<compile_context>
chip_gen: v7x
topology: tpu7x:2x2x1
jax: 0.10.0
libtpu: 0.0.40
codegen_flags: <defaults>
</compile_context>

<pallas_src>
import jax
import jax.numpy as jnp
from jax import lax
from jax.experimental import pallas as pl
from jax.experimental.pallas import tpu as pltpu

F1 = 8                     # first temporal filter bank
D = 2                      # depth multiplier
F2 = D * F1                # 16
K2 = 16                    # second (grouped) temporal kernel width
PROJ_DIM = 1024
N_CLASSES = 40

FEAT_PARAMS = ["w2s_t", "w1t", "c1", "w3s_t", "c2", "wd", "b4", "w5s_t", "c3"]
HEAD_PARAMS = ["wp1", "bp1", "wp2", "bp2", "lng", "lnb", "wc", "bc"]


def _fs(shape):
    """Full-array BlockSpec (same block every grid step)."""
    nd = len(shape)
    return pl.BlockSpec(shape, lambda *_, nd=nd: (0,) * nd)


def _elu(x):
    # PyTorch ELU(alpha=1): x if x > 0 else exp(x) - 1   (overflow-safe form)
    return jnp.where(x > 0, x, jnp.exp(jnp.minimum(x, 0.0)) - 1.0)


def _gelu_erf(x):
    # Exact-erf GELU via the Abramowitz & Stegun 7.1.26 polynomial
    # (|err| < 1.5e-7), built only from exp/mul/add/div so it lowers cleanly
    # in Mosaic (lax.erf has no TPU-Pallas lowering).  Transcendentals land on
    # the otherwise-idle EUP slot of this matmul-dominated kernel.
    z = x * 0.7071067811865476
    a = jnp.abs(z)
    t = 1.0 / (1.0 + 0.3275911 * a)
    poly = t * (0.254829592 + t * (-0.284496736 + t * (1.421413741
                + t * (-1.453152027 + t * 1.061405429))))
    erf_abs = 1.0 - poly * jnp.exp(-a * a)
    erf = jnp.where(z >= 0, erf_abs, -erf_abs)
    return 0.5 * x * (1.0 + erf)


def _pool_matrix(n_out, factor):
    # (n_out, n_out*factor) average-pooling matrix built in-kernel from iota:
    # no O(T^2) HBM parameter / DMA; applied on the MXU with M = time rows.
    n_in = n_out * factor
    row = lax.broadcasted_iota(jnp.int32, (n_out, n_in), 0)
    col = lax.broadcasted_iota(jnp.int32, (n_out, n_in), 1)
    lo = row * factor
    mask = (col >= lo) & (col < lo + factor)
    return jnp.where(mask, 1.0 / factor, 0.0)


# ---------------------------------------------------------------------------
# Kernel 1: EEGNet conv tower, BB samples per grid step, time-major tiles.
# ---------------------------------------------------------------------------
def eegnet_features_kernel(x_ref, w2s_t_ref, w1t_ref, c1_ref, w3s_t_ref,
                           c2_ref, wd_ref, b4_ref, w5s_t_ref, c3_ref,
                           out_ref, xp_ref, z_ref, g_ref):
    bb, T, C = x_ref.shape
    K1 = w1t_ref.shape[0]
    pad_l = K1 // 2                 # ZeroPad2d left
    pad_r = pad_l - 1               # ZeroPad2d right
    tp1 = T + K1 - 1
    t4 = T // 4
    t32 = T // 32
    pad2_l = K2 // 2                # 8
    pad2_r = K2 // 2 - 1            # 7

    # ---- stage 1a: per-sample zero padding.  Samples are stacked along the
    # sublane (time) axis; only the pad rows are memset (the data rows are
    # fully overwritten), and padding is redone every grid step so the kernel
    # stays correct when the batch axis is sharded across cores ("parallel").
    for b in range(bb):
        base = b * tp1
        xp_ref[base:base + pad_l, :] = jnp.zeros((pad_l, C), jnp.float32)
        xp_ref[base + pad_l:base + pad_l + T, :] = x_ref[b]
        if pad_r > 0:
            xp_ref[base + pad_l + T:base + tp1, :] = (
                jnp.zeros((pad_r, C), jnp.float32))

    # ---- stage 1b: channel reduction of the fused
    # (temporal conv o BN1 o depthwise spatial conv): ONE MXU matmul with
    # M = bb*(T+K1-1).  w2s_t already carries the BN1 scale.
    z_ref[...] = jnp.dot(xp_ref[...], w2s_t_ref[...],
                         preferred_element_type=jnp.float32)

    p4 = _pool_matrix(t4, 4)        # (T//4, T)
    p8 = _pool_matrix(t32, 8)       # (T//32, T//4)

    for b in range(bb):             # static, small unroll
        base = b * tp1

        # ---- stage 1c: K1-tap temporal correlation on the reduced (T, F1)
        # tile; vreg-resident accumulator carried through a fori_loop.
        def tap(k, acc, base=base):
            zk = z_ref[pl.ds(base + k, T), :]        # (T, F1)
            wk = w1t_ref[pl.ds(k, 1), :]             # (1, F1)
            return acc + zk * wk

        h = lax.fori_loop(0, K1, tap, jnp.zeros((T, F1), jnp.float32))
        h = h + c1_ref[...]         # fused conv1/BN1/depthwise bias term

        # ---- pointwise F1->F2 (BN2 folded) + ELU + AvgPool(1, 4) ----
        a = _elu(jnp.dot(h, w3s_t_ref[...],
                         preferred_element_type=jnp.float32) + c2_ref[...])
        pooled = jnp.dot(p4, a, preferred_element_type=jnp.float32)  # (T//4, F2)

        # ---- ZeroPad2d((8, 7)) + grouped Conv2d(F2, F2, (1,16), groups=F1):
        # 16 shifted windows stacked on the lane axis and contracted in ONE
        # (T//4, 16*F2) x (16*F2, F2) matmul (zero-masked dense weight: exact).
        g_ref[0:pad2_l, :] = jnp.zeros((pad2_l, F2), jnp.float32)
        g_ref[pad2_l:pad2_l + t4, :] = pooled
        g_ref[pad2_l + t4:pad2_l + t4 + pad2_r, :] = (
            jnp.zeros((pad2_r, F2), jnp.float32))
        s = jnp.concatenate([g_ref[k:k + t4, :] for k in range(K2)], axis=1)
        u = jnp.dot(s, wd_ref[...],
                    preferred_element_type=jnp.float32) + b4_ref[...]

        # ---- pointwise F2->F2 (BN3 folded) + ELU + AvgPool(1, 8) ----
        v = _elu(jnp.dot(u, w5s_t_ref[...],
                         preferred_element_type=jnp.float32) + c3_ref[...])
        out_ref[b] = jnp.dot(p8, v, preferred_element_type=jnp.float32)  # (T//32, F2)


# ---------------------------------------------------------------------------
# Kernel 2: fused projection head, batch-tiled.
#   h = feat @ Wp1 + b ; y = h + (GELU(h) @ Wp2 + b2) ; emb = LN(y);
#   logits = emb @ Wc + bc
# ---------------------------------------------------------------------------
def proj_head_kernel(feat_ref, wp1_ref, bp1_ref, wp2_ref, bp2_ref,
                     lng_ref, lnb_ref, wc_ref, bc_ref, emb_ref, logit_ref):
    h = jnp.dot(feat_ref[...], wp1_ref[...],
                preferred_element_type=jnp.float32) + bp1_ref[...]
    r = jnp.dot(_gelu_erf(h), wp2_ref[...],
                preferred_element_type=jnp.float32) + bp2_ref[...]
    y = h + r                                        # ResidualAdd (Dropout = id)
    mu = jnp.mean(y, axis=-1, keepdims=True)
    var = jnp.mean((y - mu) * (y - mu), axis=-1, keepdims=True)
    yn = (y - mu) * lax.rsqrt(var + 1e-5)            # LayerNorm(1024), eps=1e-5
    yn = yn * lng_ref[...] + lnb_ref[...]
    emb_ref[...] = yn
    logit_ref[...] = jnp.dot(yn, wc_ref[...],
                             preferred_element_type=jnp.float32) + bc_ref[...]


# ---------------------------------------------------------------------------
# Wrapper
# ---------------------------------------------------------------------------
def eegnet_forward(x, p, strategy="R+C", feat_block_b=4):
    """x: (B, temporal, num_channels) -- same convention as the PyTorch forward."""
    B, T, C = x.shape
    assert T % 32 == 0, "temporal length must be a multiple of 32"
    K1 = p["w1t"].shape[0]
    assert K1 == T // 2 and K1 % 2 == 0, "params were folded for a different T"
    T32 = T // 32
    E = F2 * T32
    Tp1 = T + K1 - 1

    # largest divisor of B that is <= feat_block_b (samples per grid step)
    bb = max(d for d in range(1, min(feat_block_b, B) + 1) if B % d == 0)

    feats = pl.pallas_call(
        eegnet_features_kernel,
        out_shape=jax.ShapeDtypeStruct((B, T32, F2), jnp.float32),
        grid=(B // bb,),
        in_specs=[pl.BlockSpec((bb, T, C), lambda i: (i, 0, 0))]
                 + [_fs(p[n].shape) for n in FEAT_PARAMS],
        out_specs=pl.BlockSpec((bb, T32, F2), lambda i: (i, 0, 0)),
        scratch_shapes=[pltpu.VMEM((bb * Tp1, C), jnp.float32),   # padded input
                        pltpu.VMEM((bb * Tp1, F1), jnp.float32),  # channel-reduced
                        pltpu.VMEM((T // 4 + K2 - 1, F2), jnp.float32)],
        compiler_params=pltpu.CompilerParams(
            dimension_semantics=("parallel",),
            vmem_limit_bytes=32 * 1024 * 1024),
    )(x.astype(jnp.float32), *[p[n] for n in FEAT_PARAMS])

    # Contiguous (free) flatten in time-major order (t*F2 + f).  wp1's rows
    # were permuted host-side (fold_params) so this exactly reproduces
    # PyTorch's view(B, -1) followed by the first projection Linear.
    feat2d = feats.reshape(B, E)

    bm = B if B <= 256 else 256
    assert B % bm == 0, "batch must be a multiple of 256 when B > 256"
    emb, logits = pl.pallas_call(
        proj_head_kernel,
        out_shape=(jax.ShapeDtypeStruct((B, PROJ_DIM), jnp.float32),
                   jax.ShapeDtypeStruct((B, N_CLASSES), jnp.float32)),
        grid=(B // bm,),
        in_specs=[pl.BlockSpec((bm, E), lambda i: (i, 0))]
                 + [_fs(p[n].shape) for n in HEAD_PARAMS],
        out_specs=(pl.BlockSpec((bm, PROJ_DIM), lambda i: (i, 0)),
                   pl.BlockSpec((bm, N_CLASSES), lambda i: (i, 0))),
        compiler_params=pltpu.CompilerParams(
            dimension_semantics=("parallel",),
            vmem_limit_bytes=32 * 1024 * 1024),
    )(feat2d, *[p[n] for n in HEAD_PARAMS])

    if strategy in ("retrieval", "pretraining"):
        return emb
    if strategy == "classify":
        return logits
    if strategy == "R+C":
        return emb, logits
    raise ValueError("Unknown strategy")


# ---------------------------------------------------------------------------
# Parameters: PyTorch-shaped raw params + exact eval-mode folding.
# ---------------------------------------------------------------------------
def make_raw_params(key, num_channels, temporal, proj_dim=PROJ_DIM,
                    n_classes=N_CLASSES):
    """Random parameters in the PyTorch module's native shapes."""
    C, T = num_channels, temporal
    K1 = T // 2
    E = F2 * (T // 32)
    ks = iter(jax.random.split(key, 40))

    def nrm(shape, scale=0.1):
        return (scale * jax.random.normal(next(ks), shape)).astype(jnp.float32)

    def unif(shape, lo, hi):
        return jax.random.uniform(next(ks), shape, jnp.float32, lo, hi)

    def bn(n):
        return dict(gamma=unif((n,), 0.8, 1.2), beta=nrm((n,)),
                    mean=nrm((n,)), var=unif((n,), 0.5, 1.5))

    r = {}
    r["conv1_w"], r["conv1_b"] = nrm((F1, 1, 1, K1)), nrm((F1,))    # Conv2d(1,F1,(1,K1))
    r["bn1"] = bn(F1)
    r["dw_w"], r["dw_b"] = nrm((F1, 1, C, 1)), nrm((F1,))           # depthwise (C,1)
    r["pw1_w"], r["pw1_b"] = nrm((F2, F1, 1, 1)), nrm((F2,))        # pointwise F1->F2
    r["bn2"] = bn(F2)
    r["gc_w"], r["gc_b"] = nrm((F2, D, 1, K2)), nrm((F2,))          # grouped (1,16)
    r["pw2_w"], r["pw2_b"] = nrm((F2, F2, 1, 1)), nrm((F2,))        # pointwise F2->F2
    r["bn3"] = bn(F2)
    r["proj1_w"], r["proj1_b"] = nrm((proj_dim, E), 0.05), nrm((proj_dim,), 0.05)
    r["proj2_w"], r["proj2_b"] = nrm((proj_dim, proj_dim), 0.02), nrm((proj_dim,), 0.05)
    r["ln_g"], r["ln_b"] = unif((proj_dim,), 0.8, 1.2), nrm((proj_dim,), 0.05)
    r["cls_w"], r["cls_b"] = nrm((n_classes, proj_dim), 0.02), nrm((n_classes,), 0.05)
    # self.fc, logit_scale and ClipLoss are unused by forward() -> omitted.
    return r


def fold_params(r, num_channels, temporal, proj_dim=PROJ_DIM):
    """Fold BatchNorms into adjacent convs and pre-arrange weights for the
    time-major Pallas kernels.  Exact for eval-mode semantics."""
    C, T = num_channels, temporal
    T32 = T // 32
    E = F2 * T32
    eps = 1e-5

    def bn_fold(bn):
        s = bn["gamma"] * lax.rsqrt(bn["var"] + eps)
        return s, bn["beta"] - bn["mean"] * s

    s1, t1 = bn_fold(r["bn1"])
    s2, t2 = bn_fold(r["bn2"])
    s3, t3 = bn_fold(r["bn3"])

    w1 = r["conv1_w"][:, 0, 0, :]          # (F1, K1)
    b1 = r["conv1_b"]
    w2 = r["dw_w"][:, 0, :, 0]             # (F1, C)
    b2 = r["dw_b"]
    w3 = r["pw1_w"][:, :, 0, 0]            # (F2, F1)
    b3 = r["pw1_b"]
    w5 = r["pw2_w"][:, :, 0, 0]            # (F2, F2)
    b5 = r["pw2_b"]

    p = {}
    # fused temporal-conv x BN1 x depthwise-spatial-conv:
    #   h[t,f] = sum_k w1[f,k] * Z[t+k,f] + c1[f],  Z = xpad @ (s1*w2)^T
    p["w2s_t"] = jnp.transpose(w2 * s1[:, None])                 # (C, F1)
    p["w1t"] = jnp.transpose(w1)                                 # (K1, F1)
    p["c1"] = (b2 + (s1 * b1 + t1) * jnp.sum(w2, axis=1))[None, :]   # (1, F1)
    # pointwise F1->F2 with BN2 folded
    p["w3s_t"] = jnp.transpose(w3 * s2[:, None])                 # (F1, F2)
    p["c2"] = (s2 * b3 + t2)[None, :]                            # (1, F2)
    # grouped (1,16) conv -> zero-masked dense (K2*F2, F2); row index = k*F2+i
    wg = r["gc_w"][:, :, 0, :]                                   # (F2, D, K2)
    wd = jnp.zeros((K2, F2, F2), jnp.float32)                    # (k, i_in, o)
    for o in range(F2):
        g0 = (o // D) * D
        for j in range(D):
            wd = wd.at[:, g0 + j, o].set(wg[o, j, :])
    p["wd"] = wd.reshape(K2 * F2, F2)
    p["b4"] = r["gc_b"][None, :]
    # pointwise F2->F2 with BN3 folded
    p["w5s_t"] = jnp.transpose(w5 * s3[:, None])                 # (F2, F2)
    p["c3"] = (s3 * b5 + t3)[None, :]
    # Proj_eeg / classifier, stored for x @ W.  wp1 rows are permuted from the
    # PyTorch flatten order (f*T32 + t) to the kernel's time-major flatten
    # order (t*F2 + f) so the forwards are mathematically identical.
    wp1_pt = jnp.transpose(r["proj1_w"])                         # (E, P)
    p["wp1"] = (wp1_pt.reshape(F2, T32, proj_dim)
                .transpose(1, 0, 2).reshape(E, proj_dim))
    p["bp1"] = r["proj1_b"][None, :]
    p["wp2"] = jnp.transpose(r["proj2_w"])
    p["bp2"] = r["proj2_b"][None, :]
    p["lng"] = r["ln_g"][None, :]
    p["lnb"] = r["ln_b"][None, :]
    p["wc"] = jnp.transpose(r["cls_w"])
    p["bc"] = r["cls_b"][None, :]
    return p


if __name__ == "__main__":
    B, C, T = 8, 4, 64          # batch, num_channels, temporal (T % 32 == 0)
    key = jax.random.PRNGKey(0)
    kx, kp = jax.random.split(key)
    x = jax.random.normal(kx, (B, T, C), jnp.float32)   # (batch, temporal, channels)
    raw = make_raw_params(kp, num_channels=C, temporal=T)
    params = fold_params(raw, num_channels=C, temporal=T)

    emb, logits = eegnet_forward(x, params, strategy="R+C")
    jax.block_until_ready((emb, logits))
    assert emb.shape == (B, PROJ_DIM) and logits.shape == (B, N_CLASSES)
    assert bool(jnp.all(jnp.isfinite(emb))) and bool(jnp.all(jnp.isfinite(logits)))
    print("KERNEL_OK")
</pallas_src>

<mosaic_0001>
module attributes {stable_mosaic.version = 11 : i64} {
  func.func @eegnet_features_kernel(%arg0: i32, %arg1: memref<4x64x4xf32, #tpu.memory_space<vmem>>, %arg2: memref<4x8xf32, #tpu.memory_space<vmem>>, %arg3: memref<32x8xf32, #tpu.memory_space<vmem>>, %arg4: memref<1x8xf32, #tpu.memory_space<vmem>>, %arg5: memref<8x16xf32, #tpu.memory_space<vmem>>, %arg6: memref<1x16xf32, #tpu.memory_space<vmem>>, %arg7: memref<256x16xf32, #tpu.memory_space<vmem>>, %arg8: memref<1x16xf32, #tpu.memory_space<vmem>>, %arg9: memref<16x16xf32, #tpu.memory_space<vmem>>, %arg10: memref<1x16xf32, #tpu.memory_space<vmem>>, %arg11: memref<4x2x16xf32, #tpu.memory_space<vmem>>, %arg12: memref<380x4xf32, #tpu.memory_space<vmem>>, %arg13: memref<380x8xf32, #tpu.memory_space<vmem>>, %arg14: memref<31x16xf32, #tpu.memory_space<vmem>>) attributes {dimension_semantics = [#tpu.dimension_semantics<parallel>], iteration_bounds = array<i64: 2>, scalar_prefetch = 0 : i64, scratch_operands = 3 : i64, tpu.core_type = #tpu.core_type<tc>, window_params = [{transform_indices = @transform_0, window_bounds = array<i64: 4, 64, 4>}, {pipeline_mode = #tpu.pipeline_mode<synchronous>, transform_indices = @transform_1, window_bounds = array<i64: 4, 8>}, {pipeline_mode = #tpu.pipeline_mode<synchronous>, transform_indices = @transform_2, window_bounds = array<i64: 32, 8>}, {pipeline_mode = #tpu.pipeline_mode<synchronous>, transform_indices = @transform_3, window_bounds = array<i64: 1, 8>}, {pipeline_mode = #tpu.pipeline_mode<synchronous>, transform_indices = @transform_4, window_bounds = array<i64: 8, 16>}, {pipeline_mode = #tpu.pipeline_mode<synchronous>, transform_indices = @transform_5, window_bounds = array<i64: 1, 16>}, {pipeline_mode = #tpu.pipeline_mode<synchronous>, transform_indices = @transform_6, window_bounds = array<i64: 256, 16>}, {pipeline_mode = #tpu.pipeline_mode<synchronous>, transform_indices = @transform_7, window_bounds = array<i64: 1, 16>}, {pipeline_mode = #tpu.pipeline_mode<synchronous>, transform_indices = @transform_8, window_bounds = array<i64: 16, 16>}, {pipeline_mode = #tpu.pipeline_mode<synchronous>, transform_indices = @transform_9, window_bounds = array<i64: 1, 16>}, {transform_indices = @transform_10, window_bounds = array<i64: 4, 2, 16>}]} {
    %cst = arith.constant 0.000000e+00 : f32
    %0 = vector.broadcast %cst : f32 to vector<16x4xf32>
    %c0 = arith.constant 0 : index
    %c0_0 = arith.constant 0 : index
    %1 = vector.load %arg12[%c0, %c0_0] : memref<380x4xf32, #tpu.memory_space<vmem>>, vector<16x4xf32>
    tpu.vector_store %arg12[%c0, %c0_0], %0 {strides = array<i32>} : memref<380x4xf32, #tpu.memory_space<vmem>>, vector<16x4xf32>,
    %c0_1 = arith.constant 0 : index
    %c0_2 = arith.constant 0 : index
    %c0_3 = arith.constant 0 : index
    %2 = vector.load %arg1[%c0_1, %c0_2, %c0_3] : memref<4x64x4xf32, #tpu.memory_space<vmem>>, vector<1x64x4xf32>
    %3 = vector.shape_cast %2 : vector<1x64x4xf32> to vector<64x4xf32>
    %c16 = arith.constant 16 : index
    %c0_4 = arith.constant 0 : index
    %4 = vector.load %arg12[%c16, %c0_4] : memref<380x4xf32, #tpu.memory_space<vmem>>, vector<64x4xf32>
    tpu.vector_store %arg12[%c16, %c0_4], %3 {strides = array<i32>} : memref<380x4xf32, #tpu.memory_space<vmem>>, vector<64x4xf32>,
    %cst_5 = arith.constant 0.000000e+00 : f32
    %5 = vector.broadcast %cst_5 : f32 to vector<15x4xf32>
    %c80 = arith.constant 80 : index
    %c0_6 = arith.constant 0 : index
    %6 = vector.load %arg12[%c80, %c0_6] : memref<380x4xf32, #tpu.memory_space<vmem>>, vector<15x4xf32>
    tpu.vector_store %arg12[%c80, %c0_6], %5 {strides = array<i32>} : memref<380x4xf32, #tpu.memory_space<vmem>>, vector<15x4xf32>,
    %cst_7 = arith.constant 0.000000e+00 : f32
    %7 = vector.broadcast %cst_7 : f32 to vector<16x4xf32>
    %c95 = arith.constant 95 : index
    %c0_8 = arith.constant 0 : index
    %8 = vector.load %arg12[%c95, %c0_8] : memref<380x4xf32, #tpu.memory_space<vmem>>, vector<16x4xf32>
    tpu.vector_store %arg12[%c95, %c0_8], %7 {strides = array<i32>} : memref<380x4xf32, #tpu.memory_space<vmem>>, vector<16x4xf32>,
    %c1 = arith.constant 1 : index
    %c0_9 = arith.constant 0 : index
    %c0_10 = arith.constant 0 : index
    %9 = vector.load %arg1[%c1, %c0_9, %c0_10] : memref<4x64x4xf32, #tpu.memory_space<vmem>>, vector<1x64x4xf32>
    %10 = vector.shape_cast %9 : vector<1x64x4xf32> to vector<64x4xf32>
    %c111 = arith.constant 111 : index
    %c0_11 = arith.constant 0 : index
    %11 = vector.load %arg12[%c111, %c0_11] : memref<380x4xf32, #tpu.memory_space<vmem>>, vector<64x4xf32>
    tpu.vector_store %arg12[%c111, %c0_11], %10 {strides = array<i32>} : memref<380x4xf32, #tpu.memory_space<vmem>>, vector<64x4xf32>,
    %cst_12 = arith.constant 0.000000e+00 : f32
    %12 = vector.broadcast %cst_12 : f32 to vector<15x4xf32>
    %c175 = arith.constant 175 : index
    %c0_13 = arith.constant 0 : index
    %13 = vector.load %arg12[%c175, %c0_13] : memref<380x4xf32, #tpu.memory_space<vmem>>, vector<15x4xf32>
    tpu.vector_store %arg12[%c175, %c0_13], %12 {strides = array<i32>} : memref<380x4xf32, #tpu.memory_space<vmem>>, vector<15x4xf32>,
    %cst_14 = arith.constant 0.000000e+00 : f32
    %14 = vector.broadcast %cst_14 : f32 to vector<16x4xf32>
    %c190 = arith.constant 190 : index
    %c0_15 = arith.constant 0 : index
    %15 = vector.load %arg12[%c190, %c0_15] : memref<380x4xf32, #tpu.memory_space<vmem>>, vector<16x4xf32>
    tpu.vector_store %arg12[%c190, %c0_15], %14 {strides = array<i32>} : memref<380x4xf32, #tpu.memory_space<vmem>>, vector<16x4xf32>,
    %c2 = arith.constant 2 : index
    %c0_16 = arith.constant 0 : index
    %c0_17 = arith.constant 0 : index
    %16 = vector.load %arg1[%c2, %c0_16, %c0_17] : memref<4x64x4xf32, #tpu.memory_space<vmem>>, vector<1x64x4xf32>
    %17 = vector.shape_cast %16 : vector<1x64x4xf32> to vector<64x4xf32>
    %c206 = arith.constant 206 : index
    %c0_18 = arith.constant 0 : index
    %18 = vector.load %arg12[%c206, %c0_18] : memref<380x4xf32, #tpu.memory_space<vmem>>, vector<64x4xf32>
    tpu.vector_store %arg12[%c206, %c0_18], %17 {strides = array<i32>} : memref<380x4xf32, #tpu.memory_space<vmem>>, vector<64x4xf32>,
    %cst_19 = arith.constant 0.000000e+00 : f32
    %19 = vector.broadcast %cst_19 : f32 to vector<15x4xf32>
    %c270 = arith.constant 270 : index
    %c0_20 = arith.constant 0 : index
    %20 = vector.load %arg12[%c270, %c0_20] : memref<380x4xf32, #tpu.memory_space<vmem>>, vector<15x4xf32>
    tpu.vector_store %arg12[%c270, %c0_20], %19 {strides = array<i32>} : memref<380x4xf32, #tpu.memory_space<vmem>>, vector<15x4xf32>,
    %cst_21 = arith.constant 0.000000e+00 : f32
    %21 = vector.broadcast %cst_21 : f32 to vector<16x4xf32>
    %c285 = arith.constant 285 : index
    %c0_22 = arith.constant 0 : index
    %22 = vector.load %arg12[%c285, %c0_22] : memref<380x4xf32, #tpu.memory_space<vmem>>, vector<16x4xf32>
    tpu.vector_store %arg12[%c285, %c0_22], %21 {strides = array<i32>} : memref<380x4xf32, #tpu.memory_space<vmem>>, vector<16x4xf32>,
    %c3 = arith.constant 3 : index
    %c0_23 = arith.constant 0 : index
    %c0_24 = arith.constant 0 : index
    %23 = vector.load %arg1[%c3, %c0_23, %c0_24] : memref<4x64x4xf32, #tpu.memory_space<vmem>>, vector<1x64x4xf32>
    %24 = vector.shape_cast %23 : vector<1x64x4xf32> to vector<64x4xf32>
    %c301 = arith.constant 301 : index
    %c0_25 = arith.constant 0 : index
    %25 = vector.load %arg12[%c301, %c0_25] : memref<380x4xf32, #tpu.memory_space<vmem>>, vector<64x4xf32>
    tpu.vector_store %arg12[%c301, %c0_25], %24 {strides = array<i32>} : memref<380x4xf32, #tpu.memory_space<vmem>>, vector<64x4xf32>,
    %cst_26 = arith.constant 0.000000e+00 : f32
    %26 = vector.broadcast %cst_26 : f32 to vector<15x4xf32>
    %c365 = arith.constant 365 : index
    %c0_27 = arith.constant 0 : index
    %27 = vector.load %arg12[%c365, %c0_27] : memref<380x4xf32, #tpu.memory_space<vmem>>, vector<15x4xf32>
    tpu.vector_store %arg12[%c365, %c0_27], %26 {strides = array<i32>} : memref<380x4xf32, #tpu.memory_space<vmem>>, vector<15x4xf32>,
    %c0_28 = arith.constant 0 : index
    %c0_29 = arith.constant 0 : index
    %28 = vector.load %arg12[%c0_28, %c0_29] : memref<380x4xf32, #tpu.memory_space<vmem>>, vector<380x4xf32>
    %c0_30 = arith.constant 0 : index
    %c0_31 = arith.constant 0 : index
    %29 = vector.load %arg2[%c0_30, %c0_31] : memref<4x8xf32, #tpu.memory_space<vmem>>, vector<4x8xf32>
    %cst_32 = arith.constant dense<0.000000e+00> : vector<380x8xf32>
    %30 = tpu.matmul %28, %29, %cst_32 {dimension_numbers = #tpu.dot_dimension_numbers<[1], [0], [0], [1], [0, 0, 1, 1], [], []>} : vector<380x4xf32>, vector<4x8xf32>, vector<380x8xf32> -> vector<380x8xf32>
    %c0_33 = arith.constant 0 : index
    %c0_34 = arith.constant 0 : index
    %31 = vector.load %arg13[%c0_33, %c0_34] : memref<380x8xf32, #tpu.memory_space<vmem>>, vector<380x8xf32>
    tpu.vector_store %arg13[%c0_33, %c0_34], %30 {strides = array<i32>} : memref<380x8xf32, #tpu.memory_space<vmem>>, vector<380x8xf32>,
    %32 = tpu.iota {dimensions = array<i32: 0>} : vector<16x64xi32>
    %33 = tpu.iota {dimensions = array<i32: 1>} : vector<16x64xi32>
    %c4_i32 = arith.constant 4 : i32
    %34 = vector.broadcast %c4_i32 : i32 to vector<16x64xi32>
    %35 = arith.muli %32, %34 : vector<16x64xi32>
    %36 = arith.cmpi sge, %33, %35 : vector<16x64xi32>
    %c4_i32_35 = arith.constant 4 : i32
    %37 = vector.broadcast %c4_i32_35 : i32 to vector<16x64xi32>
    %38 = arith.addi %35, %37 : vector<16x64xi32>
    %39 = arith.cmpi slt, %33, %38 : vector<16x64xi32>
    %40 = arith.andi %36, %39 : vector<16x64xi1>
    %cst_36 = arith.constant 2.500000e-01 : f32
    %cst_37 = arith.constant 0.000000e+00 : f32
    %41 = vector.broadcast %cst_36 : f32 to vector<16x64xf32>
    %42 = vector.broadcast %cst_37 : f32 to vector<16x64xf32>
    %43 = arith.select %40, %41, %42 : vector<16x64xi1>, vector<16x64xf32>
    %44 = tpu.iota {dimensions = array<i32: 0>} : vector<2x16xi32>
    %45 = tpu.iota {dimensions = array<i32: 1>} : vector<2x16xi32>
    %c8_i32 = arith.constant 8 : i32
    %46 = vector.broadcast %c8_i32 : i32 to vector<2x16xi32>
    %47 = arith.muli %44, %46 : vector<2x16xi32>
    %48 = arith.cmpi sge, %45, %47 : vector<2x16xi32>
    %c8_i32_38 = arith.constant 8 : i32
    %49 = vector.broadcast %c8_i32_38 : i32 to vector<2x16xi32>
    %50 = arith.addi %47, %49 : vector<2x16xi32>
    %51 = arith.cmpi slt, %45, %50 : vector<2x16xi32>
    %52 = arith.andi %48, %51 : vector<2x16xi1>
    %cst_39 = arith.constant 1.250000e-01 : f32
    %cst_40 = arith.constant 0.000000e+00 : f32
    %53 = vector.broadcast %cst_39 : f32 to vector<2x16xf32>
    %54 = vector.broadcast %cst_40 : f32 to vector<2x16xf32>
    %55 = arith.select %52, %53, %54 : vector<2x16xi1>, vector<2x16xf32>
    %cst_41 = arith.constant 0.000000e+00 : f32
    %56 = vector.broadcast %cst_41 : f32 to vector<64x8xf32>
    %c0_i32 = arith.constant 0 : i32
    %c32_i32 = arith.constant 32 : i32
    %57 = arith.addi %c0_i32, %c32_i32 : i32
    %c1_i32 = arith.constant 1 : i32
    %58 = scf.for %arg15 = %c0_i32 to %57 step %c1_i32 iter_args(%arg16 = %56) -> (vector<64x8xf32>)  : i32 {
      %c0_i32_317 = arith.constant 0 : i32
      %312 = arith.addi %c0_i32_317, %arg15 : i32
      %313 = arith.index_cast %312 : i32 to index
      %c0_318 = arith.constant 0 : index
      %314 = vector.load %arg13[%313, %c0_318] : memref<380x8xf32, #tpu.memory_space<vmem>>, vector<64x8xf32>
      %315 = arith.index_cast %arg15 : i32 to index
      %c0_319 = arith.constant 0 : index
      %316 = vector.load %arg3[%315, %c0_319] : memref<32x8xf32, #tpu.memory_space<vmem>>, vector<1x8xf32>
      %317 = vector.broadcast %316 : vector<1x8xf32> to vector<64x8xf32>
      %318 = arith.mulf %314, %317 : vector<64x8xf32>
      %319 = arith.addf %arg16, %318 : vector<64x8xf32>
      scf.yield %319 : vector<64x8xf32>
    }
    %c32_i32_42 = arith.constant 32 : i32
    %c0_43 = arith.constant 0 : index
    %c0_44 = arith.constant 0 : index
    %59 = vector.load %arg4[%c0_43, %c0_44] : memref<1x8xf32, #tpu.memory_space<vmem>>, vector<1x8xf32>
    %60 = vector.broadcast %59 : vector<1x8xf32> to vector<64x8xf32>
    %61 = arith.addf %58, %60 : vector<64x8xf32>
    %c0_45 = arith.constant 0 : index
    %c0_46 = arith.constant 0 : index
    %62 = vector.load %arg5[%c0_45, %c0_46] : memref<8x16xf32, #tpu.memory_space<vmem>>, vector<8x16xf32>
    %cst_47 = arith.constant dense<0.000000e+00> : vector<64x16xf32>
    %63 = tpu.matmul %61, %62, %cst_47 {dimension_numbers = #tpu.dot_dimension_numbers<[1], [0], [0], [1], [0, 0, 1, 1], [], []>} : vector<64x8xf32>, vector<8x16xf32>, vector<64x16xf32> -> vector<64x16xf32>
    %c0_48 = arith.constant 0 : index
    %c0_49 = arith.constant 0 : index
    %64 = vector.load %arg6[%c0_48, %c0_49] : memref<1x16xf32, #tpu.memory_space<vmem>>, vector<1x16xf32>
    %65 = vector.broadcast %64 : vector<1x16xf32> to vector<64x16xf32>
    %66 = arith.addf %63, %65 : vector<64x16xf32>
    %cst_50 = arith.constant 0.000000e+00 : f32
    %67 = vector.broadcast %cst_50 : f32 to vector<64x16xf32>
    %68 = arith.cmpf ogt, %66, %67 : vector<64x16xf32>
    %cst_51 = arith.constant 0.000000e+00 : f32
    %69 = vector.broadcast %cst_51 : f32 to vector<64x16xf32>
    %70 = arith.minimumf %66, %69 : vector<64x16xf32>
    %71 = math.exp %70 : vector<64x16xf32>
    %cst_52 = arith.constant 1.000000e+00 : f32
    %72 = vector.broadcast %cst_52 : f32 to vector<64x16xf32>
    %73 = arith.subf %71, %72 : vector<64x16xf32>
    %74 = arith.select %68, %66, %73 : vector<64x16xi1>, vector<64x16xf32>
    %cst_53 = arith.constant dense<0.000000e+00> : vector<16x16xf32>
    %75 = tpu.matmul %43, %74, %cst_53 {dimension_numbers = #tpu.dot_dimension_numbers<[1], [0], [0], [1], [0, 0, 1, 1], [], []>} : vector<16x64xf32>, vector<64x16xf32>, vector<16x16xf32> -> vector<16x16xf32>
    %cst_54 = arith.constant 0.000000e+00 : f32
    %76 = vector.broadcast %cst_54 : f32 to vector<8x16xf32>
    %c0_55 = arith.constant 0 : index
    %c0_56 = arith.constant 0 : index
    %77 = vector.load %arg14[%c0_55, %c0_56] : memref<31x16xf32, #tpu.memory_space<vmem>>, vector<8x16xf32>
    tpu.vector_store %arg14[%c0_55, %c0_56], %76 {strides = array<i32>} : memref<31x16xf32, #tpu.memory_space<vmem>>, vector<8x16xf32>,
    %c8 = arith.constant 8 : index
    %c0_57 = arith.constant 0 : index
    %78 = vector.load %arg14[%c8, %c0_57] : memref<31x16xf32, #tpu.memory_space<vmem>>, vector<16x16xf32>
    tpu.vector_store %arg14[%c8, %c0_57], %75 {strides = array<i32>} : memref<31x16xf32, #tpu.memory_space<vmem>>, vector<16x16xf32>,
    %cst_58 = arith.constant 0.000000e+00 : f32
    %79 = vector.broadcast %cst_58 : f32 to vector<7x16xf32>
    %c24 = arith.constant 24 : index
    %c0_59 = arith.constant 0 : index
    %80 = vector.load %arg14[%c24, %c0_59] : memref<31x16xf32, #tpu.memory_space<vmem>>, vector<7x16xf32>
    tpu.vector_store %arg14[%c24, %c0_59], %79 {strides = array<i32>} : memref<31x16xf32, #tpu.memory_space<vmem>>, vector<7x16xf32>,
    %c0_60 = arith.constant 0 : index
    %c0_61 = arith.constant 0 : index
    %81 = vector.load %arg14[%c0_60, %c0_61] : memref<31x16xf32, #tpu.memory_space<vmem>>, vector<16x16xf32>
    %c1_62 = arith.constant 1 : index
    %c0_63 = arith.constant 0 : index
    %82 = vector.load %arg14[%c1_62, %c0_63] : memref<31x16xf32, #tpu.memory_space<vmem>>, vector<16x16xf32>
    %c2_64 = arith.constant 2 : index
    %c0_65 = arith.constant 0 : index
    %83 = vector.load %arg14[%c2_64, %c0_65] : memref<31x16xf32, #tpu.memory_space<vmem>>, vector<16x16xf32>
    %c3_66 = arith.constant 3 : index
    %c0_67 = arith.constant 0 : index
    %84 = vector.load %arg14[%c3_66, %c0_67] : memref<31x16xf32, #tpu.memory_space<vmem>>, vector<16x16xf32>
    %c4 = arith.constant 4 : index
    %c0_68 = arith.constant 0 : index
    %85 = vector.load %arg14[%c4, %c0_68] : memref<31x16xf32, #tpu.memory_space<vmem>>, vector<16x16xf32>
    %c5 = arith.constant 5 : index
    %c0_69 = arith.constant 0 : index
    %86 = vector.load %arg14[%c5, %c0_69] : memref<31x16xf32, #tpu.memory_space<vmem>>, vector<16x16xf32>
    %c6 = arith.constant 6 : index
    %c0_70 = arith.constant 0 : index
    %87 = vector.load %arg14[%c6, %c0_70] : memref<31x16xf32, #tpu.memory_space<vmem>>, vector<16x16xf32>
    %c7 = arith.constant 7 : index
    %c0_71 = arith.constant 0 : index
    %88 = vector.load %arg14[%c7, %c0_71] : memref<31x16xf32, #tpu.memory_space<vmem>>, vector<16x16xf32>
    %c8_72 = arith.constant 8 : index
    %c0_73 = arith.constant 0 : index
    %89 = vector.load %arg14[%c8_72, %c0_73] : memref<31x16xf32, #tpu.memory_space<vmem>>, vector<16x16xf32>
    %c9 = arith.constant 9 : index
    %c0_74 = arith.constant 0 : index
    %90 = vector.load %arg14[%c9, %c0_74] : memref<31x16xf32, #tpu.memory_space<vmem>>, vector<16x16xf32>
    %c10 = arith.constant 10 : index
    %c0_75 = arith.constant 0 : index
    %91 = vector.load %arg14[%c10, %c0_75] : memref<31x16xf32, #tpu.memory_space<vmem>>, vector<16x16xf32>
    %c11 = arith.constant 11 : index
    %c0_76 = arith.constant 0 : index
    %92 = vector.load %arg14[%c11, %c0_76] : memref<31x16xf32, #tpu.memory_space<vmem>>, vector<16x16xf32>
    %c12 = arith.constant 12 : index
    %c0_77 = arith.constant 0 : index
    %93 = vector.load %arg14[%c12, %c0_77] : memref<31x16xf32, #tpu.memory_space<vmem>>, vector<16x16xf32>
    %c13 = arith.constant 13 : index
    %c0_78 = arith.constant 0 : index
    %94 = vector.load %arg14[%c13, %c0_78] : memref<31x16xf32, #tpu.memory_space<vmem>>, vector<16x16xf32>
    %c14 = arith.constant 14 : index
    %c0_79 = arith.constant 0 : index
    %95 = vector.load %arg14[%c14, %c0_79] : memref<31x16xf32, #tpu.memory_space<vmem>>, vector<16x16xf32>
    %c15 = arith.constant 15 : index
    %c0_80 = arith.constant 0 : index
    %96 = vector.load %arg14[%c15, %c0_80] : memref<31x16xf32, #tpu.memory_space<vmem>>, vector<16x16xf32>
    %97 = tpu.concatenate %81, %82, %83, %84, %85, %86, %87, %88, %89, %90, %91, %92, %93, %94, %95, %96 in 1 : vector<16x16xf32>, vector<16x16xf32>, vector<16x16xf32>, vector<16x16xf32>, vector<16x16xf32>, vector<16x16xf32>, vector<16x16xf32>, vector<16x16xf32>, vector<16x16xf32>, vector<16x16xf32>, vector<16x16xf32>, vector<16x16xf32>, vector<16x16xf32>, vector<16x16xf32>, vector<16x16xf32>, vector<16x16xf32> -> vector<16x256xf32>
    %c0_81 = arith.constant 0 : index
    %c0_82 = arith.constant 0 : index
    %98 = vector.load %arg7[%c0_81, %c0_82] : memref<256x16xf32, #tpu.memory_space<vmem>>, vector<256x16xf32>
    %cst_83 = arith.constant dense<0.000000e+00> : vector<16x16xf32>
    %99 = tpu.matmul %97, %98, %cst_83 {dimension_numbers = #tpu.dot_dimension_numbers<[1], [0], [0], [1], [0, 0, 1, 1], [], []>} : vector<16x256xf32>, vector<256x16xf32>, vector<16x16xf32> -> vector<16x16xf32>
    %c0_84 = arith.constant 0 : index
    %c0_85 = arith.constant 0 : index
    %100 = vector.load %arg8[%c0_84, %c0_85] : memref<1x16xf32, #tpu.memory_space<vmem>>, vector<1x16xf32>
    %101 = vector.broadcast %100 : vector<1x16xf32> to vector<16x16xf32>
    %102 = arith.addf %99, %101 : vector<16x16xf32>
    %c0_86 = arith.constant 0 : index
    %c0_87 = arith.constant 0 : index
    %103 = vector.load %arg9[%c0_86, %c0_87] : memref<16x16xf32, #tpu.memory_space<vmem>>, vector<16x16xf32>
    %cst_88 = arith.constant dense<0.000000e+00> : vector<16x16xf32>
    %104 = tpu.matmul %102, %103, %cst_88 {dimension_numbers = #tpu.dot_dimension_numbers<[1], [0], [0], [1], [0, 0, 1, 1], [], []>} : vector<16x16xf32>, vector<16x16xf32>, vector<16x16xf32> -> vector<16x16xf32>
    %c0_89 = arith.constant 0 : index
    %c0_90 = arith.constant 0 : index
    %105 = vector.load %arg10[%c0_89, %c0_90] : memref<1x16xf32, #tpu.memory_space<vmem>>, vector<1x16xf32>
    %106 = vector.broadcast %105 : vector<1x16xf32> to vector<16x16xf32>
    %107 = arith.addf %104, %106 : vector<16x16xf32>
    %cst_91 = arith.constant 0.000000e+00 : f32
    %108 = vector.broadcast %cst_91 : f32 to vector<16x16xf32>
    %109 = arith.cmpf ogt, %107, %108 : vector<16x16xf32>
    %cst_92 = arith.constant 0.000000e+00 : f32
    %110 = vector.broadcast %cst_92 : f32 to vector<16x16xf32>
    %111 = arith.minimumf %107, %110 : vector<16x16xf32>
    %112 = math.exp %111 : vector<16x16xf32>
    %cst_93 = arith.constant 1.000000e+00 : f32
    %113 = vector.broadcast %cst_93 : f32 to vector<16x16xf32>
    %114 = arith.subf %112, %113 : vector<16x16xf32>
    %115 = arith.select %109, %107, %114 : vector<16x16xi1>, vector<16x16xf32>
    %cst_94 = arith.constant dense<0.000000e+00> : vector<2x16xf32>
    %116 = tpu.matmul %55, %115, %cst_94 {dimension_numbers = #tpu.dot_dimension_numbers<[1], [0], [0], [1], [0, 0, 1, 1], [], []>} : vector<2x16xf32>, vector<16x16xf32>, vector<2x16xf32> -> vector<2x16xf32>
    %c0_95 = arith.constant 0 : index
    %c0_96 = arith.constant 0 : index
    %c0_97 = arith.constant 0 : index
    %117 = vector.load %arg11[%c0_95, %c0_96, %c0_97] : memref<4x2x16xf32, #tpu.memory_space<vmem>>, vector<1x2x16xf32>
    %118 = vector.shape_cast %117 : vector<1x2x16xf32> to vector<2x16xf32>
    %119 = vector.shape_cast %116 : vector<2x16xf32> to vector<1x2x16xf32>
    tpu.vector_store %arg11[%c0_95, %c0_96, %c0_97], %119 {strides = array<i32>} : memref<4x2x16xf32, #tpu.memory_space<vmem>>, vector<1x2x16xf32>,
    %cst_98 = arith.constant 0.000000e+00 : f32
    %120 = vector.broadcast %cst_98 : f32 to vector<64x8xf32>
    %c0_i32_99 = arith.constant 0 : i32
    %c32_i32_100 = arith.constant 32 : i32
    %121 = arith.addi %c0_i32_99, %c32_i32_100 : i32
    %c1_i32_101 = arith.constant 1 : i32
    %122 = scf.for %arg15 = %c0_i32_99 to %121 step %c1_i32_101 iter_args(%arg16 = %120) -> (vector<64x8xf32>)  : i32 {
      %c95_i32 = arith.constant 95 : i32
      %312 = arith.addi %c95_i32, %arg15 : i32
      %313 = arith.index_cast %312 : i32 to index
      %c0_317 = arith.constant 0 : index
      %314 = vector.load %arg13[%313, %c0_317] : memref<380x8xf32, #tpu.memory_space<vmem>>, vector<64x8xf32>
      %315 = arith.index_cast %arg15 : i32 to index
      %c0_318 = arith.constant 0 : index
      %316 = vector.load %arg3[%315, %c0_318] : memref<32x8xf32, #tpu.memory_space<vmem>>, vector<1x8xf32>
      %317 = vector.broadcast %316 : vector<1x8xf32> to vector<64x8xf32>
      %318 = arith.mulf %314, %317 : vector<64x8xf32>
      %319 = arith.addf %arg16, %318 : vector<64x8xf32>
      scf.yield %319 : vector<64x8xf32>
    }
    %c32_i32_102 = arith.constant 32 : i32
    %c0_103 = arith.constant 0 : index
    %c0_104 = arith.constant 0 : index
    %123 = vector.load %arg4[%c0_103, %c0_104] : memref<1x8xf32, #tpu.memory_space<vmem>>, vector<1x8xf32>
    %124 = vector.broadcast %123 : vector<1x8xf32> to vector<64x8xf32>
    %125 = arith.addf %122, %124 : vector<64x8xf32>
    %c0_105 = arith.constant 0 : index
    %c0_106 = arith.constant 0 : index
    %126 = vector.load %arg5[%c0_105, %c0_106] : memref<8x16xf32, #tpu.memory_space<vmem>>, vector<8x16xf32>
    %cst_107 = arith.constant dense<0.000000e+00> : vector<64x16xf32>
    %127 = tpu.matmul %125, %126, %cst_107 {dimension_numbers = #tpu.dot_dimension_numbers<[1], [0], [0], [1], [0, 0, 1, 1], [], []>} : vector<64x8xf32>, vector<8x16xf32>, vector<64x16xf32> -> vector<64x16xf32>
    %c0_108 = arith.constant 0 : index
    %c0_109 = arith.constant 0 : index
    %128 = vector.load %arg6[%c0_108, %c0_109] : memref<1x16xf32, #tpu.memory_space<vmem>>, vector<1x16xf32>
    %129 = vector.broadcast %128 : vector<1x16xf32> to vector<64x16xf32>
    %130 = arith.addf %127, %129 : vector<64x16xf32>
    %cst_110 = arith.constant 0.000000e+00 : f32
    %131 = vector.broadcast %cst_110 : f32 to vector<64x16xf32>
    %132 = arith.cmpf ogt, %130, %131 : vector<64x16xf32>
    %cst_111 = arith.constant 0.000000e+00 : f32
    %133 = vector.broadcast %cst_111 : f32 to vector<64x16xf32>
    %134 = arith.minimumf %130, %133 : vector<64x16xf32>
    %135 = math.exp %134 : vector<64x16xf32>
    %cst_112 = arith.constant 1.000000e+00 : f32
    %136 = vector.broadcast %cst_112 : f32 to vector<64x16xf32>
    %137 = arith.subf %135, %136 : vector<64x16xf32>
    %138 = arith.select %132, %130, %137 : vector<64x16xi1>, vector<64x16xf32>
    %cst_113 = arith.constant dense<0.000000e+00> : vector<16x16xf32>
    %139 = tpu.matmul %43, %138, %cst_113 {dimension_numbers = #tpu.dot_dimension_numbers<[1], [0], [0], [1], [0, 0, 1, 1], [], []>} : vector<16x64xf32>, vector<64x16xf32>, vector<16x16xf32> -> vector<16x16xf32>
    %cst_114 = arith.constant 0.000000e+00 : f32
    %140 = vector.broadcast %cst_114 : f32 to vector<8x16xf32>
    %c0_115 = arith.constant 0 : index
    %c0_116 = arith.constant 0 : index
    %141 = vector.load %arg14[%c0_115, %c0_116] : memref<31x16xf32, #tpu.memory_space<vmem>>, vector<8x16xf32>
    tpu.vector_store %arg14[%c0_115, %c0_116], %140 {strides = array<i32>} : memref<31x16xf32, #tpu.memory_space<vmem>>, vector<8x16xf32>,
    %c8_117 = arith.constant 8 : index
    %c0_118 = arith.constant 0 : index
    %142 = vector.load %arg14[%c8_117, %c0_118] : memref<31x16xf32, #tpu.memory_space<vmem>>, vector<16x16xf32>
    tpu.vector_store %arg14[%c8_117, %c0_118], %139 {strides = array<i32>} : memref<31x16xf32, #tpu.memory_space<vmem>>, vector<16x16xf32>,
    %cst_119 = arith.constant 0.000000e+00 : f32
    %143 = vector.broadcast %cst_119 : f32 to vector<7x16xf32>
    %c24_120 = arith.constant 24 : index
    %c0_121 = arith.constant 0 : index
    %144 = vector.load %arg14[%c24_120, %c0_121] : memref<31x16xf32, #tpu.memory_space<vmem>>, vector<7x16xf32>
    tpu.vector_store %arg14[%c24_120, %c0_121], %143 {strides = array<i32>} : memref<31x16xf32, #tpu.memory_space<vmem>>, vector<7x16xf32>,
    %c0_122 = arith.constant 0 : index
    %c0_123 = arith.constant 0 : index
    %145 = vector.load %arg14[%c0_122, %c0_123] : memref<31x16xf32, #tpu.memory_space<vmem>>, vector<16x16xf32>
    %c1_124 = arith.constant 1 : index
    %c0_125 = arith.constant 0 : index
    %146 = vector.load %arg14[%c1_124, %c0_125] : memref<31x16xf32, #tpu.memory_space<vmem>>, vector<16x16xf32>
    %c2_126 = arith.constant 2 : index
    %c0_127 = arith.constant 0 : index
    %147 = vector.load %arg14[%c2_126, %c0_127] : memref<31x16xf32, #tpu.memory_space<vmem>>, vector<16x16xf32>
    %c3_128 = arith.constant 3 : index
    %c0_129 = arith.constant 0 : index
    %148 = vector.load %arg14[%c3_128, %c0_129] : memref<31x16xf32, #tpu.memory_space<vmem>>, vector<16x16xf32>
    %c4_130 = arith.constant 4 : index
    %c0_131 = arith.constant 0 : index
    %149 = vector.load %arg14[%c4_130, %c0_131] : memref<31x16xf32, #tpu.memory_space<vmem>>, vector<16x16xf32>
    %c5_132 = arith.constant 5 : index
    %c0_133 = arith.constant 0 : index
    %150 = vector.load %arg14[%c5_132, %c0_133] : memref<31x16xf32, #tpu.memory_space<vmem>>, vector<16x16xf32>
    %c6_134 = arith.constant 6 : index
    %c0_135 = arith.constant 0 : index
    %151 = vector.load %arg14[%c6_134, %c0_135] : memref<31x16xf32, #tpu.memory_space<vmem>>, vector<16x16xf32>
    %c7_136 = arith.constant 7 : index
    %c0_137 = arith.constant 0 : index
    %152 = vector.load %arg14[%c7_136, %c0_137] : memref<31x16xf32, #tpu.memory_space<vmem>>, vector<16x16xf32>
    %c8_138 = arith.constant 8 : index
    %c0_139 = arith.constant 0 : index
    %153 = vector.load %arg14[%c8_138, %c0_139] : memref<31x16xf32, #tpu.memory_space<vmem>>, vector<16x16xf32>
    %c9_140 = arith.constant 9 : index
    %c0_141 = arith.constant 0 : index
    %154 = vector.load %arg14[%c9_140, %c0_141] : memref<31x16xf32, #tpu.memory_space<vmem>>, vector<16x16xf32>
    %c10_142 = arith.constant 10 : index
    %c0_143 = arith.constant 0 : index
    %155 = vector.load %arg14[%c10_142, %c0_143] : memref<31x16xf32, #tpu.memory_space<vmem>>, vector<16x16xf32>
    %c11_144 = arith.constant 11 : index
    %c0_145 = arith.constant 0 : index
    %156 = vector.load %arg14[%c11_144, %c0_145] : memref<31x16xf32, #tpu.memory_space<vmem>>, vector<16x16xf32>
    %c12_146 = arith.constant 12 : index
    %c0_147 = arith.constant 0 : index
    %157 = vector.load %arg14[%c12_146, %c0_147] : memref<31x16xf32, #tpu.memory_space<vmem>>, vector<16x16xf32>
    %c13_148 = arith.constant 13 : index
    %c0_149 = arith.constant 0 : index
    %158 = vector.load %arg14[%c13_148, %c0_149] : memref<31x16xf32, #tpu.memory_space<vmem>>, vector<16x16xf32>
    %c14_150 = arith.constant 14 : index
    %c0_151 = arith.constant 0 : index
    %159 = vector.load %arg14[%c14_150, %c0_151] : memref<31x16xf32, #tpu.memory_space<vmem>>, vector<16x16xf32>
    %c15_152 = arith.constant 15 : index
    %c0_153 = arith.constant 0 : index
    %160 = vector.load %arg14[%c15_152, %c0_153] : memref<31x16xf32, #tpu.memory_space<vmem>>, vector<16x16xf32>
    %161 = tpu.concatenate %145, %146, %147, %148, %149, %150, %151, %152, %153, %154, %155, %156, %157, %158, %159, %160 in 1 : vector<16x16xf32>, vector<16x16xf32>, vector<16x16xf32>, vector<16x16xf32>, vector<16x16xf32>, vector<16x16xf32>, vector<16x16xf32>, vector<16x16xf32>, vector<16x16xf32>, vector<16x16xf32>, vector<16x16xf32>, vector<16x16xf32>, vector<16x16xf32>, vector<16x16xf32>, vector<16x16xf32>, vector<16x16xf32> -> vector<16x256xf32>
    %c0_154 = arith.constant 0 : index
    %c0_155 = arith.constant 0 : index
    %162 = vector.load %arg7[%c0_154, %c0_155] : memref<256x16xf32, #tpu.memory_space<vmem>>, vector<256x16xf32>
    %cst_156 = arith.constant dense<0.000000e+00> : vector<16x16xf32>
    %163 = tpu.matmul %161, %162, %cst_156 {dimension_numbers = #tpu.dot_dimension_numbers<[1], [0], [0], [1], [0, 0, 1, 1], [], []>} : vector<16x256xf32>, vector<256x16xf32>, vector<16x16xf32> -> vector<16x16xf32>
    %c0_157 = arith.constant 0 : index
    %c0_158 = arith.constant 0 : index
    %164 = vector.load %arg8[%c0_157, %c0_158] : memref<1x16xf32, #tpu.memory_space<vmem>>, vector<1x16xf32>
    %165 = vector.broadcast %164 : vector<1x16xf32> to vector<16x16xf32>
    %166 = arith.addf %163, %165 : vector<16x16xf32>
    %c0_159 = arith.constant 0 : index
    %c0_160 = arith.constant 0 : index
    %167 = vector.load %arg9[%c0_159, %c0_160] : memref<16x16xf32, #tpu.memory_space<vmem>>, vector<16x16xf32>
    %cst_161 = arith.constant dense<0.000000e+00> : vector<16x16xf32>
    %168 = tpu.matmul %166, %167, %cst_161 {dimension_numbers = #tpu.dot_dimension_numbers<[1], [0], [0], [1], [0, 0, 1, 1], [], []>} : vector<16x16xf32>, vector<16x16xf32>, vector<16x16xf32> -> vector<16x16xf32>
    %c0_162 = arith.constant 0 : index
    %c0_163 = arith.constant 0 : index
    %169 = vector.load %arg10[%c0_162, %c0_163] : memref<1x16xf32, #tpu.memory_space<vmem>>, vector<1x16xf32>
    %170 = vector.broadcast %169 : vector<1x16xf32> to vector<16x16xf32>
    %171 = arith.addf %168, %170 : vector<16x16xf32>
    %cst_164 = arith.constant 0.000000e+00 : f32
    %172 = vector.broadcast %cst_164 : f32 to vector<16x16xf32>
    %173 = arith.cmpf ogt, %171, %172 : vector<16x16xf32>
    %cst_165 = arith.constant 0.000000e+00 : f32
    %174 = vector.broadcast %cst_165 : f32 to vector<16x16xf32>
    %175 = arith.minimumf %171, %174 : vector<16x16xf32>
    %176 = math.exp %175 : vector<16x16xf32>
    %cst_166 = arith.constant 1.000000e+00 : f32
    %177 = vector.broadcast %cst_166 : f32 to vector<16x16xf32>
    %178 = arith.subf %176, %177 : vector<16x16xf32>
    %179 = arith.select %173, %171, %178 : vector<16x16xi1>, vector<16x16xf32>
    %cst_167 = arith.constant dense<0.000000e+00> : vector<2x16xf32>
    %180 = tpu.matmul %55, %179, %cst_167 {dimension_numbers = #tpu.dot_dimension_numbers<[1], [0], [0], [1], [0, 0, 1, 1], [], []>} : vector<2x16xf32>, vector<16x16xf32>, vector<2x16xf32> -> vector<2x16xf32>
    %c1_168 = arith.constant 1 : index
    %c0_169 = arith.constant 0 : index
    %c0_170 = arith.constant 0 : index
    %181 = vector.load %arg11[%c1_168, %c0_169, %c0_170] : memref<4x2x16xf32, #tpu.memory_space<vmem>>, vector<1x2x16xf32>
    %182 = vector.shape_cast %181 : vector<1x2x16xf32> to vector<2x16xf32>
    %183 = vector.shape_cast %180 : vector<2x16xf32> to vector<1x2x16xf32>
    tpu.vector_store %arg11[%c1_168, %c0_169, %c0_170], %183 {strides = array<i32>} : memref<4x2x16xf32, #tpu.memory_space<vmem>>, vector<1x2x16xf32>,
    %cst_171 = arith.constant 0.000000e+00 : f32
    %184 = vector.broadcast %cst_171 : f32 to vector<64x8xf32>
    %c0_i32_172 = arith.constant 0 : i32
    %c32_i32_173 = arith.constant 32 : i32
    %185 = arith.addi %c0_i32_172, %c32_i32_173 : i32
    %c1_i32_174 = arith.constant 1 : i32
    %186 = scf.for %arg15 = %c0_i32_172 to %185 step %c1_i32_174 iter_args(%arg16 = %184) -> (vector<64x8xf32>)  : i32 {
      %c190_i32 = arith.constant 190 : i32
      %312 = arith.addi %c190_i32, %arg15 : i32
      %313 = arith.index_cast %312 : i32 to index
      %c0_317 = arith.constant 0 : index
      %314 = vector.load %arg13[%313, %c0_317] : memref<380x8xf32, #tpu.memory_space<vmem>>, vector<64x8xf32>
      %315 = arith.index_cast %arg15 : i32 to index
      %c0_318 = arith.constant 0 : index
      %316 = vector.load %arg3[%315, %c0_318] : memref<32x8xf32, #tpu.memory_space<vmem>>, vector<1x8xf32>
      %317 = vector.broadcast %316 : vector<1x8xf32> to vector<64x8xf32>
      %318 = arith.mulf %314, %317 : vector<64x8xf32>
      %319 = arith.addf %arg16, %318 : vector<64x8xf32>
      scf.yield %319 : vector<64x8xf32>
    }
    %c32_i32_175 = arith.constant 32 : i32
    %c0_176 = arith.constant 0 : index
    %c0_177 = arith.constant 0 : index
    %187 = vector.load %arg4[%c0_176, %c0_177] : memref<1x8xf32, #tpu.memory_space<vmem>>, vector<1x8xf32>
    %188 = vector.broadcast %187 : vector<1x8xf32> to vector<64x8xf32>
    %189 = arith.addf %186, %188 : vector<64x8xf32>
    %c0_178 = arith.constant 0 : index
    %c0_179 = arith.constant 0 : index
    %190 = vector.load %arg5[%c0_178, %c0_179] : memref<8x16xf32, #tpu.memory_space<vmem>>, vector<8x16xf32>
    %cst_180 = arith.constant dense<0.000000e+00> : vector<64x16xf32>
    %191 = tpu.matmul %189, %190, %cst_180 {dimension_numbers = #tpu.dot_dimension_numbers<[1], [0], [0], [1], [0, 0, 1, 1], [], []>} : vector<64x8xf32>, vector<8x16xf32>, vector<64x16xf32> -> vector<64x16xf32>
    %c0_181 = arith.constant 0 : index
    %c0_182 = arith.constant 0 : index
    %192 = vector.load %arg6[%c0_181, %c0_182] : memref<1x16xf32, #tpu.memory_space<vmem>>, vector<1x16xf32>
    %193 = vector.broadcast %192 : vector<1x16xf32> to vector<64x16xf32>
    %194 = arith.addf %191, %193 : vector<64x16xf32>
    %cst_183 = arith.constant 0.000000e+00 : f32
    %195 = vector.broadcast %cst_183 : f32 to vector<64x16xf32>
    %196 = arith.cmpf ogt, %194, %195 : vector<64x16xf32>
    %cst_184 = arith.constant 0.000000e+00 : f32
    %197 = vector.broadcast %cst_184 : f32 to vector<64x16xf32>
    %198 = arith.minimumf %194, %197 : vector<64x16xf32>
    %199 = math.exp %198 : vector<64x16xf32>
    %cst_185 = arith.constant 1.000000e+00 : f32
    %200 = vector.broadcast %cst_185 : f32 to vector<64x16xf32>
    %201 = arith.subf %199, %200 : vector<64x16xf32>
    %202 = arith.select %196, %194, %201 : vector<64x16xi1>, vector<64x16xf32>
    %cst_186 = arith.constant dense<0.000000e+00> : vector<16x16xf32>
    %203 = tpu.matmul %43, %202, %cst_186 {dimension_numbers = #tpu.dot_dimension_numbers<[1], [0], [0], [1], [0, 0, 1, 1], [], []>} : vector<16x64xf32>, vector<64x16xf32>, vector<16x16xf32> -> vector<16x16xf32>
    %cst_187 = arith.constant 0.000000e+00 : f32
    %204 = vector.broadcast %cst_187 : f32 to vector<8x16xf32>
    %c0_188 = arith.constant 0 : index
    %c0_189 = arith.constant 0 : index
    %205 = vector.load %arg14[%c0_188, %c0_189] : memref<31x16xf32, #tpu.memory_space<vmem>>, vector<8x16xf32>
    tpu.vector_store %arg14[%c0_188, %c0_189], %204 {strides = array<i32>} : memref<31x16xf32, #tpu.memory_space<vmem>>, vector<8x16xf32>,
    %c8_190 = arith.constant 8 : index
    %c0_191 = arith.constant 0 : index
    %206 = vector.load %arg14[%c8_190, %c0_191] : memref<31x16xf32, #tpu.memory_space<vmem>>, vector<16x16xf32>
    tpu.vector_store %arg14[%c8_190, %c0_191], %203 {strides = array<i32>} : memref<31x16xf32, #tpu.memory_space<vmem>>, vector<16x16xf32>,
    %cst_192 = arith.constant 0.000000e+00 : f32
    %207 = vector.broadcast %cst_192 : f32 to vector<7x16xf32>
    %c24_193 = arith.constant 24 : index
    %c0_194 = arith.constant 0 : index
    %208 = vector.load %arg14[%c24_193, %c0_194] : memref<31x16xf32, #tpu.memory_space<vmem>>, vector<7x16xf32>
    tpu.vector_store %arg14[%c24_193, %c0_194], %207 {strides = array<i32>} : memref<31x16xf32, #tpu.memory_space<vmem>>, vector<7x16xf32>,
    %c0_195 = arith.constant 0 : index
    %c0_196 = arith.constant 0 : index
    %209 = vector.load %arg14[%c0_195, %c0_196] : memref<31x16xf32, #tpu.memory_space<vmem>>, vector<16x16xf32>
    %c1_197 = arith.constant 1 : index
    %c0_198 = arith.constant 0 : index
    %210 = vector.load %arg14[%c1_197, %c0_198] : memref<31x16xf32, #tpu.memory_space<vmem>>, vector<16x16xf32>
    %c2_199 = arith.constant 2 : index
    %c0_200 = arith.constant 0 : index
    %211 = vector.load %arg14[%c2_199, %c0_200] : memref<31x16xf32, #tpu.memory_space<vmem>>, vector<16x16xf32>
    %c3_201 = arith.constant 3 : index
    %c0_202 = arith.constant 0 : index
    %212 = vector.load %arg14[%c3_201, %c0_202] : memref<31x16xf32, #tpu.memory_space<vmem>>, vector<16x16xf32>
    %c4_203 = arith.constant 4 : index
    %c0_204 = arith.constant 0 : index
    %213 = vector.load %arg14[%c4_203, %c0_204] : memref<31x16xf32, #tpu.memory_space<vmem>>, vector<16x16xf32>
    %c5_205 = arith.constant 5 : index
    %c0_206 = arith.constant 0 : index
    %214 = vector.load %arg14[%c5_205, %c0_206] : memref<31x16xf32, #tpu.memory_space<vmem>>, vector<16x16xf32>
    %c6_207 = arith.constant 6 : index
    %c0_208 = arith.constant 0 : index
    %215 = vector.load %arg14[%c6_207, %c0_208] : memref<31x16xf32, #tpu.memory_space<vmem>>, vector<16x16xf32>
    %c7_209 = arith.constant 7 : index
    %c0_210 = arith.constant 0 : index
    %216 = vector.load %arg14[%c7_209, %c0_210] : memref<31x16xf32, #tpu.memory_space<vmem>>, vector<16x16xf32>
    %c8_211 = arith.constant 8 : index
    %c0_212 = arith.constant 0 : index
    %217 = vector.load %arg14[%c8_211, %c0_212] : memref<31x16xf32, #tpu.memory_space<vmem>>, vector<16x16xf32>
    %c9_213 = arith.constant 9 : index
    %c0_214 = arith.constant 0 : index
    %218 = vector.load %arg14[%c9_213, %c0_214] : memref<31x16xf32, #tpu.memory_space<vmem>>, vector<16x16xf32>
    %c10_215 = arith.constant 10 : index
    %c0_216 = arith.constant 0 : index
    %219 = vector.load %arg14[%c10_215, %c0_216] : memref<31x16xf32, #tpu.memory_space<vmem>>, vector<16x16xf32>
    %c11_217 = arith.constant 11 : index
    %c0_218 = arith.constant 0 : index
    %220 = vector.load %arg14[%c11_217, %c0_218] : memref<31x16xf32, #tpu.memory_space<vmem>>, vector<16x16xf32>
    %c12_219 = arith.constant 12 : index
    %c0_220 = arith.constant 0 : index
    %221 = vector.load %arg14[%c12_219, %c0_220] : memref<31x16xf32, #tpu.memory_space<vmem>>, vector<16x16xf32>
    %c13_221 = arith.constant 13 : index
    %c0_222 = arith.constant 0 : index
    %222 = vector.load %arg14[%c13_221, %c0_222] : memref<31x16xf32, #tpu.memory_space<vmem>>, vector<16x16xf32>
    %c14_223 = arith.constant 14 : index
    %c0_224 = arith.constant 0 : index
    %223 = vector.load %arg14[%c14_223, %c0_224] : memref<31x16xf32, #tpu.memory_space<vmem>>, vector<16x16xf32>
    %c15_225 = arith.constant 15 : index
    %c0_226 = arith.constant 0 : index
    %224 = vector.load %arg14[%c15_225, %c0_226] : memref<31x16xf32, #tpu.memory_space<vmem>>, vector<16x16xf32>
    %225 = tpu.concatenate %209, %210, %211, %212, %213, %214, %215, %216, %217, %218, %219, %220, %221, %222, %223, %224 in 1 : vector<16x16xf32>, vector<16x16xf32>, vector<16x16xf32>, vector<16x16xf32>, vector<16x16xf32>, vector<16x16xf32>, vector<16x16xf32>, vector<16x16xf32>, vector<16x16xf32>, vector<16x16xf32>, vector<16x16xf32>, vector<16x16xf32>, vector<16x16xf32>, vector<16x16xf32>, vector<16x16xf32>, vector<16x16xf32> -> vector<16x256xf32>
    %c0_227 = arith.constant 0 : index
    %c0_228 = arith.constant 0 : index
    %226 = vector.load %arg7[%c0_227, %c0_228] : memref<256x16xf32, #tpu.memory_space<vmem>>, vector<256x16xf32>
    %cst_229 = arith.constant dense<0.000000e+00> : vector<16x16xf32>
    %227 = tpu.matmul %225, %226, %cst_229 {dimension_numbers = #tpu.dot_dimension_numbers<[1], [0], [0], [1], [0, 0, 1, 1], [], []>} : vector<16x256xf32>, vector<256x16xf32>, vector<16x16xf32> -> vector<16x16xf32>
    %c0_230 = arith.constant 0 : index
    %c0_231 = arith.constant 0 : index
    %228 = vector.load %arg8[%c0_230, %c0_231] : memref<1x16xf32, #tpu.memory_space<vmem>>, vector<1x16xf32>
    %229 = vector.broadcast %228 : vector<1x16xf32> to vector<16x16xf32>
    %230 = arith.addf %227, %229 : vector<16x16xf32>
    %c0_232 = arith.constant 0 : index
    %c0_233 = arith.constant 0 : index
    %231 = vector.load %arg9[%c0_232, %c0_233] : memref<16x16xf32, #tpu.memory_space<vmem>>, vector<16x16xf32>
    %cst_234 = arith.constant dense<0.000000e+00> : vector<16x16xf32>
    %232 = tpu.matmul %230, %231, %cst_234 {dimension_numbers = #tpu.dot_dimension_numbers<[1], [0], [0], [1], [0, 0, 1, 1], [], []>} : vector<16x16xf32>, vector<16x16xf32>, vector<16x16xf32> -> vector<16x16xf32>
    %c0_235 = arith.constant 0 : index
    %c0_236 = arith.constant 0 : index
    %233 = vector.load %arg10[%c0_235, %c0_236] : memref<1x16xf32, #tpu.memory_space<vmem>>, vector<1x16xf32>
    %234 = vector.broadcast %233 : vector<1x16xf32> to vector<16x16xf32>
    %235 = arith.addf %232, %234 : vector<16x16xf32>
    %cst_237 = arith.constant 0.000000e+00 : f32
    %236 = vector.broadcast %cst_237 : f32 to vector<16x16xf32>
    %237 = arith.cmpf ogt, %235, %236 : vector<16x16xf32>
    %cst_238 = arith.constant 0.000000e+00 : f32
    %238 = vector.broadcast %cst_238 : f32 to vector<16x16xf32>
    %239 = arith.minimumf %235, %238 : vector<16x16xf32>
    %240 = math.exp %239 : vector<16x16xf32>
    %cst_239 = arith.constant 1.000000e+00 : f32
    %241 = vector.broadcast %cst_239 : f32 to vector<16x16xf32>
    %242 = arith.subf %240, %241 : vector<16x16xf32>
    %243 = arith.select %237, %235, %242 : vector<16x16xi1>, vector<16x16xf32>
    %cst_240 = arith.constant dense<0.000000e+00> : vector<2x16xf32>
    %244 = tpu.matmul %55, %243, %cst_240 {dimension_numbers = #tpu.dot_dimension_numbers<[1], [0], [0], [1], [0, 0, 1, 1], [], []>} : vector<2x16xf32>, vector<16x16xf32>, vector<2x16xf32> -> vector<2x16xf32>
    %c2_241 = arith.constant 2 : index
    %c0_242 = arith.constant 0 : index
    %c0_243 = arith.constant 0 : index
    %245 = vector.load %arg11[%c2_241, %c0_242, %c0_243] : memref<4x2x16xf32, #tpu.memory_space<vmem>>, vector<1x2x16xf32>
    %246 = vector.shape_cast %245 : vector<1x2x16xf32> to vector<2x16xf32>
    %247 = vector.shape_cast %244 : vector<2x16xf32> to vector<1x2x16xf32>
    tpu.vector_store %arg11[%c2_241, %c0_242, %c0_243], %247 {strides = array<i32>} : memref<4x2x16xf32, #tpu.memory_space<vmem>>, vector<1x2x16xf32>,
    %cst_244 = arith.constant 0.000000e+00 : f32
    %248 = vector.broadcast %cst_244 : f32 to vector<64x8xf32>
    %c0_i32_245 = arith.constant 0 : i32
    %c32_i32_246 = arith.constant 32 : i32
    %249 = arith.addi %c0_i32_245, %c32_i32_246 : i32
    %c1_i32_247 = arith.constant 1 : i32
    %250 = scf.for %arg15 = %c0_i32_245 to %249 step %c1_i32_247 iter_args(%arg16 = %248) -> (vector<64x8xf32>)  : i32 {
      %c285_i32 = arith.constant 285 : i32
      %312 = arith.addi %c285_i32, %arg15 : i32
      %313 = arith.index_cast %312 : i32 to index
      %c0_317 = arith.constant 0 : index
      %314 = vector.load %arg13[%313, %c0_317] : memref<380x8xf32, #tpu.memory_space<vmem>>, vector<64x8xf32>
      %315 = arith.index_cast %arg15 : i32 to index
      %c0_318 = arith.constant 0 : index
      %316 = vector.load %arg3[%315, %c0_318] : memref<32x8xf32, #tpu.memory_space<vmem>>, vector<1x8xf32>
      %317 = vector.broadcast %316 : vector<1x8xf32> to vector<64x8xf32>
      %318 = arith.mulf %314, %317 : vector<64x8xf32>
      %319 = arith.addf %arg16, %318 : vector<64x8xf32>
      scf.yield %319 : vector<64x8xf32>
    }
    %c32_i32_248 = arith.constant 32 : i32
    %c0_249 = arith.constant 0 : index
    %c0_250 = arith.constant 0 : index
    %251 = vector.load %arg4[%c0_249, %c0_250] : memref<1x8xf32, #tpu.memory_space<vmem>>, vector<1x8xf32>
    %252 = vector.broadcast %251 : vector<1x8xf32> to vector<64x8xf32>
    %253 = arith.addf %250, %252 : vector<64x8xf32>
    %c0_251 = arith.constant 0 : index
    %c0_252 = arith.constant 0 : index
    %254 = vector.load %arg5[%c0_251, %c0_252] : memref<8x16xf32, #tpu.memory_space<vmem>>, vector<8x16xf32>
    %cst_253 = arith.constant dense<0.000000e+00> : vector<64x16xf32>
    %255 = tpu.matmul %253, %254, %cst_253 {dimension_numbers = #tpu.dot_dimension_numbers<[1], [0], [0], [1], [0, 0, 1, 1], [], []>} : vector<64x8xf32>, vector<8x16xf32>, vector<64x16xf32> -> vector<64x16xf32>
    %c0_254 = arith.constant 0 : index
    %c0_255 = arith.constant 0 : index
    %256 = vector.load %arg6[%c0_254, %c0_255] : memref<1x16xf32, #tpu.memory_space<vmem>>, vector<1x16xf32>
    %257 = vector.broadcast %256 : vector<1x16xf32> to vector<64x16xf32>
    %258 = arith.addf %255, %257 : vector<64x16xf32>
    %cst_256 = arith.constant 0.000000e+00 : f32
    %259 = vector.broadcast %cst_256 : f32 to vector<64x16xf32>
    %260 = arith.cmpf ogt, %258, %259 : vector<64x16xf32>
    %cst_257 = arith.constant 0.000000e+00 : f32
    %261 = vector.broadcast %cst_257 : f32 to vector<64x16xf32>
    %262 = arith.minimumf %258, %261 : vector<64x16xf32>
    %263 = math.exp %262 : vector<64x16xf32>
    %cst_258 = arith.constant 1.000000e+00 : f32
    %264 = vector.broadcast %cst_258 : f32 to vector<64x16xf32>
    %265 = arith.subf %263, %264 : vector<64x16xf32>
    %266 = arith.select %260, %258, %265 : vector<64x16xi1>, vector<64x16xf32>
    %cst_259 = arith.constant dense<0.000000e+00> : vector<16x16xf32>
    %267 = tpu.matmul %43, %266, %cst_259 {dimension_numbers = #tpu.dot_dimension_numbers<[1], [0], [0], [1], [0, 0, 1, 1], [], []>} : vector<16x64xf32>, vector<64x16xf32>, vector<16x16xf32> -> vector<16x16xf32>
    %cst_260 = arith.constant 0.000000e+00 : f32
    %268 = vector.broadcast %cst_260 : f32 to vector<8x16xf32>
    %c0_261 = arith.constant 0 : index
    %c0_262 = arith.constant 0 : index
    %269 = vector.load %arg14[%c0_261, %c0_262] : memref<31x16xf32, #tpu.memory_space<vmem>>, vector<8x16xf32>
    tpu.vector_store %arg14[%c0_261, %c0_262], %268 {strides = array<i32>} : memref<31x16xf32, #tpu.memory_space<vmem>>, vector<8x16xf32>,
    %c8_263 = arith.constant 8 : index
    %c0_264 = arith.constant 0 : index
    %270 = vector.load %arg14[%c8_263, %c0_264] : memref<31x16xf32, #tpu.memory_space<vmem>>, vector<16x16xf32>
    tpu.vector_store %arg14[%c8_263, %c0_264], %267 {strides = array<i32>} : memref<31x16xf32, #tpu.memory_space<vmem>>, vector<16x16xf32>,
    %cst_265 = arith.constant 0.000000e+00 : f32
    %271 = vector.broadcast %cst_265 : f32 to vector<7x16xf32>
    %c24_266 = arith.constant 24 : index
    %c0_267 = arith.constant 0 : index
    %272 = vector.load %arg14[%c24_266, %c0_267] : memref<31x16xf32, #tpu.memory_space<vmem>>, vector<7x16xf32>
    tpu.vector_store %arg14[%c24_266, %c0_267], %271 {strides = array<i32>} : memref<31x16xf32, #tpu.memory_space<vmem>>, vector<7x16xf32>,
    %c0_268 = arith.constant 0 : index
    %c0_269 = arith.constant 0 : index
    %273 = vector.load %arg14[%c0_268, %c0_269] : memref<31x16xf32, #tpu.memory_space<vmem>>, vector<16x16xf32>
    %c1_270 = arith.constant 1 : index
    %c0_271 = arith.constant 0 : index
    %274 = vector.load %arg14[%c1_270, %c0_271] : memref<31x16xf32, #tpu.memory_space<vmem>>, vector<16x16xf32>
    %c2_272 = arith.constant 2 : index
    %c0_273 = arith.constant 0 : index
    %275 = vector.load %arg14[%c2_272, %c0_273] : memref<31x16xf32, #tpu.memory_space<vmem>>, vector<16x16xf32>
    %c3_274 = arith.constant 3 : index
    %c0_275 = arith.constant 0 : index
    %276 = vector.load %arg14[%c3_274, %c0_275] : memref<31x16xf32, #tpu.memory_space<vmem>>, vector<16x16xf32>
    %c4_276 = arith.constant 4 : index
    %c0_277 = arith.constant 0 : index
    %277 = vector.load %arg14[%c4_276, %c0_277] : memref<31x16xf32, #tpu.memory_space<vmem>>, vector<16x16xf32>
    %c5_278 = arith.constant 5 : index
    %c0_279 = arith.constant 0 : index
    %278 = vector.load %arg14[%c5_278, %c0_279] : memref<31x16xf32, #tpu.memory_space<vmem>>, vector<16x16xf32>
    %c6_280 = arith.constant 6 : index
    %c0_281 = arith.constant 0 : index
    %279 = vector.load %arg14[%c6_280, %c0_281] : memref<31x16xf32, #tpu.memory_space<vmem>>, vector<16x16xf32>
    %c7_282 = arith.constant 7 : index
    %c0_283 = arith.constant 0 : index
    %280 = vector.load %arg14[%c7_282, %c0_283] : memref<31x16xf32, #tpu.memory_space<vmem>>, vector<16x16xf32>
    %c8_284 = arith.constant 8 : index
    %c0_285 = arith.constant 0 : index
    %281 = vector.load %arg14[%c8_284, %c0_285] : memref<31x16xf32, #tpu.memory_space<vmem>>, vector<16x16xf32>
    %c9_286 = arith.constant 9 : index
    %c0_287 = arith.constant 0 : index
    %282 = vector.load %arg14[%c9_286, %c0_287] : memref<31x16xf32, #tpu.memory_space<vmem>>, vector<16x16xf32>
    %c10_288 = arith.constant 10 : index
    %c0_289 = arith.constant 0 : index
    %283 = vector.load %arg14[%c10_288, %c0_289] : memref<31x16xf32, #tpu.memory_space<vmem>>, vector<16x16xf32>
    %c11_290 = arith.constant 11 : index
    %c0_291 = arith.constant 0 : index
    %284 = vector.load %arg14[%c11_290, %c0_291] : memref<31x16xf32, #tpu.memory_space<vmem>>, vector<16x16xf32>
    %c12_292 = arith.constant 12 : index
    %c0_293 = arith.constant 0 : index
    %285 = vector.load %arg14[%c12_292, %c0_293] : memref<31x16xf32, #tpu.memory_space<vmem>>, vector<16x16xf32>
    %c13_294 = arith.constant 13 : index
    %c0_295 = arith.constant 0 : index
    %286 = vector.load %arg14[%c13_294, %c0_295] : memref<31x16xf32, #tpu.memory_space<vmem>>, vector<16x16xf32>
    %c14_296 = arith.constant 14 : index
    %c0_297 = arith.constant 0 : index
    %287 = vector.load %arg14[%c14_296, %c0_297] : memref<31x16xf32, #tpu.memory_space<vmem>>, vector<16x16xf32>
    %c15_298 = arith.constant 15 : index
    %c0_299 = arith.constant 0 : index
    %288 = vector.load %arg14[%c15_298, %c0_299] : memref<31x16xf32, #tpu.memory_space<vmem>>, vector<16x16xf32>
    %289 = tpu.concatenate %273, %274, %275, %276, %277, %278, %279, %280, %281, %282, %283, %284, %285, %286, %287, %288 in 1 : vector<16x16xf32>, vector<16x16xf32>, vector<16x16xf32>, vector<16x16xf32>, vector<16x16xf32>, vector<16x16xf32>, vector<16x16xf32>, vector<16x16xf32>, vector<16x16xf32>, vector<16x16xf32>, vector<16x16xf32>, vector<16x16xf32>, vector<16x16xf32>, vector<16x16xf32>, vector<16x16xf32>, vector<16x16xf32> -> vector<16x256xf32>
    %c0_300 = arith.constant 0 : index
    %c0_301 = arith.constant 0 : index
    %290 = vector.load %arg7[%c0_300, %c0_301] : memref<256x16xf32, #tpu.memory_space<vmem>>, vector<256x16xf32>
    %cst_302 = arith.constant dense<0.000000e+00> : vector<16x16xf32>
    %291 = tpu.matmul %289, %290, %cst_302 {dimension_numbers = #tpu.dot_dimension_numbers<[1], [0], [0], [1], [0, 0, 1, 1], [], []>} : vector<16x256xf32>, vector<256x16xf32>, vector<16x16xf32> -> vector<16x16xf32>
    %c0_303 = arith.constant 0 : index
    %c0_304 = arith.constant 0 : index
    %292 = vector.load %arg8[%c0_303, %c0_304] : memref<1x16xf32, #tpu.memory_space<vmem>>, vector<1x16xf32>
    %293 = vector.broadcast %292 : vector<1x16xf32> to vector<16x16xf32>
    %294 = arith.addf %291, %293 : vector<16x16xf32>
    %c0_305 = arith.constant 0 : index
    %c0_306 = arith.constant 0 : index
    %295 = vector.load %arg9[%c0_305, %c0_306] : memref<16x16xf32, #tpu.memory_space<vmem>>, vector<16x16xf32>
    %cst_307 = arith.constant dense<0.000000e+00> : vector<16x16xf32>
    %296 = tpu.matmul %294, %295, %cst_307 {dimension_numbers = #tpu.dot_dimension_numbers<[1], [0], [0], [1], [0, 0, 1, 1], [], []>} : vector<16x16xf32>, vector<16x16xf32>, vector<16x16xf32> -> vector<16x16xf32>
    %c0_308 = arith.constant 0 : index
    %c0_309 = arith.constant 0 : index
    %297 = vector.load %arg10[%c0_308, %c0_309] : memref<1x16xf32, #tpu.memory_space<vmem>>, vector<1x16xf32>
    %298 = vector.broadcast %297 : vector<1x16xf32> to vector<16x16xf32>
    %299 = arith.addf %296, %298 : vector<16x16xf32>
    %cst_310 = arith.constant 0.000000e+00 : f32
    %300 = vector.broadcast %cst_310 : f32 to vector<16x16xf32>
    %301 = arith.cmpf ogt, %299, %300 : vector<16x16xf32>
    %cst_311 = arith.constant 0.000000e+00 : f32
    %302 = vector.broadcast %cst_311 : f32 to vector<16x16xf32>
    %303 = arith.minimumf %299, %302 : vector<16x16xf32>
    %304 = math.exp %303 : vector<16x16xf32>
    %cst_312 = arith.constant 1.000000e+00 : f32
    %305 = vector.broadcast %cst_312 : f32 to vector<16x16xf32>
    %306 = arith.subf %304, %305 : vector<16x16xf32>
    %307 = arith.select %301, %299, %306 : vector<16x16xi1>, vector<16x16xf32>
    %cst_313 = arith.constant dense<0.000000e+00> : vector<2x16xf32>
    %308 = tpu.matmul %55, %307, %cst_313 {dimension_numbers = #tpu.dot_dimension_numbers<[1], [0], [0], [1], [0, 0, 1, 1], [], []>} : vector<2x16xf32>, vector<16x16xf32>, vector<2x16xf32> -> vector<2x16xf32>
    %c3_314 = arith.constant 3 : index
    %c0_315 = arith.constant 0 : index
    %c0_316 = arith.constant 0 : index
    %309 = vector.load %arg11[%c3_314, %c0_315, %c0_316] : memref<4x2x16xf32, #tpu.memory_space<vmem>>, vector<1x2x16xf32>
    %310 = vector.shape_cast %309 : vector<1x2x16xf32> to vector<2x16xf32>
    %311 = vector.shape_cast %308 : vector<2x16xf32> to vector<1x2x16xf32>
    tpu.vector_store %arg11[%c3_314, %c0_315, %c0_316], %311 {strides = array<i32>} : memref<4x2x16xf32, #tpu.memory_space<vmem>>, vector<1x2x16xf32>,
    return
  }
  func.func @transform_0(%arg0: i32) -> (i32, i32, i32) {
    %c0_i32 = arith.constant 0 : i32
    %c0_i32_0 = arith.constant 0 : i32
    %c0_i32_1 = arith.constant 0 : i32
    return %arg0, %c0_i32, %c0_i32_0 : i32, i32, i32
  }
  func.func @transform_1(%arg0: i32) -> (i32, i32) {
    %c0_i32 = arith.constant 0 : i32
    %c0_i32_0 = arith.constant 0 : i32
    %c0_i32_1 = arith.constant 0 : i32
    return %c0_i32, %c0_i32_0 : i32, i32
  }
  func.func @transform_2(%arg0: i32) -> (i32, i32) {
    %c0_i32 = arith.constant 0 : i32
    %c0_i32_0 = arith.constant 0 : i32
    %c0_i32_1 = arith.constant 0 : i32
    return %c0_i32, %c0_i32_0 : i32, i32
  }
  func.func @transform_3(%arg0: i32) -> (i32, i32) {
    %c0_i32 = arith.constant 0 : i32
    %c0_i32_0 = arith.constant 0 : i32
    %c0_i32_1 = arith.constant 0 : i32
    return %c0_i32, %c0_i32_0 : i32, i32
  }
  func.func @transform_4(%arg0: i32) -> (i32, i32) {
    %c0_i32 = arith.constant 0 : i32
    %c0_i32_0 = arith.constant 0 : i32
    %c0_i32_1 = arith.constant 0 : i32
    return %c0_i32, %c0_i32_0 : i32, i32
  }
  func.func @transform_5(%arg0: i32) -> (i32, i32) {
    %c0_i32 = arith.constant 0 : i32
    %c0_i32_0 = arith.constant 0 : i32
    %c0_i32_1 = arith.constant 0 : i32
    return %c0_i32, %c0_i32_0 : i32, i32
  }
  func.func @transform_6(%arg0: i32) -> (i32, i32) {
    %c0_i32 = arith.constant 0 : i32
    %c0_i32_0 = arith.constant 0 : i32
    %c0_i32_1 = arith.constant 0 : i32
    return %c0_i32, %c0_i32_0 : i32, i32
  }
  func.func @transform_7(%arg0: i32) -> (i32, i32) {
    %c0_i32 = arith.constant 0 : i32
    %c0_i32_0 = arith.constant 0 : i32
    %c0_i32_1 = arith.constant 0 : i32
    return %c0_i32, %c0_i32_0 : i32, i32
  }
  func.func @transform_8(%arg0: i32) -> (i32, i32) {
    %c0_i32 = arith.constant 0 : i32
    %c0_i32_0 = arith.constant 0 : i32
    %c0_i32_1 = arith.constant 0 : i32
    return %c0_i32, %c0_i32_0 : i32, i32
  }
  func.func @transform_9(%arg0: i32) -> (i32, i32) {
    %c0_i32 = arith.constant 0 : i32
    %c0_i32_0 = arith.constant 0 : i32
    %c0_i32_1 = arith.constant 0 : i32
    return %c0_i32, %c0_i32_0 : i32, i32
  }
  func.func @transform_10(%arg0: i32) -> (i32, i32, i32) {
    %c0_i32 = arith.constant 0 : i32
    %c0_i32_0 = arith.constant 0 : i32
    %c0_i32_1 = arith.constant 0 : i32
    return %arg0, %c0_i32, %c0_i32_0 : i32, i32, i32
  }
}

</mosaic_0001>

<bundles_post_ra>
// kernel: tpu_custom_call.1
= control target key start
LH: loop header
LB: loop body
LE: loop exit
PB: predicated region body
PF: predicated region fallthrough
CT: control target
= control target key end

     0   :  { %s7303_s0 = inlined_call_operand.vmem [shape: f32[8,64,4], index: 0, kind: input, shape index: {}]   ;;  %s7304_s1 = inlined_call_operand.vmem [shape: f32[4,8], index: 1, kind: input, shape index: {}]   ;;  %s7305_s2 = inlined_call_operand.vmem [shape: f32[32,8], index: 2, kind: input, shape index: {}]   ;;  %s7306_s3 = inlined_call_operand.vmem [shape: f32[1,8], index: 3, kind: input, shape index: {}]   ;;  %s7307_s4 = inlined_call_operand.vmem [shape: f32[8,16], index: 4, kind: input, shape index: {}]   ;;  %s7308_s5 = inlined_call_operand.vmem [shape: f32[1,16], index: 5, kind: input, shape index: {}]   ;;  %s7309_s6 = inlined_call_operand.vmem [shape: f32[256,16], index: 6, kind: input, shape index: {}]   ;;  %s7310_s7 = inlined_call_operand.vmem [shape: f32[1,16], index: 7, kind: input, shape index: {}]   ;;  %s7311_s8 = inlined_call_operand.vmem [shape: f32[16,16], index: 8, kind: input, shape index: {}]   ;;  %s7312_s9 = inlined_call_operand.vmem [shape: f32[1,16], index: 9, kind: input, shape index: {}]   ;;  %s7313_s10 = inlined_call_operand.hbm [shape: f32[8,2,16], index: 10, kind: output, shape index: {}]  }
   0x1   :  { %7346 = sst [smem:[#allocation8_spill]] %s7303_s0 }
   0x2   :  { %7347 = sst [smem:[#allocation9_spill]] %s7304_s1 }
   0x3   :  { %15 = vsyncpa [#allocation6], 0 }
   0x4   :  { %17 = vsyncpa [#allocation6 + $0x1], 0  ;;  %s6204_s13 = smov 0   ;;  %s6206_s14 = smov 0  }
   0x5   :  { %s6208_s15 = smov 0   ;;  %s6210_s16 = smov 0  }
   0x6 LB: > { %s6225_s17 = sadd.s32 4294967295, %s5991_s16   ;;  %s4211_s18 = sadd.s32 4294967294, %s5991_s16   ;;  %s5991_s16 = sphi %s6210_s16, %s7400_s16   ;;  %s5987_s15 = sphi %s6208_s15, %s7399_s15   ;;  %s5983_s14 = sphi %s6206_s14, %s7398_s14   ;;  %s5979_s13 = sphi %s6204_s13, %s7397_s13  }
   0x7   : > { %s6229_s19 = sadd.s32 1, %s5991_s16   ;;  %s245_s20 = sadd.s32 1, %s5987_s15 }
   0x8   : > { %s242_s21 = ssub.s32 %s5991_s16, %s6229_s19  ;;  %p255_p0 = scmp.ne.s32.totalorder %s5987_s15, %s5983_s14 }
   0x9   : > { %p243_p1 = scmp.eq.s32.totalorder %s242_s21, 0  ;;  %p256_p2 = scmp.eq.s32.totalorder %s6225_s17, 1 }
   0xa   : > { %p261_p3 = scmp.ne.s32.totalorder %s5983_s14, %s5979_s13  ;;  %p262_p4 = scmp.eq.s32.totalorder %s4211_s18, 1 }
   0xb   : > { %s6240_s22 = scalar_select %p243_p1, %s5987_s15, %s245_s20  }
   0xc   : > { %p6242_p5 = por %p256_p2, %p255_p0  ;;  %p6246_p6 = por %p262_p4, %p261_p3 }
   0xd   : > { %p4214_p7 = scmp.ge.s32.totalorder %s5991_s16, 1  ;;  %p317_p8 = scmp.lt.s32.totalorder %s5991_s16, 3 }
   0xf   : > { %p318_p9 = pnand %p4214_p7, %p317_p8 }
  0x10   : > { %s7314_s25 = sand.u32 (!%p318_p9), 1, %s5983_s14   ;;  %s7350_s1 = sld [smem:[#allocation9_spill]] (!%p318_p9)  ;;  %vm642_vm0 = vcmask (!%p318_p9), 1043456   ;;  %vm364_vm1 = vcmask (!%p318_p9), 31744   ;;  %v1001_v1 = vlaneseq (!%p318_p9)  ;;  %v6137_v2 = vmov (!%p318_p9), 0.0  }
  0x11   : > { %321 = sbr.rel (%p318_p9) target bundleno = 5528 (0x1598), region = 60  ;;  %s6258_s28 = sshll.u32 (!%p318_p9), %s7314_s25, 3  ;;  %365 = vst.msk [vmem:[#allocation2] sm:$0xff] (!%p318_p9), %vm364_vm1, %v6137_v2  ;;  %366 = vst.msk [vmem:[#allocation2 + $0x8] sm:$0xff] (!%p318_p9), %vm364_vm1, %v6137_v2  ;;  %vm384_vm2 = vcmask (!%p318_p9), 30720   ;;  %vm7323_vm12 = vcmask (!%p318_p9), 64512  }
  0x12   : > { %383 = vst.msk [vmem:[#allocation2 + $0x50] sm:$0xff] (!%p318_p9), %vm364_vm1, %v6137_v2  ;;  %386 = vst.msk [vmem:[#allocation2 + $0x5f] sm:$0xff] (!%p318_p9), %vm364_vm1, %v6137_v2  ;;  %s4216_s29 = sshll.u32 (!%p318_p9), %s6225_s17, 2  ;;  %v1002_v3 = vshrl.u32 (!%p318_p9), %v1001_v1, 7  ;;  %v1005_v4 = vand.u32 (!%p318_p9), 127, %v1001_v1  ;;  %s7353_s0 = sld [smem:[#allocation8_spill]] (!%p318_p9) }
  0x13   : > { %387 = vst.msk [vmem:[#allocation2 + $0x67] sm:$0xff] (!%p318_p9), %vm364_vm1, %v6137_v2  ;;  %405 = vst.msk [vmem:[#allocation2 + $0xaf] sm:$0xff] (!%p318_p9), %vm364_vm1, %v6137_v2  ;;  %p357_p10 = scmp.lt.s32.totalorder (!%p318_p9), %s4216_s29, 7  ;;  %vm999_vm13 = vcmask (!%p318_p9), 60416   ;;  %s6479_s20 = scalar_lea.vmem (!%p318_p9), [#allocation5], %s6258_s28 }
  0x14   : > { %407 = vst.msk [vmem:[#allocation2 + $0xbe] sm:$0xff] (!%p318_p9), %vm364_vm1, %v6137_v2  ;;  %408 = vst.msk [vmem:[#allocation2 + $0xc6] sm:$0xff] (!%p318_p9), %vm364_vm1, %v6137_v2  ;;  %v1003_v5 = vadd.s32 (!%p318_p9), 8, %v1002_v3  ;;  %v1006_v6 = vmul.u32 (!%p318_p9), 4, %v1002_v3  ;;  %v1018_v7 = vmul.u32 (!%p318_p9), 8, %v1002_v3  ;;  %s6481_s21 = smov (!%p318_p9), 0  }
  0x15   : > { %426 = vst.msk [vmem:[#allocation2 + $0x10e] sm:$0xff] (!%p318_p9), %vm364_vm1, %v6137_v2  ;;  %428 = vst.msk [vmem:[#allocation2 + $0x11d] sm:$0xff] (!%p318_p9), %vm364_vm1, %v6137_v2 }
  0x16   : > { %v497_v0 = vld [vmem:[%s7350_s1] sm:$0xf] (!%p318_p9)  ;;  %429 = vst.msk [vmem:[#allocation2 + $0x125] sm:$0xff] (!%p318_p9), %vm364_vm1, %v6137_v2  ;;  %447 = vst.msk [vmem:[#allocation2 + $0x16d] sm:$0xff] (!%p318_p9), %vm364_vm1, %v6137_v2  ;;  %v1007_v8 = vmul.u32 (!%p318_p9), 4, %v1003_v5  ;;  %vm1008_vm3 = vcmp.ge.s32.totalorder (!%p318_p9), %v1005_v4, %v1006_v6  ;;  %v1010_v9 = vadd.s32 (!%p318_p9), 4, %v1006_v6  ;;  %vm6293_vm4 = vcmp.ge.s32.totalorder (!%p318_p9), %v1005_v4, %v1018_v7 }
  0x17   : > { %4743 = vmatprep.subr.msk.mxu0 (!%p318_p9), %vm642_vm0, %v497_v0  ;;  %5225 = vmatprep.subr.msk.mxu1 (!%p318_p9), %vm642_vm0, %v497_v0  ;;  %385 = vst.msk [vmem:[#allocation2 + $0x58] sm:$0x7f] (!%p318_p9), %vm384_vm2, %v6137_v2  ;;  %406 = vst.msk [vmem:[#allocation2 + $0xb7] sm:$0x7f] (!%p318_p9), %vm384_vm2, %v6137_v2  ;;  %v1020_v11 = vadd.s32 (!%p318_p9), 8, %v1018_v7 }
  0x18   : > { %4744 = vmatpush3.msk.msra.mxu0 %vm642_vm0, %v497_v0  ;;  %427 = vst.msk [vmem:[#allocation2 + $0x116] sm:$0x7f] %vm384_vm2, %v6137_v2  ;;  %448 = vst.msk [vmem:[#allocation2 + $0x175] sm:$0x7f] %vm384_vm2, %v6137_v2  ;;  %5226 = vmatpush3.msk.msra.mxu1 %vm642_vm0, %v497_v0  ;;  %s7402_s29 = smov (!%p357_p10, %s4216_s29), 7  ;;  %v449_v12 = vld [vmem:[#allocation2] sm:$0xff]  ;;  %vm6302_vm5 = vcmp.ge.s32.totalorder %v1005_v4, %v1007_v8  ;;  %vm1012_vm6 = vcmp.lt.s32.totalorder %v1005_v4, %v1010_v9 }
  0x19   : > { %s4436_s30 = sshll.u32 %s7402_s29, 6  ;;  %v1011_v14 = vadd.s32 4, %v1007_v8  ;;  %v450_v15 = vld [vmem:[#allocation2 + $0x8] sm:$0xff]  ;;  %4745 = vmatprep.mubr.msk.f32.mxu0 %vm364_vm1, %v449_v12  ;;  %vm1014_vm7 = vmand %vm1008_vm3, %vm1012_vm6  ;;  %vm1021_vm8 = vcmp.lt.s32.totalorder %v1005_v4, %v1020_v11  ;;  %v459_v54 = vld [vmem:[#allocation2 + $0x50] sm:$0xff] }
  0x1a   : > { %s6300_s18 = scalar_lea.vmem %s7353_s0, %s4436_s30  ;;  %v6312_v19 = vsel %vm1014_vm7, 0.25, %v6137_v2  ;;  %vm1022_vm10 = vmand %vm6293_vm4, %vm1021_vm8  ;;  %4746 = vmatmul.mubr.msk.f32.vlgmr.msra.gmra.mrb[0].mxu0 %vm364_vm1, %v450_v15  ;;  %v461_v61 = vld [vmem:[#allocation2 + $0x60] sm:$0xff] }
  0x1b   : > { %v367_v16 = vld [vmem:[%s6300_s18] sm:$0xff]  ;;  %v368_v17 = vld [vmem:[%s6300_s18 + $0x8] sm:$0xff]  ;;  %v369_v18 = vld [vmem:[%s6300_s18 + $0x10] sm:$0xff]  ;;  %vm1013_vm9 = vcmp.lt.s32.totalorder %v1005_v4, %v1011_v14  ;;  %v6324_v22 = vsel %vm1022_vm10, 0.125, %v6137_v2 }
  0x1c   : > { %375 = vst.msk [vmem:[#allocation2 + $0x10] sm:$0xff] %vm364_vm1, %v367_v16  ;;  %376 = vst.msk [vmem:[#allocation2 + $0x18] sm:$0xff] %vm364_vm1, %v368_v17  ;;  %v370_v20 = vld [vmem:[%s6300_s18 + $0x18] sm:$0xff]  ;;  %v371_v21 = vld [vmem:[%s6300_s18 + $0x20] sm:$0xff] }
  0x1d   : > { %377 = vst.msk [vmem:[#allocation2 + $0x20] sm:$0xff] %vm364_vm1, %v369_v18  ;;  %vm1015_vm11 = vmand %vm6302_vm5, %vm1013_vm9  ;;  %v372_v23 = vld [vmem:[%s6300_s18 + $0x28] sm:$0xff]  ;;  %v373_v24 = vld [vmem:[%s6300_s18 + $0x30] sm:$0xff] }
  0x1e   : > { %378 = vst.msk [vmem:[#allocation2 + $0x28] sm:$0xff] %vm364_vm1, %v370_v20  ;;  %379 = vst.msk [vmem:[#allocation2 + $0x30] sm:$0xff] %vm364_vm1, %v371_v21  ;;  %v6331_v25 = vsel %vm1015_vm11, 0.25, %v6137_v2  ;;  %v374_v26 = vld [vmem:[%s6300_s18 + $0x38] sm:$0xff]  ;;  %v4219_v27 = vld [vmem:[%s6300_s18 + $0x40] sm:$0xff] }
  0x1f   : > { %380 = vst.msk [vmem:[#allocation2 + $0x38] sm:$0xff] %vm364_vm1, %v372_v23  ;;  %381 = vst.msk [vmem:[#allocation2 + $0x40] sm:$0xff] %vm364_vm1, %v373_v24  ;;  %v4220_v28 = vld [vmem:[%s6300_s18 + $0x48] sm:$0xff]  ;;  %v4221_v29 = vld [vmem:[%s6300_s18 + $0x50] sm:$0xff] }
  0x20   : > { %382 = vst.msk [vmem:[#allocation2 + $0x48] sm:$0xff] %vm364_vm1, %v374_v26  ;;  %397 = vst.msk [vmem:[#allocation2 + $0x6f] sm:$0xff] %vm364_vm1, %v4219_v27  ;;  %v4222_v30 = vld [vmem:[%s6300_s18 + $0x58] sm:$0xff]  ;;  %v4223_v31 = vld [vmem:[%s6300_s18 + $0x60] sm:$0xff] }
  0x21   : > { %398 = vst.msk [vmem:[#allocation2 + $0x77] sm:$0xff] %vm364_vm1, %v4220_v28  ;;  %399 = vst.msk [vmem:[#allocation2 + $0x7f] sm:$0xff] %vm364_vm1, %v4221_v29  ;;  %v4224_v32 = vld [vmem:[%s6300_s18 + $0x68] sm:$0xff]  ;;  %v4225_v33 = vld [vmem:[%s6300_s18 + $0x70] sm:$0xff] }
  0x22   : > { %400 = vst.msk [vmem:[#allocation2 + $0x87] sm:$0xff] %vm364_vm1, %v4222_v30  ;;  %401 = vst.msk [vmem:[#allocation2 + $0x8f] sm:$0xff] %vm364_vm1, %v4223_v31  ;;  %v4226_v34 = vld [vmem:[%s6300_s18 + $0x78] sm:$0xff]  ;;  %v4227_v38 = vld [vmem:[%s6300_s18 + $0x80] sm:$0xff] }
  0x23   : > { %v451_v35 = vld [vmem:[#allocation2 + $0x10] sm:$0xff]  ;;  %402 = vst.msk [vmem:[#allocation2 + $0x97] sm:$0xff] %vm364_vm1, %v4224_v32  ;;  %403 = vst.msk [vmem:[#allocation2 + $0x9f] sm:$0xff] %vm364_vm1, %v4225_v33  ;;  %v452_v36 = vld [vmem:[#allocation2 + $0x18] sm:$0xff] }
  0x24   : > { %404 = vst.msk [vmem:[#allocation2 + $0xa7] sm:$0xff] %vm364_vm1, %v4226_v34  ;;  %4748 = vmatprep.mubr.msk.f32.mxu0 %vm364_vm1, %v451_v35  ;;  %v453_v37 = vld [vmem:[#allocation2 + $0x20] sm:$0xff]  ;;  %418 = vst.msk [vmem:[#allocation2 + $0xce] sm:$0xff] %vm364_vm1, %v4227_v38  ;;  %v4228_v40 = vld [vmem:[%s6300_s18 + $0x88] sm:$0xff] }
  0x25   : > { %4749 = vmatmul.mubr.msk.f32.gmra.mrb[2].mxu0 %vm364_vm1, %v452_v36  ;;  %v454_v39 = vld [vmem:[#allocation2 + $0x28] sm:$0xff]  ;;  %v455_v41 = vld [vmem:[#allocation2 + $0x30] sm:$0xff]  ;;  %419 = vst.msk [vmem:[#allocation2 + $0xd6] sm:$0xff] %vm364_vm1, %v4228_v40  ;;  %v4230_v43 = vld [vmem:[%s6300_s18 + $0x98] sm:$0xff] }
  0x26   : > { %4751 = vmatprep.mubr.msk.f32.mxu0 %vm364_vm1, %v453_v37  ;;  %v4229_v42 = vld [vmem:[%s6300_s18 + $0x90] sm:$0xff]  ;;  %421 = vst.msk [vmem:[#allocation2 + $0xe6] sm:$0xff] %vm364_vm1, %v4230_v43  ;;  %v4231_v44 = vld [vmem:[%s6300_s18 + $0xa0] sm:$0xff]  ;;  %v456_v45 = vld [vmem:[#allocation2 + $0x38] sm:$0xff] }
  0x27   : > { %420 = vst.msk [vmem:[#allocation2 + $0xde] sm:$0xff] %vm364_vm1, %v4229_v42  ;;  %422 = vst.msk [vmem:[#allocation2 + $0xee] sm:$0xff] %vm364_vm1, %v4231_v44  ;;  %v457_v46 = vld [vmem:[#allocation2 + $0x40] sm:$0xff]  ;;  %v4232_v47 = vld [vmem:[%s6300_s18 + $0xa8] sm:$0xff] }
  0x28   : > { %v4233_v48 = vld [vmem:[%s6300_s18 + $0xb0] sm:$0xff]  ;;  %423 = vst.msk [vmem:[#allocation2 + $0xf6] sm:$0xff] %vm364_vm1, %v4232_v47  ;;  %v4234_v49 = vld [vmem:[%s6300_s18 + $0xb8] sm:$0xff]  ;;  %v4235_v50 = vld [vmem:[%s6300_s18 + $0xc0] sm:$0xff] }
  0x29   : > { %4752 = vmatmul.mubr.msk.f32.gmra.mrb[4].mxu0 %vm364_vm1, %v454_v39  ;;  %424 = vst.msk [vmem:[#allocation2 + $0xfe] sm:$0xff] %vm364_vm1, %v4233_v48  ;;  %425 = vst.msk [vmem:[#allocation2 + $0x106] sm:$0xff] %vm364_vm1, %v4234_v49  ;;  %v458_v51 = vld [vmem:[#allocation2 + $0x48] sm:$0xff]  ;;  %v4237_v53 = vld [vmem:[%s6300_s18 + $0xd0] sm:$0xff] }
  0x2a   : > { %4754 = vmatprep.mubr.msk.f32.mxu0 %vm364_vm1, %v455_v41  ;;  %439 = vst.msk [vmem:[#allocation2 + $0x12d] sm:$0xff] %vm364_vm1, %v4235_v50  ;;  %v4236_v52 = vld [vmem:[%s6300_s18 + $0xc8] sm:$0xff]  ;;  %441 = vst.msk [vmem:[#allocation2 + $0x13d] sm:$0xff] %vm364_vm1, %v4237_v53  ;;  %v4241_v55 = vld [vmem:[%s6300_s18 + $0xf0] sm:$0xff] }
  0x2b   : > { %440 = vst.msk [vmem:[#allocation2 + $0x135] sm:$0xff] %vm364_vm1, %v4236_v52  ;;  %v4242_v56 = vld [vmem:[%s6300_s18 + $0xf8] sm:$0xff]  ;;  %445 = vst.msk [vmem:[#allocation2 + $0x15d] sm:$0xff] %vm364_vm1, %v4241_v55  ;;  %v4239_v58 = vld [vmem:[%s6300_s18 + $0xe0] sm:$0xff] }
  0x2c   : > { %v4238_v57 = vld [vmem:[%s6300_s18 + $0xd8] sm:$0xff]  ;;  %446 = vst.msk [vmem:[#allocation2 + $0x165] sm:$0xff] %vm364_vm1, %v4242_v56  ;;  %v4240_v59 = vld [vmem:[%s6300_s18 + $0xe8] sm:$0xff]  ;;  %443 = vst.msk [vmem:[#allocation2 + $0x14d] sm:$0xff] %vm364_vm1, %v4239_v58 }
  0x2d   : > { %4755 = vmatmul.mubr.msk.f32.gmra.mrb[6].mxu0 %vm364_vm1, %v456_v45  ;;  %442 = vst.msk [vmem:[#allocation2 + $0x145] sm:$0xff] %vm364_vm1, %v4238_v57  ;;  %v460_v60 = vld [vmem:[#allocation2 + $0x58] sm:$0xff]  ;;  %444 = vst.msk [vmem:[#allocation2 + $0x155] sm:$0xff] %vm364_vm1, %v4240_v59  ;;  %v462_v62 = vld [vmem:[#allocation2 + $0x68] sm:$0xff] }
  0x2e   : > { %4757 = vmatprep.mubr.msk.f32.mxu0 %vm364_vm1, %v457_v46  ;;  %v463_v63 = vld [vmem:[#allocation2 + $0x70] sm:$0xff]  ;;  %v464_v4 = vld [vmem:[#allocation2 + $0x78] sm:$0xff]  ;;  %v465_v5 = vld [vmem:[#allocation2 + $0x80] sm:$0xff] }
  0x2f   : > { %v495_v3 = vld [vmem:[#allocation2 + $0x170] sm:$0xff]  ;;  %v496_v6 = vld [vmem:[#allocation2 + $0x178] sm:$0xf]  ;;  %v466_v7 = vld [vmem:[#allocation2 + $0x88] sm:$0xff] }
  0x30   : > { %v467_v8 = vld [vmem:[#allocation2 + $0x90] sm:$0xff]  ;;  %v468_v9 = vld [vmem:[#allocation2 + $0x98] sm:$0xff]  ;;  %v469_v10 = vld [vmem:[#allocation2 + $0xa0] sm:$0xff] }
  0x31   : > { %4758 = vmatmul.mubr.msk.f32.gmra.mrb[8].mxu0 %vm364_vm1, %v458_v51  ;;  %v470_v11 = vld [vmem:[#allocation2 + $0xa8] sm:$0xff]  ;;  %v471_v12 = vld [vmem:[#allocation2 + $0xb0] sm:$0xff]  ;;  %v472_v13 = vld [vmem:[#allocation2 + $0xb8] sm:$0xff] }
  0x32   : > { %4760 = vmatprep.mubr.msk.f32.mxu0 %vm364_vm1, %v459_v54  ;;  %v473_v14 = vld [vmem:[#allocation2 + $0xc0] sm:$0xff]  ;;  %v474_v15 = vld [vmem:[#allocation2 + $0xc8] sm:$0xff]  ;;  %v475_v16 = vld [vmem:[#allocation2 + $0xd0] sm:$0xff] }
  0x33   : > { %v493_v0 = vld [vmem:[#allocation2 + $0x160] sm:$0xff]  ;;  %v494_v1 = vld [vmem:[#allocation2 + $0x168] sm:$0xff]  ;;  %v476_v17 = vld [vmem:[#allocation2 + $0xd8] sm:$0xff] }
  0x34   : > { %4811 = vmatprep.mubr.msk.f32.mxu1 %vm364_vm1, %v493_v0  ;;  %v477_v18 = vld [vmem:[#allocation2 + $0xe0] sm:$0xff]  ;;  %v478_v20 = vld [vmem:[#allocation2 + $0xe8] sm:$0xff]  ;;  %v479_v21 = vld [vmem:[#allocation2 + $0xf0] sm:$0xff] }
  0x35   : > { %4761 = vmatmul.mubr.msk.f32.gmra.mrb[10].mxu0 %vm364_vm1, %v460_v60  ;;  %4812 = vmatmul.mubr.msk.f32.vlgmr.msra.gmra.mrb[0].mxu1 %vm364_vm1, %v494_v1  ;;  %v480_v23 = vld [vmem:[#allocation2 + $0xf8] sm:$0xff]  ;;  %v481_v24 = vld [vmem:[#allocation2 + $0x100] sm:$0xff]  ;;  %v482_v26 = vld [vmem:[#allocation2 + $0x108] sm:$0xff] }
  0x36   : > { %4763 = vmatprep.mubr.msk.f32.mxu0 %vm364_vm1, %v461_v61  ;;  %4814 = vmatprep.mubr.msk.f32.mxu1 %vm364_vm1, %v495_v3  ;;  %v483_v27 = vld [vmem:[#allocation2 + $0x110] sm:$0xff]  ;;  %v484_v28 = vld [vmem:[#allocation2 + $0x118] sm:$0xff]  ;;  %v485_v29 = vld [vmem:[#allocation2 + $0x120] sm:$0xff] }
  0x37   : > { %v486_v30 = vld [vmem:[#allocation2 + $0x128] sm:$0xff]  ;;  %v487_v31 = vld [vmem:[#allocation2 + $0x130] sm:$0xff]  ;;  %v488_v32 = vld [vmem:[#allocation2 + $0x138] sm:$0xff] }
  0x38   : > { %v489_v33 = vld [vmem:[#allocation2 + $0x140] sm:$0xff]  ;;  %v490_v34 = vld [vmem:[#allocation2 + $0x148] sm:$0xff]  ;;  %v491_v35 = vld [vmem:[#allocation2 + $0x150] sm:$0xff] }
  0x39   : > { %4764 = vmatmul.mubr.msk.f32.gmra.mrb[12].mxu0 %vm364_vm1, %v462_v62  ;;  %4815 = vmatmul.mubr.msk.f32.gmra.mrb[2].mxu1 %vm364_vm1, %v496_v6  ;;  %v492_v36 = vld [vmem:[#allocation2 + $0x158] sm:$0xff] }
  0x3a   : > { %4766 = vmatprep.mubr.msk.f32.mxu0 %vm364_vm1, %v463_v63 }
  0x3d   : > { %4767 = vmatmul.mubr.msk.f32.gmra.mrb[14].mxu0 %vm364_vm1, %v464_v4 }
  0x3e   : > { %4769 = vmatprep.mubr.msk.f32.mxu0 %vm364_vm1, %v465_v5 }
  0x41   : > { %4770 = vmatmul.mubr.msk.f32.gmra.mrb[16].mxu0 %vm364_vm1, %v466_v7 }
  0x42   : > { %4772 = vmatprep.mubr.msk.f32.mxu0 %vm364_vm1, %v467_v8 }
  0x45   : > { %4773 = vmatmul.mubr.msk.f32.gmra.mrb[18].mxu0 %vm364_vm1, %v468_v9 }
  0x46   : > { %4775 = vmatprep.mubr.msk.f32.mxu0 %vm364_vm1, %v469_v10 }
  0x49   : > { %4776 = vmatmul.mubr.msk.f32.gmra.mrb[20].mxu0 %vm364_vm1, %v470_v11 }
  0x4a   : > { %4778 = vmatprep.mubr.msk.f32.mxu0 %vm364_vm1, %v471_v12 }
  0x4d   : > { %4779 = vmatmul.mubr.msk.f32.gmra.mrb[22].mxu0 %vm364_vm1, %v472_v13 }
  0x4e   : > { %4781 = vmatprep.mubr.msk.f32.mxu0 %vm364_vm1, %v473_v14 }
  0x51   : > { %4782 = vmatmul.mubr.msk.f32.gmra.mrb[24].mxu0 %vm364_vm1, %v474_v15 }
  0x52   : > { %4784 = vmatprep.mubr.msk.f32.mxu0 %vm364_vm1, %v475_v16 }
  0x55   : > { %4785 = vmatmul.mubr.msk.f32.gmra.mrb[26].mxu0 %vm364_vm1, %v476_v17 }
  0x56   : > { %4787 = vmatprep.mubr.msk.f32.mxu0 %vm364_vm1, %v477_v18 }
  0x59   : > { %4788 = vmatmul.mubr.msk.f32.gmra.mrb[28].mxu0 %vm364_vm1, %v478_v20 }
  0x5a   : > { %4790 = vmatprep.mubr.msk.f32.mxu0 %vm364_vm1, %v479_v21 }
  0x5d   : > { %4791 = vmatmul.mubr.msk.f32.gmra.mrb[30].mxu0 %vm364_vm1, %v480_v23 }
  0x5e   : > { %4793 = vmatprep.mubr.msk.f32.mxu0 %vm364_vm1, %v481_v24  ;;  %v5993_v24 = vmov 0.0  }
  0x61   : > { %4794 = vmatmul.mubr.msk.f32.gmra.mrb[32].mxu0 %vm364_vm1, %v482_v26  ;;  %v5997_v26 = vmov 0.0  }
  0x62   : > { %4796 = vmatprep.mubr.msk.f32.mxu0 %vm364_vm1, %v483_v27  ;;  %v6001_v27 = vmov 0.0  }
  0x65   : > { %4797 = vmatmul.mubr.msk.f32.gmra.mrb[34].mxu0 %vm364_vm1, %v484_v28  ;;  %v6005_v28 = vmov 0.0  }
  0x66   : > { %4799 = vmatprep.mubr.msk.f32.mxu0 %vm364_vm1, %v485_v29  ;;  %v6009_v29 = vmov 0.0  }
  0x69   : > { %4800 = vmatmul.mubr.msk.f32.gmra.mrb[36].mxu0 %vm364_vm1, %v486_v30  ;;  %v6013_v30 = vmov 0.0  }
  0x6a   : > { %4802 = vmatprep.mubr.msk.f32.mxu0 %vm364_vm1, %v487_v31  ;;  %v6017_v31 = vmov 0.0  }
  0x6d   : > { %4803 = vmatmul.mubr.msk.f32.gmra.mrb[38].mxu0 %vm364_vm1, %v488_v32  ;;  %v6021_v32 = vmov 0.0  }
  0x6e   : > { %4805 = vmatprep.mubr.msk.f32.mxu0 %vm364_vm1, %v489_v33 }
  0x71   : > { %4806 = vmatmul.mubr.msk.f32.gmra.mrb[40].mxu0 %vm364_vm1, %v490_v34 }
  0x72   : > { %4808 = vmatprep.mubr.msk.f32.mxu0 %vm364_vm1, %v491_v35 }
  0x75   : > { %4809 = vmatmul.mubr.msk.f32.gmra.mrb[42].mxu0 %vm364_vm1, %v492_v36 }
  0xed   : > { %v4747_v37 = vpop.f32.mrb[0].mxu0 }
  0xee   : > { %953 = vst.msk [vmem:[#allocation3 + $0x8] sm:$0xff] %vm7323_vm12, %v4747_v37  ;;  %v712_v38 = vpop.f32.mrb[1].mxu0 }
  0xef   : > { %952 = vst.msk [vmem:[#allocation3] sm:$0xff] %vm7323_vm12, %v712_v38 }
  0xf8   : > { %v4750_v39 = vpop.f32.mrb[2].mxu0 }
  0xf9   : > { %955 = vst.msk [vmem:[#allocation3 + $0x18] sm:$0xff] %vm7323_vm12, %v4750_v39  ;;  %v722_v40 = vpop.f32.mrb[3].mxu0 }
  0xfa   : > { %954 = vst.msk [vmem:[#allocation3 + $0x10] sm:$0xff] %vm7323_vm12, %v722_v40 }
  0xfc   : > { %v4753_v41 = vpop.f32.mrb[4].mxu0 }
  0xfd   : > { %957 = vst.msk [vmem:[#allocation3 + $0x28] sm:$0xff] %vm7323_vm12, %v4753_v41  ;;  %v732_v42 = vpop.f32.mrb[5].mxu0 }
  0xfe   : > { %956 = vst.msk [vmem:[#allocation3 + $0x20] sm:$0xff] %vm7323_vm12, %v732_v42 }
 0x100   : > { %v4756_v43 = vpop.f32.mrb[6].mxu0 }
 0x101   : > { %959 = vst.msk [vmem:[#allocation3 + $0x38] sm:$0xff] %vm7323_vm12, %v4756_v43  ;;  %v742_v44 = vpop.f32.mrb[7].mxu0 }
 0x102   : > { %958 = vst.msk [vmem:[#allocation3 + $0x30] sm:$0xff] %vm7323_vm12, %v742_v44 }
 0x104   : > { %v4759_v45 = vpop.f32.mrb[8].mxu0 }
 0x105   : > { %961 = vst.msk [vmem:[#allocation3 + $0x48] sm:$0xff] %vm7323_vm12, %v4759_v45  ;;  %v752_v46 = vpop.f32.mrb[9].mxu0 }
 0x106   : > { %960 = vst.msk [vmem:[#allocation3 + $0x40] sm:$0xff] %vm7323_vm12, %v752_v46 }
 0x108   : > { %v4762_v47 = vpop.f32.mrb[10].mxu0  ;;  %v4813_v51 = vpop.f32.mrb[0].mxu1 }
 0x109   : > { %963 = vst.msk [vmem:[#allocation3 + $0x58] sm:$0xff] %vm7323_vm12, %v4762_v47  ;;  %v762_v48 = vpop.f32.mrb[11].mxu0  ;;  %997 = vst.msk [vmem:[#allocation3 + $0x168] sm:$0xff] %vm7323_vm12, %v4813_v51  ;;  %v932_v52 = vpop.f32.mrb[1].mxu1 }
 0x10a   : > { %962 = vst.msk [vmem:[#allocation3 + $0x50] sm:$0xff] %vm7323_vm12, %v762_v48  ;;  %996 = vst.msk [vmem:[#allocation3 + $0x160] sm:$0xff] %vm7323_vm12, %v932_v52 }
 0x10c   : > { %v4765_v49 = vpop.f32.mrb[12].mxu0  ;;  %v4816_v55 = vpop.f32.mrb[2].mxu1 }
 0x10d   : > { %965 = vst.msk [vmem:[#allocation3 + $0x68] sm:$0xff] %vm7323_vm12, %v4765_v49  ;;  %v772_v50 = vpop.f32.mrb[13].mxu0  ;;  %v942_v56 = vpop.f32.mrb[3].mxu1 }
 0x10e   : > { %964 = vst.msk [vmem:[#allocation3 + $0x60] sm:$0xff] %vm7323_vm12, %v772_v50  ;;  %998 = vst.msk [vmem:[#allocation3 + $0x170] sm:$0xff] %vm7323_vm12, %v942_v56 }
 0x10f   : > { %1000 = vst.msk [vmem:[#allocation3 + $0x178] sm:$0xf] %vm999_vm13, %v4816_v55 }
 0x110   : > { %v4768_v53 = vpop.f32.mrb[14].mxu0 }
 0x111   : > { %967 = vst.msk [vmem:[#allocation3 + $0x78] sm:$0xff] %vm7323_vm12, %v4768_v53  ;;  %v782_v54 = vpop.f32.mrb[15].mxu0 }
 0x112   : > { %966 = vst.msk [vmem:[#allocation3 + $0x70] sm:$0xff] %vm7323_vm12, %v782_v54 }
 0x114   : > { %v4771_v57 = vpop.f32.mrb[16].mxu0 }
 0x115   : > { %969 = vst.msk [vmem:[#allocation3 + $0x88] sm:$0xff] %vm7323_vm12, %v4771_v57  ;;  %v792_v58 = vpop.f32.mrb[17].mxu0 }
 0x116   : > { %968 = vst.msk [vmem:[#allocation3 + $0x80] sm:$0xff] %vm7323_vm12, %v792_v58 }
 0x118   : > { %v4774_v59 = vpop.f32.mrb[18].mxu0 }
 0x119   : > { %971 = vst.msk [vmem:[#allocation3 + $0x98] sm:$0xff] %vm7323_vm12, %v4774_v59  ;;  %v802_v60 = vpop.f32.mrb[19].mxu0 }
 0x11a   : > { %970 = vst.msk [vmem:[#allocation3 + $0x90] sm:$0xff] %vm7323_vm12, %v802_v60 }
 0x11c   : > { %v4777_v61 = vpop.f32.mrb[20].mxu0 }
 0x11d   : > { %973 = vst.msk [vmem:[#allocation3 + $0xa8] sm:$0xff] %vm7323_vm12, %v4777_v61  ;;  %v812_v62 = vpop.f32.mrb[21].mxu0 }
 0x11e   : > { %972 = vst.msk [vmem:[#allocation3 + $0xa0] sm:$0xff] %vm7323_vm12, %v812_v62 }
 0x120   : > { %v4780_v63 = vpop.f32.mrb[22].mxu0 }
 0x121   : > { %975 = vst.msk [vmem:[#allocation3 + $0xb8] sm:$0xff] %vm7323_vm12, %v4780_v63  ;;  %v822_v0 = vpop.f32.mrb[23].mxu0 }
 0x122   : > { %974 = vst.msk [vmem:[#allocation3 + $0xb0] sm:$0xff] %vm7323_vm12, %v822_v0 }
 0x124   : > { %v4783_v1 = vpop.f32.mrb[24].mxu0 }
 0x125   : > { %977 = vst.msk [vmem:[#allocation3 + $0xc8] sm:$0xff] %vm7323_vm12, %v4783_v1  ;;  %v832_v3 = vpop.f32.mrb[25].mxu0 }
 0x126   : > { %976 = vst.msk [vmem:[#allocation3 + $0xc0] sm:$0xff] %vm7323_vm12, %v832_v3 }
 0x128   : > { %v4786_v4 = vpop.f32.mrb[26].mxu0 }
 0x129   : > { %979 = vst.msk [vmem:[#allocation3 + $0xd8] sm:$0xff] %vm7323_vm12, %v4786_v4  ;;  %v842_v5 = vpop.f32.mrb[27].mxu0 }
 0x12a   : > { %978 = vst.msk [vmem:[#allocation3 + $0xd0] sm:$0xff] %vm7323_vm12, %v842_v5 }
 0x12c   : > { %v4789_v6 = vpop.f32.mrb[28].mxu0 }
 0x12d   : > { %981 = vst.msk [vmem:[#allocation3 + $0xe8] sm:$0xff] %vm7323_vm12, %v4789_v6  ;;  %v852_v7 = vpop.f32.mrb[29].mxu0 }
 0x12e   : > { %980 = vst.msk [vmem:[#allocation3 + $0xe0] sm:$0xff] %vm7323_vm12, %v852_v7 }
 0x130   : > { %v4792_v8 = vpop.f32.mrb[30].mxu0 }
 0x131   : > { %983 = vst.msk [vmem:[#allocation3 + $0xf8] sm:$0xff] %vm7323_vm12, %v4792_v8  ;;  %v862_v9 = vpop.f32.mrb[31].mxu0 }
 0x132   : > { %982 = vst.msk [vmem:[#allocation3 + $0xf0] sm:$0xff] %vm7323_vm12, %v862_v9 }
 0x134   : > { %v4795_v10 = vpop.f32.mrb[32].mxu0 }
 0x135   : > { %985 = vst.msk [vmem:[#allocation3 + $0x108] sm:$0xff] %vm7323_vm12, %v4795_v10  ;;  %v872_v11 = vpop.f32.mrb[33].mxu0 }
 0x136   : > { %984 = vst.msk [vmem:[#allocation3 + $0x100] sm:$0xff] %vm7323_vm12, %v872_v11 }
 0x138   : > { %v4798_v12 = vpop.f32.mrb[34].mxu0 }
 0x139   : > { %987 = vst.msk [vmem:[#allocation3 + $0x118] sm:$0xff] %vm7323_vm12, %v4798_v12  ;;  %v882_v13 = vpop.f32.mrb[35].mxu0 }
 0x13a   : > { %986 = vst.msk [vmem:[#allocation3 + $0x110] sm:$0xff] %vm7323_vm12, %v882_v13 }
 0x13c   : > { %v4801_v14 = vpop.f32.mrb[36].mxu0 }
 0x13d   : > { %989 = vst.msk [vmem:[#allocation3 + $0x128] sm:$0xff] %vm7323_vm12, %v4801_v14  ;;  %v892_v15 = vpop.f32.mrb[37].mxu0 }
 0x13e   : > { %988 = vst.msk [vmem:[#allocation3 + $0x120] sm:$0xff] %vm7323_vm12, %v892_v15 }
 0x140   : > { %v4804_v16 = vpop.f32.mrb[38].mxu0 }
 0x141   : > { %991 = vst.msk [vmem:[#allocation3 + $0x138] sm:$0xff] %vm7323_vm12, %v4804_v16  ;;  %v902_v17 = vpop.f32.mrb[39].mxu0 }
 0x142   : > { %990 = vst.msk [vmem:[#allocation3 + $0x130] sm:$0xff] %vm7323_vm12, %v902_v17 }
 0x144   : > { %v4807_v18 = vpop.f32.mrb[40].mxu0 }
 0x145   : > { %993 = vst.msk [vmem:[#allocation3 + $0x148] sm:$0xff] %vm7323_vm12, %v4807_v18  ;;  %v912_v20 = vpop.f32.mrb[41].mxu0 }
 0x146   : > { %992 = vst.msk [vmem:[#allocation3 + $0x140] sm:$0xff] %vm7323_vm12, %v912_v20 }
 0x148   : > { %v4810_v21 = vpop.f32.mrb[42].mxu0 }
 0x149   : > { %995 = vst.msk [vmem:[#allocation3 + $0x158] sm:$0xff] %vm7323_vm12, %v4810_v21  ;;  %v922_v23 = vpop.f32.mrb[43].mxu0 }
 0x14a   : > { %994 = vst.msk [vmem:[#allocation3 + $0x150] sm:$0xff] %vm7323_vm12, %v922_v23 }
 0x14b LB: >> { %s1047_s28 = scalar_lea.vmem %s7305_s2, %s6027_s21  ;;  %s1038_s29 = scalar_lea.vmem [#allocation3], %s6027_s21  ;;  %s6027_s21 = sphi %s6481_s21, %s1029_s21   ;;  %v6023_v32 = vphi %v6021_v32, %v6022_v32   ;;  %v6019_v31 = vphi %v6017_v31, %v6018_v31   ;;  %v6015_v30 = vphi %v6013_v30, %v6014_v30   ;;  %v6011_v29 = vphi %v6009_v29, %v6010_v29   ;;  %v6007_v28 = vphi %v6005_v28, %v6006_v28   ;;  %v6003_v27 = vphi %v6001_v27, %v6002_v27   ;;  %v5999_v26 = vphi %v5997_v26, %v5998_v26   ;;  %v5995_v24 = vphi %v5993_v24, %v5994_v24  }
 0x14c   : >> { %v4292_v41 = vld [vmem:[%s1047_s28] ss:$0 sm:$0xff]  ;;  %s1029_s21 = sadd.s32 1, %s6027_s21  }
 0x14d   : >> { %p1026_p11 = scmp.ge.s32.totalorder %s1029_s21, 32  }
 0x14e   : > { %v1084_v58 = vld [vmem:[%s7307_s4] sm:$0xff] (%p1026_p11)  ;;  %vm1269_vm14 = vcmask (%p1026_p11), 523264   ;;  %vm1351_vm7 = vcmask (%p1026_p11), 130048   ;;  %vm7344_vm8 = vcmask (%p1026_p11), 129024   ;;  %s7340_s0 = smov (%p1026_p11), 64   ;;  %s7315_s18 = smov (%p1026_p11), 16  }
 0x14f   : > { %v4293_v59 = vld [vmem:[%s7306_s3] ss:$0 sm:$0xff] (%p1026_p11)  ;;  %4817 = vmatprep.subr.mxu1 (%p1026_p11), %v1084_v58  ;;  %1352 = vst.msk [vmem:[#allocation4] sm:$0xff] (%p1026_p11), %vm1351_vm7, %v6137_v2  ;;  %s7319_s21 = smov (%p1026_p11), 32   ;;  %s7328_s12 = smov (%p1026_p11), 96   ;;  %vm1467_vm9 = vcmask (%p1026_p11), 261120  }
 0x150   : > { %4818 = vmatpush3.msra.mxu1 (%p1026_p11), %v1084_v58  ;;  %v4294_v5 = vld [vmem:[%s7308_s5] ss:$0 sm:$0xff] (%p1026_p11)  ;;  %1356 = vst.msk [vmem:[#allocation4 + $0x18] sm:$0x7f] (%p1026_p11), %vm7344_vm8, %v6137_v2  ;;  %s7324_s26 = smov (%p1026_p11), 112   ;;  %vm1470_vm10 = vcmask (%p1026_p11), 392192  }
 0x151   : >> { %v1039_v33 = vld [vmem:[%s1038_s29] sm:$0xff]  ;;  %v1040_v34 = vld [vmem:[%s1038_s29 + $0x8] sm:$0xff]  ;;  %v1041_v35 = vld [vmem:[%s1038_s29 + $0x10] sm:$0xff]  ;;  %vm1475_vm11 = vcmask (%p1026_p11), 654336   ;;  %vm1478_vm13 = vcmask (%p1026_p11), 785408   ;;  %s6673_s30 = smov (%p1026_p11), 0  }
 0x152   : >> { %v1042_v36 = vld [vmem:[%s1038_s29 + $0x18] sm:$0xff]  ;;  %v1043_v37 = vld [vmem:[%s1038_s29 + $0x20] sm:$0xff]  ;;  %v1044_v38 = vld [vmem:[%s1038_s29 + $0x28] sm:$0xff]  ;;  %v1053_v42 = vmul.f32 %v4292_v41, %v1039_v33  ;;  %v1054_v43 = vmul.f32 %v4292_v41, %v1040_v34  ;;  %v1055_v44 = vmul.f32 %v4292_v41, %v1041_v35  ;;  %1028 = sbr.rel (!%p1026_p11) target bundleno = 331 (0x14b), region = 137 }
 0x153   : >> { %v1045_v39 = vld [vmem:[%s1038_s29 + $0x30] sm:$0xff]  ;;  %v1046_v40 = vld [vmem:[%s1038_s29 + $0x38] sm:$0xff]  ;;  %v1056_v45 = vmul.f32 %v4292_v41, %v1042_v36  ;;  %v1057_v46 = vmul.f32 %v4292_v41, %v1043_v37  ;;  %v1058_v47 = vmul.f32 %v4292_v41, %v1044_v38  ;;  %s7332_s29 = smov (%p1026_p11), 80  }
 0x154   : >> { %v1059_v48 = vmul.f32 %v4292_v41, %v1045_v39  ;;  %v1060_v49 = vmul.f32 %v4292_v41, %v1046_v40  ;;  %v1061_v50 = vadd.f32 %v6023_v32, %v1053_v42   ;;  %v1062_v51 = vadd.f32 %v6019_v31, %v1054_v43  }
 0x155   : >> { %v1063_v52 = vadd.f32 %v6015_v30, %v1055_v44   ;;  %v1064_v53 = vadd.f32 %v6011_v29, %v1056_v45   ;;  %v1065_v54 = vadd.f32 %v6007_v28, %v1057_v46   ;;  %v1066_v55 = vadd.f32 %v6003_v27, %v1058_v47  }
 0x156   : >> { %v1067_v56 = vadd.f32 %v5999_v26, %v1059_v48   ;;  %v1068_v57 = vadd.f32 %v5995_v24, %v1060_v49   ;;  %v6018_v31 = vmov %v1062_v51   ;;  %v6022_v32 = vmov %v1061_v50  }
 0x157   : >> { %v6002_v27 = vmov %v1066_v55   ;;  %v6006_v28 = vmov %v1065_v54   ;;  %v6010_v29 = vmov %v1064_v53   ;;  %v6014_v30 = vmov %v1063_v52  }
 0x158   : >> { %v5994_v24 = vmov %v1068_v57   ;;  %v5998_v26 = vmov %v1067_v56   ;;  %v1076_v60 = vadd.f32 (%p1026_p11), %v4293_v59, %v1061_v50  ;;  %v1077_v61 = vadd.f32 (%p1026_p11), %v4293_v59, %v1062_v51 }
 0x159   : > { %v1078_v62 = vadd.f32 %v4293_v59, %v1063_v52  ;;  %v1079_v63 = vadd.f32 %v4293_v59, %v1064_v53  ;;  %v1080_v0 = vadd.f32 %v4293_v59, %v1065_v54  ;;  %v1081_v1 = vadd.f32 %v4293_v59, %v1066_v55 }
 0x15a   : > { %4819 = vmatprep.mubr.msk.f32.mxu1 %vm7323_vm12, %v1076_v60  ;;  %v1082_v3 = vadd.f32 %v4293_v59, %v1067_v56  ;;  %v1083_v4 = vadd.f32 %v4293_v59, %v1068_v57 }
 0x15b   : > { %4820 = vmatmul.mubr.msk.f32.vlgmr.msra.gmra.mrb[4].mxu1 %vm7323_vm12, %v1077_v61 }
 0x15c   : > { %4822 = vmatprep.mubr.msk.f32.mxu1 %vm7323_vm12, %v1078_v62 }
 0x15f   : > { %4823 = vmatmul.mubr.msk.f32.gmra.mrb[6].mxu1 %vm7323_vm12, %v1079_v63 }
 0x160   : > { %4825 = vmatprep.mubr.msk.f32.mxu1 %vm7323_vm12, %v1080_v0 }
 0x163   : > { %4826 = vmatmul.mubr.msk.f32.gmra.mrb[8].mxu1 %vm7323_vm12, %v1081_v1 }
 0x164   : > { %4828 = vmatprep.mubr.msk.f32.mxu1 %vm7323_vm12, %v1082_v3 }
 0x167   : > { %4829 = vmatmul.mubr.msk.f32.gmra.mrb[10].mxu1 %vm7323_vm12, %v1083_v4 }
 0x168   : > { %4847 = vmatprep.mubr.msk.f32.mxu1 %vm1269_vm14, %v6312_v19 }
 0x22e   : > { %v4821_v6 = vpop.f32.mrb[4].mxu1 }
 0x22f   : > { %v1188_v7 = vadd.f32 %v4821_v6, %v4294_v5  ;;  %v1182_v8 = vpop.f32.mrb[5].mxu1  ;;  %v1507_v6 = vld [vmem:[%s7309_s6 + $0x80] sm:$0xff] }
 0x230   : > { %v1183_v9 = vadd.f32 %v4294_v5, %v1182_v8  ;;  %v1491_v8 = vld [vmem:[%s7309_s6] sm:$0xff] }
 0x231   : > { %v1230_v10 = vmin.f32 %v1188_v7, 0.0  ;;  %vm1222_vm15 = vcmp.gt.f32.partialorder %v1188_v7, 0.0 }
 0x232   : > { %v1229_v11 = vmin.f32 %v1183_v9, 0.0  ;;  %v4824_v12 = vpop.f32.mrb[6].mxu1  ;;  %vm1221_vm0 = vcmp.gt.f32.partialorder %v1183_v9, 0.0 }
 0x233   : > { %v1239_v13 = vmul.f32 1.442695, %v1230_v10  ;;  %v1198_v14 = vadd.f32 %v4824_v12, %v4294_v5  ;;  %v1192_v15 = vpop.f32.mrb[7].mxu1  ;;  %v1492_v10 = vld [vmem:[%s7309_s6 + $0x8] sm:$0xff]  ;;  %v1510_v12 = vld [vmem:[%s7309_s6 + $0x98] sm:$0xff] }
 0x234   : > { %v1237_v16 = vmul.f32 1.442695, %v1229_v11  ;;  %v1193_v17 = vadd.f32 %v4294_v5, %v1192_v15  ;;  %v1509_v11 = vld [vmem:[%s7309_s6 + $0x90] sm:$0xff] }
 0x235   : > { %5600 = vpow2.f32 %v1239_v13  ;;  %v1232_v18 = vmin.f32 %v1198_v14, 0.0  ;;  %vm1224_vm1 = vcmp.gt.f32.partialorder %v1198_v14, 0.0  ;;  %v5023_v13 = vpack.c.bf16 %v1492_v10, %v1491_v8  ;;  %v1493_v15 = vld [vmem:[%s7309_s6 + $0x10] sm:$0xff] }
 0x236   : > { %5602 = vpow2.f32 %v1237_v16  ;;  %v1231_v20 = vmin.f32 %v1193_v17, 0.0  ;;  %v4827_v21 = vpop.f32.mrb[8].mxu1  ;;  %vm1223_vm2 = vcmp.gt.f32.partialorder %v1193_v17, 0.0  ;;  %v1494_v16 = vld [vmem:[%s7309_s6 + $0x18] sm:$0xff] }
 0x237   : > { %v1243_v23 = vmul.f32 1.442695, %v1232_v18  ;;  %v1208_v24 = vadd.f32 %v4827_v21, %v4294_v5  ;;  %v1202_v26 = vpop.f32.mrb[9].mxu1  ;;  %v1511_v18 = vld [vmem:[%s7309_s6 + $0xa0] sm:$0xff] }
 0x238   : > { %v1241_v27 = vmul.f32 1.442695, %v1231_v20  ;;  %v1203_v28 = vadd.f32 %v4294_v5, %v1202_v26  ;;  %v1512_v20 = vld [vmem:[%s7309_s6 + $0xa8] sm:$0xff]  ;;  %v1495_v21 = vld [vmem:[%s7309_s6 + $0x20] sm:$0xff] }
 0x239   : > { %5604 = vpow2.f32 %v1243_v23  ;;  %v1234_v29 = vmin.f32 %v1208_v24, 0.0  ;;  %vm1226_vm3 = vcmp.gt.f32.partialorder %v1208_v24, 0.0  ;;  %v5029_v23 = vpack.c.bf16 %v1512_v20, %v1511_v18 }
 0x23a   : > { %5606 = vpow2.f32 %v1241_v27  ;;  %v1233_v30 = vmin.f32 %v1203_v28, 0.0  ;;  %v4830_v31 = vpop.f32.mrb[10].mxu1  ;;  %vm1225_vm4 = vcmp.gt.f32.partialorder %v1203_v28, 0.0 }
 0x23b   : > { %v1247_v32 = vmul.f32 1.442695, %v1234_v29  ;;  %v1218_v33 = vadd.f32 %v4830_v31, %v4294_v5  ;;  %v1212_v34 = vpop.f32.mrb[11].mxu1  ;;  %v1513_v29 = vld [vmem:[%s7309_s6 + $0xb0] sm:$0xff] }
 0x23c   : > { %v1245_v35 = vmul.f32 1.442695, %v1233_v30  ;;  %v1213_v36 = vadd.f32 %v4294_v5, %v1212_v34  ;;  %v1514_v30 = vld [vmem:[%s7309_s6 + $0xb8] sm:$0xff]  ;;  %v1497_v31 = vld [vmem:[%s7309_s6 + $0x30] sm:$0xff] }
 0x23d   : > { %5608 = vpow2.f32 %v1247_v32  ;;  %v1236_v37 = vmin.f32 %v1218_v33, 0.0  ;;  %vm1228_vm5 = vcmp.gt.f32.partialorder %v1218_v33, 0.0  ;;  %v5033_v32 = vpack.c.bf16 %v1514_v30, %v1513_v29 }
 0x23e   : > { %5610 = vpow2.f32 %v1245_v35  ;;  %v1235_v38 = vmin.f32 %v1213_v36, 0.0  ;;  %vm1227_vm6 = vcmp.gt.f32.partialorder %v1213_v36, 0.0  ;;  %v1515_v35 = vld [vmem:[%s7309_s6 + $0xc0] sm:$0xff] }
 0x23f   : > { %v5601_v39 = vpop.eup %5600  ;;  %v1251_v40 = vmul.f32 1.442695, %v1236_v37  ;;  %v1499_v37 = vld [vmem:[%s7309_s6 + $0x40] sm:$0xff] }
 0x240   : > { %v5603_v41 = vpop.eup %5602  ;;  %v4304_v42 = vadd.f32 -1.0, %v5601_v39  ;;  %v1249_v43 = vmul.f32 1.442695, %v1235_v38  ;;  %v1500_v39 = vld [vmem:[%s7309_s6 + $0x48] sm:$0xff] }
 0x241   : > { %v4303_v44 = vadd.f32 -1.0, %v5603_v41  ;;  %5612 = vpow2.f32 %v1251_v40 }
 0x242   : > { %5614 = vpow2.f32 %v1249_v43  ;;  %v1262_v45 = vsel %vm1222_vm15, %v1188_v7, %v4304_v42  ;;  %v1508_v7 = vld [vmem:[%s7309_s6 + $0x88] sm:$0xff]  ;;  %v5039_v42 = vpack.c.bf16 %v1500_v39, %v1499_v37  ;;  %v1357_v37 = vld [vmem:[#allocation4] sm:$0xff]  ;;  %vm1481_vm15 = vcmask 916480  }
 0x243   : > { %v5605_v46 = vpop.eup %5604  ;;  %v1261_v47 = vsel %vm1221_vm0, %v1183_v9, %v4303_v44  ;;  %v5021_v9 = vpack.c.bf16 %v1508_v7, %v1507_v6  ;;  %v1521_v6 = vld [vmem:[%s7309_s6 + $0xf0] sm:$0xff]  ;;  %v1522_v7 = vld [vmem:[%s7309_s6 + $0xf8] sm:$0xff]  ;;  %vm6146_vm0 = vmmov 0  }
 0x244   : > { %v5607_v48 = vpop.eup %5606  ;;  %v4306_v49 = vadd.f32 -1.0, %v5605_v46  ;;  %v5005_v50 = vpack.c.bf16 %v1262_v45, %v1261_v47 }
 0x245   : > { %v4305_v51 = vadd.f32 -1.0, %v5607_v48 }
 0x246   : > { %5006 = vmatprep.subr.bf16.mxu1 %v5005_v50  ;;  %v1264_v52 = vsel %vm1224_vm1, %v1198_v14, %v4306_v49  ;;  %v5025_v14 = vpack.c.bf16 %v1510_v12, %v1509_v11  ;;  %v1505_v12 = vld [vmem:[%s7309_s6 + $0x70] sm:$0xff] }
 0x247   : > { %v5609_v53 = vpop.eup %5608  ;;  %5008 = vmatpush3.bf16.msra.mxu1 %v5005_v50  ;;  %v1263_v54 = vsel %vm1223_vm2, %v1193_v17, %v4305_v51  ;;  %v5027_v17 = vpack.c.bf16 %v1494_v16, %v1493_v15 }
 0x248   : > { %v5611_v55 = vpop.eup %5610  ;;  %v4308_v56 = vadd.f32 -1.0, %v5609_v53  ;;  %v5009_v57 = vpack.c.bf16 %v1264_v52, %v1263_v54 }
 0x249   : > { %v4307_v58 = vadd.f32 -1.0, %v5611_v55  ;;  %v1517_v55 = vld [vmem:[%s7309_s6 + $0xd0] sm:$0xff] }
 0x24a   : > { %5010 = vmatprep.subr.bf16.mxu1 %v5009_v57  ;;  %v1266_v59 = vsel %vm1226_vm3, %v1208_v24, %v4308_v56  ;;  %v1496_v24 = vld [vmem:[%s7309_s6 + $0x28] sm:$0xff]  ;;  %v1518_v56 = vld [vmem:[%s7309_s6 + $0xd8] sm:$0xff]  ;;  %vm7345_vm3 = vcmask 123904  }
 0x24b   : > { %v5613_v60 = vpop.eup %5612  ;;  %5012 = vmatpush3.bf16.msra.mxu1 %v5009_v57  ;;  %v1265_v61 = vsel %vm1225_vm4, %v1203_v28, %v4307_v58  ;;  %v5031_v26 = vpack.c.bf16 %v1496_v24, %v1495_v21  ;;  %v1501_v57 = vld [vmem:[%s7309_s6 + $0x50] sm:$0xff]  ;;  %v1502_v58 = vld [vmem:[%s7309_s6 + $0x58] sm:$0xff] }
 0x24c   : > { %v5615_v62 = vpop.eup %5614  ;;  %v4310_v63 = vadd.f32 -1.0, %v5613_v60  ;;  %v5013_v0 = vpack.c.bf16 %v1266_v59, %v1265_v61  ;;  %v5041_v59 = vpack.c.bf16 %v1518_v56, %v1517_v55  ;;  %v5043_v60 = vpack.c.bf16 %v1502_v58, %v1501_v57  ;;  %v1519_v61 = vld [vmem:[%s7309_s6 + $0xe0] sm:$0xff] }
 0x24d   : > { %v4309_v1 = vadd.f32 -1.0, %v5615_v62  ;;  %v1520_v62 = vld [vmem:[%s7309_s6 + $0xe8] sm:$0xff] }
 0x24e   : > { %5014 = vmatprep.subr.bf16.mxu1 %v5013_v0  ;;  %v1268_v3 = vsel %vm1228_vm5, %v1218_v33, %v4310_v63  ;;  %v1498_v33 = vld [vmem:[%s7309_s6 + $0x38] sm:$0xff]  ;;  %v5045_v63 = vpack.c.bf16 %v1520_v62, %v1519_v61 }
 0x24f   : > { %5016 = vmatpush3.bf16.msra.mxu1 %v5013_v0  ;;  %v1267_v4 = vsel %vm1227_vm6, %v1213_v36, %v4309_v1  ;;  %v5035_v34 = vpack.c.bf16 %v1498_v33, %v1497_v31  ;;  %v1516_v36 = vld [vmem:[%s7309_s6 + $0xc8] sm:$0xff]  ;;  %v1503_v0 = vld [vmem:[%s7309_s6 + $0x60] sm:$0xff] }
 0x250   : > { %v5017_v5 = vpack.c.bf16 %v1268_v3, %v1267_v4  ;;  %v5037_v38 = vpack.c.bf16 %v1516_v36, %v1515_v35  ;;  %v1504_v1 = vld [vmem:[%s7309_s6 + $0x68] sm:$0xff] }
 0x251   : > { %v5047_v11 = vpack.c.bf16 %v1504_v1, %v1503_v0 }
 0x252   : > { %5018 = vmatprep.subr.bf16.mxu1 %v5017_v5 }
 0x253   : > { %5020 = vmatpush3.bf16.msra.mxu1 %v5017_v5 }
 0x254   : > { %5022 = vmatprep.subr.bf16.mxu1 %v5021_v9 }
 0x256   : > { %4848 = vmatmul.mubr.msk.f32.vlgmr.msra.gmra.mrb[12].mxu1 %vm1269_vm14, %v6331_v25 }
 0x257   : > { %5024 = vmatpush3.bf16.msra.mxu1 %v5023_v13  ;;  %v1506_v13 = vld [vmem:[%s7309_s6 + $0x78] sm:$0xff] }
 0x258   : > { %5026 = vmatprep.subr.bf16.mxu1 %v5025_v14  ;;  %v5049_v14 = vpack.c.bf16 %v1522_v7, %v1521_v6  ;;  %v5051_v20 = vpack.c.bf16 %v1506_v13, %v1505_v12 }
 0x25b   : > { %5028 = vmatpush3.bf16.msra.mxu1 %v5027_v17 }
 0x25c   : > { %5030 = vmatprep.subr.bf16.mxu1 %v5029_v23 }
 0x25f   : > { %5032 = vmatpush3.bf16.msra.mxu1 %v5031_v26 }
 0x260   : > { %5034 = vmatprep.subr.bf16.mxu1 %v5033_v32 }
 0x263   : > { %5036 = vmatpush3.bf16.msra.mxu1 %v5035_v34 }
 0x264   : > { %5038 = vmatprep.subr.bf16.mxu1 %v5037_v38 }
 0x267   : > { %5040 = vmatpush3.bf16.msra.mxu1 %v5039_v42 }
 0x268   : > { %5042 = vmatprep.subr.bf16.mxu1 %v5041_v59 }
 0x26b   : > { %5044 = vmatpush3.bf16.msra.mxu1 %v5043_v60 }
 0x26c   : > { %5046 = vmatprep.subr.bf16.mxu1 %v5045_v63 }
 0x26f   : > { %5048 = vmatpush3.bf16.msra.mxu1 %v5047_v11 }
 0x270   : > { %5050 = vmatprep.subr.bf16.mxu1 %v5049_v14 }
 0x273   : > { %5052 = vmatpush3.bf16.msra.mxu1 %v5051_v20 }
 0x329   : > { %v4849_v27 = vpop.f32.mrb[12].mxu1 }
 0x32a   : > { %1354 = vst.msk [vmem:[#allocation4 + $0x10] sm:$0xff] %vm1351_vm7, %v4849_v27  ;;  %v1342_v28 = vpop.f32.mrb[13].mxu1 }
 0x32b   : > { %1353 = vst.msk [vmem:[#allocation4 + $0x8] sm:$0xff] %vm1351_vm7, %v1342_v28 }
 0x331   : > { %v1377_v40 = vld [vmem:[#allocation4 + $0x14] sm:$0xff] }
 0x332   : > { %v1374_v41 = vld [vmem:[#allocation4 + $0x11] sm:$0xff]  ;;  %1450 = vrot.lane.b32.xlu0 %v1377_v40, %s7340_s0  ;;  %v1359_v43 = vld [vmem:[#allocation4 + $0x1] sm:$0xff]  ;;  %v1360_v44 = vld [vmem:[#allocation4 + $0x9] sm:$0xff] }
 0x333   : > { %1438 = vrot.lane.b32.xlu1 %v1374_v41, %s7315_s18  ;;  %v5565_v45 = vpack.i.bf16 %v1359_v43, %v1360_v44  ;;  %v1375_v46 = vld [vmem:[#allocation4 + $0x12] sm:$0xff]  ;;  %v1361_v47 = vld [vmem:[#allocation4 + $0x2] sm:$0xff]  ;;  %v1362_v48 = vld [vmem:[#allocation4 + $0xa] sm:$0xff] }
 0x334   : > { %v1376_v49 = vld [vmem:[#allocation4 + $0x13] sm:$0xff]  ;;  %v1363_v50 = vld [vmem:[#allocation4 + $0x3] sm:$0xff]  ;;  %v1364_v51 = vld [vmem:[#allocation4 + $0xb] sm:$0xff]  ;;  %v5570_v52 = vpack.i.bf16 %v1361_v47, %v1362_v48 }
 0x335   : > { %v1367_v53 = vld [vmem:[#allocation4 + $0x5] sm:$0xff]  ;;  %v1368_v54 = vld [vmem:[#allocation4 + $0xd] sm:$0xff]  ;;  %v5575_v3 = vpack.i.bf16 %v1363_v50, %v1364_v51  ;;  %v1378_v23 = vld [vmem:[#allocation4 + $0x15] sm:$0xff] }
 0x336   : > { %5566 = vrot.lane.b32.xlu0 %v5565_v45, %s7315_s18  ;;  %s7336_s18 = smov 48   ;;  %v5585_v4 = vpack.i.bf16 %v1367_v53, %v1368_v54  ;;  %v1365_v5 = vld [vmem:[#allocation4 + $0x4] sm:$0xff]  ;;  %v1366_v8 = vld [vmem:[#allocation4 + $0xc] sm:$0xff]  ;;  %v1380_v24 = vld [vmem:[#allocation4 + $0x17] sm:$0xff] }
 0x337   : > { %1442 = vrot.lane.b32.xlu1 %v1375_v46, %s7319_s21  ;;  %v1369_v9 = vld [vmem:[#allocation4 + $0x6] sm:$0xff]  ;;  %v1370_v10 = vld [vmem:[#allocation4 + $0xe] sm:$0xff]  ;;  %v5580_v15 = vpack.i.bf16 %v1365_v5, %v1366_v8  ;;  %v1379_v26 = vld [vmem:[#allocation4 + $0x16] sm:$0xff] }
 0x338   : > { %v5590_v16 = vpack.i.bf16 %v1369_v9, %v1370_v10  ;;  %v1371_v17 = vld [vmem:[#allocation4 + $0x7] sm:$0xff]  ;;  %v1372_v18 = vld [vmem:[#allocation4 + $0xf] sm:$0xff] }
 0x339   : > { %v5595_v21 = vpack.i.bf16 %v1371_v17, %v1372_v18  ;;  %v1373_v42 = vld [vmem:[#allocation4 + $0x10] sm:$0xff]  ;;  %v1358_v43 = vld [vmem:[#allocation4 + $0x8] sm:$0xff] }
 0x33a   : > { %5571 = vrot.lane.b32.xlu0 %v5570_v52, %s7319_s21  ;;  %v1606_v17 = vld [vmem:[%s7311_s8 + $0x8] sm:$0xff] }
 0x33b   : > { %1446 = vrot.lane.b32.xlu1 %v1376_v49, %s7336_s18 }
 0x33e   : > { %5586 = vrot.lane.b32.xlu0 %v5585_v4, %s7332_s29 }
 0x33f   : > { %5576 = vrot.lane.b32.xlu1 %v5575_v3, %s7336_s18 }
 0x342   : > { %5591 = vrot.lane.b32.xlu0 %v5590_v16, %s7328_s12  ;;  %v1605_v16 = vld [vmem:[%s7311_s8] sm:$0xff] }
 0x343   : > { %5581 = vrot.lane.b32.xlu1 %v5580_v15, %s7340_s0  ;;  %v5053_v18 = vpack.c.bf16 %v1606_v17, %v1605_v16 }
 0x345   : > { %5054 = vmatprep.subr.bf16.mxu1 %v5053_v18 }
 0x346   : > { %5596 = vrot.lane.b32.xlu0 %v5595_v21, %s7324_s26  ;;  %v4313_v21 = vld [vmem:[%s7310_s7] ss:$0 sm:$0xff] }
 0x347   : > { %1454 = vrot.lane.b32.xlu1 %v1378_v23, %s7332_s29 }
 0x34a   : > { %1458 = vrot.lane.b32.xlu0 %v1379_v26, %s7328_s12 }
 0x34b   : > { %1462 = vrot.lane.b32.xlu1 %v1380_v24, %s7324_s26 }
 0x3a4   : > { %v1451_v27 = vpop.permute.xlu0 %1450 }
 0x3a5   : > { %v1439_v28 = vpop.permute.xlu1 %1438 }
 0x3a6   : > { %v1484_v44 = vsel %vm1351_vm7, %v1373_v42, %v1439_v28 }
 0x3a8   : > { %v5567_v30 = vpop.permute.xlu0 %5566 }
 0x3a9   : > { %v1443_v29 = vpop.permute.xlu1 %1442  ;;  %v5569_v33 = vunpack.i.h.bf16 %v5567_v30  ;;  %v5568_v34 = vunpack.i.l.bf16 %v5567_v30 }
 0x3aa   : > { %v1485_v57 = vsel %vm1467_vm9, %v1484_v44, %v1443_v29 }
 0x3ab   : > { %v1465_v45 = vsel %vm1351_vm7, %v1357_v37, %v5569_v33  ;;  %v1466_v46 = vsel %vm1351_vm7, %v1358_v43, %v5568_v34 }
 0x3ac   : > { %v5572_v32 = vpop.permute.xlu0 %5571 }
 0x3ad   : > { %v1447_v31 = vpop.permute.xlu1 %1446  ;;  %v5574_v38 = vunpack.i.h.bf16 %v5572_v32  ;;  %v5573_v39 = vunpack.i.l.bf16 %v5572_v32  ;;  %v4314_v32 = vld [vmem:[%s7312_s9] ss:$0 sm:$0xff] }
 0x3ae   : > { %v1486_v61 = vsel %vm1470_vm10, %v1485_v57, %v1447_v31  ;;  %v6145_v31 = vmov 0.0|0.0   ;;  %v6057_v57 = vmov 0.0  }
 0x3af   : > { %v1468_v49 = vsel %vm1467_vm9, %v1465_v45, %v5574_v38  ;;  %v1469_v50 = vsel %vm1467_vm9, %v1466_v46, %v5573_v39  ;;  %v1487_v8 = vsel %vm1269_vm14, %v1486_v61, %v1451_v27 }
 0x3b0   : > { %v5587_v36 = vpop.permute.xlu0 %5586 }
 0x3b1   : > { %v5577_v35 = vpop.permute.xlu1 %5576  ;;  %v5589_v55 = vunpack.i.h.bf16 %v5587_v36  ;;  %v5588_v56 = vunpack.i.l.bf16 %v5587_v36 }
 0x3b2   : > { %v5579_v40 = vunpack.i.h.bf16 %v5577_v35  ;;  %v5578_v41 = vunpack.i.l.bf16 %v5577_v35 }
 0x3b4   : > { %v5592_v48 = vpop.permute.xlu0 %5591  ;;  %v1471_v53 = vsel %vm1470_vm10, %v1468_v49, %v5579_v40  ;;  %v1472_v54 = vsel %vm1470_vm10, %v1469_v50, %v5578_v41  ;;  %v6029_v50 = vmov 0.0  }
 0x3b5   : > { %v5582_v47 = vpop.permute.xlu1 %5581  ;;  %v5593_v60 = vunpack.i.l.bf16 %v5592_v48  ;;  %v5594_v62 = vunpack.i.h.bf16 %v5592_v48 }
 0x3b6   : > { %v5584_v51 = vunpack.i.h.bf16 %v5582_v47  ;;  %v5583_v52 = vunpack.i.l.bf16 %v5582_v47 }
 0x3b8   : > { %v1473_v58 = vsel %vm1269_vm14, %v1471_v53, %v5584_v51  ;;  %v1474_v59 = vsel %vm1269_vm14, %v1472_v54, %v5583_v52  ;;  %v5597_v1 = vpop.permute.xlu0 %5596  ;;  %v6033_v51 = vmov 0.0   ;;  %v6037_v52 = vmov 0.0  }
 0x3b9   : > { %v1455_v63 = vpop.permute.xlu1 %1454  ;;  %v1476_v0 = vsel %vm1475_vm11, %v1473_v58, %v5589_v55  ;;  %v1477_v3 = vsel %vm1475_vm11, %v1474_v59, %v5588_v56  ;;  %v5599_v4 = vunpack.i.h.bf16 %v5597_v1  ;;  %v5598_v5 = vunpack.i.l.bf16 %v5597_v1 }
 0x3ba   : > { %v1480_v6 = vsel %vm1478_vm13, %v1477_v3, %v5593_v60  ;;  %v1479_v7 = vsel %vm1478_vm13, %v1476_v0, %v5594_v62  ;;  %v1488_v11 = vsel %vm1475_vm11, %v1487_v8, %v1455_v63  ;;  %v6041_v53 = vmov 0.0  }
 0x3bb   : > { %v1483_v9 = vsel %vm1481_vm15, %v1480_v6, %v5598_v5  ;;  %v1482_v10 = vsel %vm1481_vm15, %v1479_v7, %v5599_v4  ;;  %v6045_v54 = vmov 0.0   ;;  %v6049_v55 = vmov 0.0  }
 0x3bc   : > { %v1459_v13 = vpop.permute.xlu0 %1458  ;;  %1594 = vmatprep.mubr.f32.mxu1 %v1483_v9  ;;  %v6053_v56 = vmov 0.0  }
 0x3bd   : > { %v1463_v12 = vpop.permute.xlu1 %1462  ;;  %v1489_v14 = vsel %vm1478_vm13, %v1488_v11, %v1459_v13  ;;  %1595 = vmatmul.mubr.f32.vlgmr.msra.gmra.mrb[14].mxu1 %v1482_v10 }
 0x3be   : > { %v1490_v15 = vsel %vm1481_vm15, %v1489_v14, %v1463_v12  ;;  %5056 = vmatpush3.bf16.msra.mxu1 %v5053_v18 }
 0x3bf   : > { %1599 = vmatprep.mubr.f32.mxu1 %v1490_v15  ;;  %5057 = vmatprep.subr.bf16.mxu1 %v6145_v31 }
 0x3c1   : > { %1600 = vmatmul.mubr.f32.gmra.mrb[16].mxu1 %v1483_v9 }
 0x490   : > { %v4538_v20 = vpop.f32.mrb[14].mxu1 }
 0x491   : > { %v4539_v23 = vpop.f32.mrb[15].mxu1 }
 0x492   : > { %v4540_v24 = vadd.f32 %v4539_v23, %v4538_v20 }
 0x494   : > { %v1597_v26 = vadd.f32 %v4540_v24, %v4313_v21  ;;  %v4541_v27 = vpop.f32.mrb[16].mxu1 }
 0x495   : > { %v4542_v28 = vpop.f32.mrb[17].mxu1 }
 0x496   : > { %v4543_v29 = vadd.f32 %v4542_v28, %v4541_v27  ;;  %4854 = vmatprep.mubr.msk.f32.mxu1 %vm1351_vm7, %v1597_v26 }
 0x498   : > { %v1602_v30 = vadd.f32 %v4543_v29, %v4313_v21 }
 0x49a   : > { %4855 = vmatmul.mubr.msk.f32.vlgmr.msra.gmra.mrb[18].mxu1 %vm1351_vm7, %v1602_v30 }
 0x49b   : > { %4861 = vmatprep.mubr.msk.f32.mxu1 %vm6146_vm0, %v6137_v2 }
 0x56d   : > { %v4856_v33 = vpop.f32.mrb[18].mxu1 }
 0x56e   : > { %v1692_v34 = vadd.f32 %v4856_v33, %v4314_v32  ;;  %v1686_v35 = vpop.f32.mrb[19].mxu1 }
 0x56f   : > { %v1687_v36 = vadd.f32 %v4314_v32, %v1686_v35 }
 0x570   : > { %v1698_v37 = vmin.f32 %v1692_v34, 0.0  ;;  %vm1696_vm1 = vcmp.gt.f32.partialorder %v1692_v34, 0.0 }
 0x571   : > { %v1697_v38 = vmin.f32 %v1687_v36, 0.0  ;;  %vm1695_vm2 = vcmp.gt.f32.partialorder %v1687_v36, 0.0 }
 0x572   : > { %v1701_v39 = vmul.f32 1.442695, %v1698_v37 }
 0x573   : > { %v1699_v40 = vmul.f32 1.442695, %v1697_v38 }
 0x574   : > { %5616 = vpow2.f32 %v1701_v39 }
 0x575   : > { %5618 = vpow2.f32 %v1699_v40 }
 0x57e   : > { %v5617_v41 = vpop.eup %5616 }
 0x57f   : > { %v5619_v42 = vpop.eup %5618  ;;  %v4318_v43 = vadd.f32 -1.0, %v5617_v41 }
 0x580   : > { %v4317_v44 = vadd.f32 -1.0, %v5619_v42 }
 0x581   : > { %v1706_v45 = vsel %vm1696_vm1, %v1692_v34, %v4318_v43 }
 0x582   : > { %v1705_v46 = vsel %vm1695_vm2, %v1687_v36, %v4317_v44 }
 0x583   : > { %v5058_v47 = vpack.c.bf16 %v1706_v45, %v1705_v46 }
 0x585   : > { %5059 = vmatpush3.bf16.msra.mxu1 %v5058_v47 }
 0x588   : > { %4862 = vmatmul.mubr.msk.f32.vlgmr.msra.gmra.mrb[20].mxu1 %vm1351_vm7, %v6324_v22 }
 0x65b   : > { %v1776_v48 = vpop.f32.mrb[20].mxu1 }
 0x65c   : > { %1781 = vst.msk [vmem:[%s6479_s20] sm:$0x3] %vm7345_vm3, %v1776_v48  ;;  %v4863_v49 = vpop.f32.mrb[21].mxu1 }
 0x65d LB: >> { %s1806_s25 = scalar_lea.vmem %s7305_s2, %s6063_s30  ;;  %s4057_s27 = scalar_lea.vmem [#allocation3], %s6063_s30  ;;  %s6063_s30 = sphi %s6673_s30, %s1787_s30   ;;  %v6059_v57 = vphi %v6057_v57, %v6058_v57   ;;  %v6055_v56 = vphi %v6053_v56, %v6054_v56   ;;  %v6051_v55 = vphi %v6049_v55, %v6050_v55   ;;  %v6047_v54 = vphi %v6045_v54, %v6046_v54   ;;  %v6043_v53 = vphi %v6041_v53, %v6042_v53   ;;  %v6039_v52 = vphi %v6037_v52, %v6038_v52   ;;  %v6035_v51 = vphi %v6033_v51, %v6034_v51   ;;  %v6031_v50 = vphi %v6029_v50, %v6030_v50  }
 0x65e   : >> { %v4320_v58 = vld [vmem:[%s4057_s27 + $0x5f] sm:$0xff]  ;;  %v4321_v59 = vld [vmem:[%s4057_s27 + $0x67] sm:$0xff]  ;;  %v4322_v60 = vld [vmem:[%s4057_s27 + $0x6f] sm:$0xff]  ;;  %s1787_s30 = sadd.s32 1, %s6063_s30  }
 0x65f   : >> { %v4323_v61 = vld [vmem:[%s4057_s27 + $0x77] sm:$0xff]  ;;  %v4324_v62 = vld [vmem:[%s4057_s27 + $0x7f] sm:$0xff]  ;;  %v4325_v63 = vld [vmem:[%s4057_s27 + $0x87] sm:$0xff]  ;;  %p1784_p12 = scmp.ge.s32.totalorder %s1787_s30, 32  }
 0x660   : >> { %v4326_v0 = vld [vmem:[%s4057_s27 + $0x8f] sm:$0xff]  ;;  %v4327_v1 = vld [vmem:[%s4057_s27 + $0x97] sm:$0xff]  ;;  %v4328_v3 = vld [vmem:[%s1806_s25] ss:$0 sm:$0xff]  ;;  %2106 = vst.msk [vmem:[#allocation4 + $0x18] sm:$0x7f] (%p1784_p12), %vm7344_vm8, %v6137_v2 }
 0x661   : >> { %v1812_v4 = vmul.f32 %v4328_v3, %v4320_v58  ;;  %v1813_v5 = vmul.f32 %v4328_v3, %v4321_v59  ;;  %v1814_v6 = vmul.f32 %v4328_v3, %v4322_v60  ;;  %v1815_v7 = vmul.f32 %v4328_v3, %v4323_v61  ;;  %1786 = sbr.rel (!%p1784_p12) target bundleno = 1629 (0x65d), region = 148  ;;  %v1843_v21 = vld [vmem:[%s7307_s4] sm:$0xff] (%p1784_p12)  ;;  %2103 = vst.msk [vmem:[#allocation4] sm:$0xff] (%p1784_p12), %vm1351_vm7, %v6137_v2  ;;  %s7356_s0 = smov (%p1784_p12), 64  }
 0x662   : >> { %v1816_v8 = vmul.f32 %v4328_v3, %v4324_v62  ;;  %v1817_v9 = vmul.f32 %v4328_v3, %v4325_v63  ;;  %v1818_v10 = vmul.f32 %v4328_v3, %v4326_v0  ;;  %v1819_v11 = vmul.f32 %v4328_v3, %v4327_v1  ;;  %v4329_v23 = vld [vmem:[%s7306_s3] ss:$0 sm:$0xff] (%p1784_p12)  ;;  %4864 = vmatprep.subr.mxu1 (%p1784_p12), %v1843_v21  ;;  %s7357_s12 = smov (%p1784_p12), 16   ;;  %s7358_s26 = smov (%p1784_p12), 32  }
 0x663   : >> { %v1820_v12 = vadd.f32 %v6059_v57, %v1812_v4   ;;  %v1821_v13 = vadd.f32 %v6055_v56, %v1813_v5   ;;  %v1822_v14 = vadd.f32 %v6051_v55, %v1814_v6   ;;  %v1823_v15 = vadd.f32 %v6047_v54, %v1815_v7   ;;  %4865 = vmatpush3.msra.mxu1 (%p1784_p12), %v1843_v21  ;;  %v4330_v34 = vld [vmem:[%s7308_s5] ss:$0 sm:$0xff] (%p1784_p12)  ;;  %s7360_s21 = smov (%p1784_p12), 80   ;;  %s6865_s29 = smov (%p1784_p12), 0  }
 0x664   : >> { %v1824_v16 = vadd.f32 %v6043_v53, %v1816_v8   ;;  %v1825_v17 = vadd.f32 %v6039_v52, %v1817_v9   ;;  %v1826_v18 = vadd.f32 %v6035_v51, %v1818_v10   ;;  %v1827_v20 = vadd.f32 %v6031_v50, %v1819_v11  }
 0x665   : >> { %v6046_v54 = vmov %v1823_v15   ;;  %v6050_v55 = vmov %v1822_v14   ;;  %v6054_v56 = vmov %v1821_v13   ;;  %v6058_v57 = vmov %v1820_v12  }
 0x666   : >> { %v6030_v50 = vmov %v1827_v20   ;;  %v6034_v51 = vmov %v1826_v18   ;;  %v6038_v52 = vmov %v1825_v17   ;;  %v6042_v53 = vmov %v1824_v16  }
 0x667   : > { %v1835_v24 = vadd.f32 (%p1784_p12), %v4329_v23, %v1820_v12  ;;  %v1836_v26 = vadd.f32 (%p1784_p12), %v4329_v23, %v1821_v13  ;;  %v1837_v27 = vadd.f32 (%p1784_p12), %v4329_v23, %v1822_v14  ;;  %v1838_v28 = vadd.f32 (%p1784_p12), %v4329_v23, %v1823_v15 }
 0x668   : > { %v1839_v29 = vadd.f32 %v4329_v23, %v1824_v16  ;;  %v1840_v30 = vadd.f32 %v4329_v23, %v1825_v17  ;;  %v1841_v32 = vadd.f32 %v4329_v23, %v1826_v18  ;;  %v1842_v33 = vadd.f32 %v4329_v23, %v1827_v20 }
 0x669   : > { %4866 = vmatprep.mubr.msk.f32.mxu1 %vm7323_vm12, %v1835_v24 }
 0x66a   : > { %4867 = vmatmul.mubr.msk.f32.vlgmr.msra.gmra.mrb[22].mxu1 %vm7323_vm12, %v1836_v26 }
 0x66b   : > { %4869 = vmatprep.mubr.msk.f32.mxu1 %vm7323_vm12, %v1837_v27 }
 0x66e   : > { %4870 = vmatmul.mubr.msk.f32.gmra.mrb[24].mxu1 %vm7323_vm12, %v1838_v28 }
 0x66f   : > { %4872 = vmatprep.mubr.msk.f32.mxu1 %vm7323_vm12, %v1839_v29 }
 0x672   : > { %4873 = vmatmul.mubr.msk.f32.gmra.mrb[26].mxu1 %vm7323_vm12, %v1840_v30 }
 0x673   : > { %4875 = vmatprep.mubr.msk.f32.mxu1 %vm7323_vm12, %v1841_v32 }
 0x676   : > { %4876 = vmatmul.mubr.msk.f32.gmra.mrb[28].mxu1 %vm7323_vm12, %v1842_v33 }
 0x677   : > { %4894 = vmatprep.mubr.msk.f32.mxu1 %vm1269_vm14, %v6312_v19 }
 0x73d   : > { %v4868_v35 = vpop.f32.mrb[22].mxu1 }
 0x73e   : > { %v1947_v36 = vadd.f32 %v4868_v35, %v4330_v34  ;;  %v1941_v37 = vpop.f32.mrb[23].mxu1 }
 0x73f   : > { %v1942_v38 = vadd.f32 %v4330_v34, %v1941_v37  ;;  %v2253_v37 = vld [vmem:[%s7309_s6 + $0x88] sm:$0xff] }
 0x740   : > { %v1989_v39 = vmin.f32 %v1947_v36, 0.0  ;;  %vm1981_vm4 = vcmp.gt.f32.partialorder %v1947_v36, 0.0 }
 0x741   : > { %v1988_v40 = vmin.f32 %v1942_v38, 0.0  ;;  %v4871_v41 = vpop.f32.mrb[24].mxu1  ;;  %vm1980_vm5 = vcmp.gt.f32.partialorder %v1942_v38, 0.0 }
 0x742   : > { %v1998_v42 = vmul.f32 1.442695, %v1989_v39  ;;  %v1957_v43 = vadd.f32 %v4871_v41, %v4330_v34  ;;  %v1951_v44 = vpop.f32.mrb[25].mxu1  ;;  %v2254_v41 = vld [vmem:[%s7309_s6 + $0x90] sm:$0xff] }
 0x743   : > { %v1996_v45 = vmul.f32 1.442695, %v1988_v40  ;;  %v1952_v46 = vadd.f32 %v4330_v34, %v1951_v44  ;;  %v2237_v40 = vld [vmem:[%s7309_s6 + $0x8] sm:$0xff] }
 0x744   : > { %5655 = vpow2.f32 %v1998_v42  ;;  %v1991_v47 = vmin.f32 %v1957_v43, 0.0  ;;  %vm1983_vm6 = vcmp.gt.f32.partialorder %v1957_v43, 0.0  ;;  %v2255_v42 = vld [vmem:[%s7309_s6 + $0x98] sm:$0xff] }
 0x745   : > { %5657 = vpow2.f32 %v1996_v45  ;;  %v1990_v48 = vmin.f32 %v1952_v46, 0.0  ;;  %v4874_v49 = vpop.f32.mrb[26].mxu1  ;;  %vm1982_vm1 = vcmp.gt.f32.partialorder %v1952_v46, 0.0  ;;  %v5080_v44 = vpack.c.bf16 %v2255_v42, %v2254_v41  ;;  %v2238_v45 = vld [vmem:[%s7309_s6 + $0x10] sm:$0xff] }
 0x746   : > { %v2002_v50 = vmul.f32 1.442695, %v1991_v47  ;;  %v1967_v51 = vadd.f32 %v4874_v49, %v4330_v34  ;;  %v1961_v52 = vpop.f32.mrb[27].mxu1  ;;  %v2257_v49 = vld [vmem:[%s7309_s6 + $0xa8] sm:$0xff] }
 0x747   : > { %v2000_v53 = vmul.f32 1.442695, %v1990_v48  ;;  %v1962_v54 = vadd.f32 %v4330_v34, %v1961_v52  ;;  %v2256_v48 = vld [vmem:[%s7309_s6 + $0xa0] sm:$0xff]  ;;  %v2241_v52 = vld [vmem:[%s7309_s6 + $0x28] sm:$0xff] }
 0x748   : > { %5659 = vpow2.f32 %v2002_v50  ;;  %v1993_v55 = vmin.f32 %v1967_v51, 0.0  ;;  %vm1985_vm2 = vcmp.gt.f32.partialorder %v1967_v51, 0.0  ;;  %v2240_v50 = vld [vmem:[%s7309_s6 + $0x20] sm:$0xff] }
 0x749   : > { %5661 = vpow2.f32 %v2000_v53  ;;  %v1992_v56 = vmin.f32 %v1962_v54, 0.0  ;;  %v4877_v57 = vpop.f32.mrb[28].mxu1  ;;  %vm1984_vm12 = vcmp.gt.f32.partialorder %v1962_v54, 0.0  ;;  %v5086_v53 = vpack.c.bf16 %v2241_v52, %v2240_v50 }
 0x74a   : > { %v2006_v58 = vmul.f32 1.442695, %v1993_v55  ;;  %v1977_v59 = vadd.f32 %v4877_v57, %v4330_v34  ;;  %v1971_v60 = vpop.f32.mrb[29].mxu1  ;;  %v2259_v57 = vld [vmem:[%s7309_s6 + $0xb8] sm:$0xff] }
 0x74b   : > { %v2004_v61 = vmul.f32 1.442695, %v1992_v56  ;;  %v1972_v62 = vadd.f32 %v4330_v34, %v1971_v60  ;;  %v2258_v56 = vld [vmem:[%s7309_s6 + $0xb0] sm:$0xff]  ;;  %v2243_v60 = vld [vmem:[%s7309_s6 + $0x38] sm:$0xff] }
 0x74c   : > { %5663 = vpow2.f32 %v2006_v58  ;;  %v1995_v63 = vmin.f32 %v1977_v59, 0.0  ;;  %v2242_v58 = vld [vmem:[%s7309_s6 + $0x30] sm:$0xff] }
 0x74d   : > { %5665 = vpow2.f32 %v2004_v61  ;;  %v1994_v0 = vmin.f32 %v1972_v62, 0.0  ;;  %v5090_v61 = vpack.c.bf16 %v2243_v60, %v2242_v58 }
 0x74e   : > { %v5656_v1 = vpop.eup %5655  ;;  %v2010_v3 = vmul.f32 1.442695, %v1995_v63  ;;  %v2261_v63 = vld [vmem:[%s7309_s6 + $0xc8] sm:$0xff] }
 0x74f   : > { %v5658_v4 = vpop.eup %5657  ;;  %v4340_v5 = vadd.f32 -1.0, %v5656_v1  ;;  %v2008_v6 = vmul.f32 1.442695, %v1994_v0  ;;  %v2244_v0 = vld [vmem:[%s7309_s6 + $0x40] sm:$0xff] }
 0x750   : > { %v4339_v7 = vadd.f32 -1.0, %v5658_v4  ;;  %5667 = vpow2.f32 %v2010_v3  ;;  %v2245_v3 = vld [vmem:[%s7309_s6 + $0x48] sm:$0xff] }
 0x751   : > { %5669 = vpow2.f32 %v2008_v6  ;;  %v2021_v8 = vsel %vm1981_vm4, %v1947_v36, %v4340_v5  ;;  %vm1987_vm4 = vcmp.gt.f32.partialorder %v1977_v59, 0.0  ;;  %v2252_v36 = vld [vmem:[%s7309_s6 + $0x80] sm:$0xff]  ;;  %v5094_v6 = vpack.c.bf16 %v2245_v3, %v2244_v0 }
 0x752   : > { %v5660_v9 = vpop.eup %5659  ;;  %v2020_v10 = vsel %vm1980_vm5, %v1942_v38, %v4339_v7  ;;  %vm1986_vm5 = vcmp.gt.f32.partialorder %v1972_v62, 0.0  ;;  %v2236_v38 = vld [vmem:[%s7309_s6] sm:$0xff]  ;;  %v5076_v39 = vpack.c.bf16 %v2253_v37, %v2252_v36  ;;  %v2266_v37 = vld [vmem:[%s7309_s6 + $0xf0] sm:$0xff] }
 0x753   : > { %v5662_v11 = vpop.eup %5661  ;;  %v4342_v12 = vadd.f32 -1.0, %v5660_v9  ;;  %v5060_v13 = vpack.c.bf16 %v2021_v8, %v2020_v10 }
 0x754   : > { %v4341_v14 = vadd.f32 -1.0, %v5662_v11  ;;  %5077 = vmatprep.subr.bf16.mxu0 %v5076_v39 }
 0x755   : > { %5061 = vmatprep.subr.bf16.mxu1 %v5060_v13  ;;  %v2023_v15 = vsel %vm1983_vm6, %v1957_v43, %v4342_v12  ;;  %v5078_v43 = vpack.c.bf16 %v2237_v40, %v2236_v38  ;;  %v2267_v38 = vld [vmem:[%s7309_s6 + $0xf8] sm:$0xff] }
 0x756   : > { %v5664_v16 = vpop.eup %5663  ;;  %5063 = vmatpush3.bf16.msra.mxu1 %v5060_v13  ;;  %v2022_v17 = vsel %vm1982_vm1, %v1952_v46, %v4341_v14  ;;  %v2239_v46 = vld [vmem:[%s7309_s6 + $0x18] sm:$0xff] }
 0x757   : > { %v5666_v18 = vpop.eup %5665  ;;  %v4344_v20 = vadd.f32 -1.0, %v5664_v16  ;;  %v5064_v21 = vpack.c.bf16 %v2023_v15, %v2022_v17  ;;  %5079 = vmatpush3.bf16.msra.mxu0 %v5078_v43  ;;  %v5082_v47 = vpack.c.bf16 %v2239_v46, %v2238_v45  ;;  %v2250_v43 = vld [vmem:[%s7309_s6 + $0x70] sm:$0xff]  ;;  %v5104_v45 = vpack.c.bf16 %v2267_v38, %v2266_v37 }
 0x758   : > { %v4343_v23 = vadd.f32 -1.0, %v5666_v18  ;;  %5081 = vmatprep.subr.bf16.mxu0 %v5080_v44  ;;  %v2251_v44 = vld [vmem:[%s7309_s6 + $0x78] sm:$0xff] }
 0x759   : > { %5065 = vmatprep.subr.bf16.mxu1 %v5064_v21  ;;  %v2025_v24 = vsel %vm1985_vm2, %v1967_v51, %v4344_v20  ;;  %v5084_v51 = vpack.c.bf16 %v2257_v49, %v2256_v48  ;;  %v2262_v20 = vld [vmem:[%s7309_s6 + $0xd0] sm:$0xff]  ;;  %v5106_v50 = vpack.c.bf16 %v2251_v44, %v2250_v43 }
 0x75a   : > { %v5668_v26 = vpop.eup %5667  ;;  %5067 = vmatpush3.bf16.msra.mxu1 %v5064_v21  ;;  %v2024_v27 = vsel %vm1984_vm12, %v1962_v54, %v4343_v23  ;;  %v2263_v21 = vld [vmem:[%s7309_s6 + $0xd8] sm:$0xff]  ;;  %v2246_v23 = vld [vmem:[%s7309_s6 + $0x50] sm:$0xff] }
 0x75b   : > { %v5670_v28 = vpop.eup %5669  ;;  %v4346_v29 = vadd.f32 -1.0, %v5668_v26  ;;  %v5068_v30 = vpack.c.bf16 %v2025_v24, %v2024_v27  ;;  %5083 = vmatpush3.bf16.msra.mxu0 %v5082_v47  ;;  %v2247_v24 = vld [vmem:[%s7309_s6 + $0x58] sm:$0xff]  ;;  %v5096_v26 = vpack.c.bf16 %v2263_v21, %v2262_v20 }
 0x75c   : > { %v4345_v32 = vadd.f32 -1.0, %v5670_v28  ;;  %5085 = vmatprep.subr.bf16.mxu0 %v5084_v51  ;;  %v5098_v27 = vpack.c.bf16 %v2247_v24, %v2246_v23  ;;  %v2264_v28 = vld [vmem:[%s7309_s6 + $0xe0] sm:$0xff] }
 0x75d   : > { %5069 = vmatprep.subr.bf16.mxu1 %v5068_v30  ;;  %v2027_v33 = vsel %vm1987_vm4, %v1977_v59, %v4346_v29  ;;  %v5088_v59 = vpack.c.bf16 %v2259_v57, %v2258_v56  ;;  %v2265_v29 = vld [vmem:[%s7309_s6 + $0xe8] sm:$0xff] }
 0x75e   : > { %5071 = vmatpush3.bf16.msra.mxu1 %v5068_v30  ;;  %v2026_v34 = vsel %vm1986_vm5, %v1972_v62, %v4345_v32  ;;  %v2260_v62 = vld [vmem:[%s7309_s6 + $0xc0] sm:$0xff]  ;;  %v5100_v30 = vpack.c.bf16 %v2265_v29, %v2264_v28 }
 0x75f   : > { %v5072_v35 = vpack.c.bf16 %v2027_v33, %v2026_v34  ;;  %5087 = vmatpush3.bf16.msra.mxu0 %v5086_v53  ;;  %v5092_v1 = vpack.c.bf16 %v2261_v63, %v2260_v62  ;;  %v2248_v32 = vld [vmem:[%s7309_s6 + $0x60] sm:$0xff]  ;;  %v2249_v33 = vld [vmem:[%s7309_s6 + $0x68] sm:$0xff] }
 0x760   : > { %5089 = vmatprep.subr.bf16.mxu0 %v5088_v59  ;;  %v5102_v42 = vpack.c.bf16 %v2249_v33, %v2248_v32 }
 0x761   : > { %5073 = vmatprep.subr.bf16.mxu1 %v5072_v35 }
 0x762   : > { %5075 = vmatpush3.bf16.msra.mxu1 %v5072_v35 }
 0x763   : > { %5091 = vmatpush3.bf16.msra.mxu0 %v5090_v61 }
 0x764   : > { %5093 = vmatprep.subr.bf16.mxu0 %v5092_v1  ;;  %v2107_v1 = vld [vmem:[#allocation4] sm:$0xff] }
 0x765   : > { %4895 = vmatmul.mubr.msk.f32.vlgmr.msra.gmra.mrb[30].mxu1 %vm1269_vm14, %v6331_v25 }
 0x767   : > { %5095 = vmatpush3.bf16.msra.mxu0 %v5094_v6 }
 0x768   : > { %5097 = vmatprep.subr.bf16.mxu0 %v5096_v26 }
 0x76b   : > { %5099 = vmatpush3.bf16.msra.mxu0 %v5098_v27 }
 0x76c   : > { %5101 = vmatprep.subr.bf16.mxu0 %v5100_v30 }
 0x76f   : > { %5103 = vmatpush3.bf16.msra.mxu0 %v5102_v42 }
 0x770   : > { %5105 = vmatprep.subr.bf16.mxu0 %v5104_v45 }
 0x773   : > { %5107 = vmatpush3.bf16.msra.mxu0 %v5106_v50 }
 0x838   : > { %v4896_v54 = vpop.f32.mrb[30].mxu1 }
 0x839   : > { %2105 = vst.msk [vmem:[#allocation4 + $0x10] sm:$0xff] %vm1351_vm7, %v4896_v54  ;;  %v2094_v55 = vpop.f32.mrb[31].mxu1 }
 0x83a   : > { %2104 = vst.msk [vmem:[#allocation4 + $0x8] sm:$0xff] %vm1351_vm7, %v2094_v55 }
 0x840   : > { %v2127_v4 = vld [vmem:[#allocation4 + $0x14] sm:$0xff] }
 0x841   : > { %v2124_v5 = vld [vmem:[#allocation4 + $0x11] sm:$0xff]  ;;  %2200 = vrot.lane.b32.xlu0 %v2127_v4, %s7356_s0  ;;  %v2109_v7 = vld [vmem:[#allocation4 + $0x1] sm:$0xff]  ;;  %v2110_v8 = vld [vmem:[#allocation4 + $0x9] sm:$0xff] }
 0x842   : > { %2188 = vrot.lane.b32.xlu1 %v2124_v5, %s7357_s12  ;;  %v5620_v9 = vpack.i.bf16 %v2109_v7, %v2110_v8  ;;  %v2125_v10 = vld [vmem:[#allocation4 + $0x12] sm:$0xff]  ;;  %v2111_v11 = vld [vmem:[#allocation4 + $0x2] sm:$0xff]  ;;  %v2112_v12 = vld [vmem:[#allocation4 + $0xa] sm:$0xff] }
 0x843   : > { %v2126_v13 = vld [vmem:[#allocation4 + $0x13] sm:$0xff]  ;;  %v2113_v14 = vld [vmem:[#allocation4 + $0x3] sm:$0xff]  ;;  %v2114_v15 = vld [vmem:[#allocation4 + $0xb] sm:$0xff]  ;;  %v5625_v16 = vpack.i.bf16 %v2111_v11, %v2112_v12 }
 0x844   : > { %v2117_v17 = vld [vmem:[#allocation4 + $0x5] sm:$0xff]  ;;  %v2118_v18 = vld [vmem:[#allocation4 + $0xd] sm:$0xff]  ;;  %v5630_v34 = vpack.i.bf16 %v2113_v14, %v2114_v15  ;;  %v2128_v52 = vld [vmem:[#allocation4 + $0x15] sm:$0xff] }
 0x845   : > { %5621 = vrot.lane.b32.xlu0 %v5620_v9, %s7357_s12  ;;  %s7359_s12 = smov 48   ;;  %v5640_v35 = vpack.i.bf16 %v2117_v17, %v2118_v18  ;;  %v2115_v36 = vld [vmem:[#allocation4 + $0x4] sm:$0xff]  ;;  %v2116_v39 = vld [vmem:[#allocation4 + $0xc] sm:$0xff]  ;;  %v2130_v53 = vld [vmem:[#allocation4 + $0x17] sm:$0xff] }
 0x846   : > { %2192 = vrot.lane.b32.xlu1 %v2125_v10, %s7358_s26  ;;  %v2119_v40 = vld [vmem:[#allocation4 + $0x6] sm:$0xff]  ;;  %v2120_v41 = vld [vmem:[#allocation4 + $0xe] sm:$0xff]  ;;  %v5635_v46 = vpack.i.bf16 %v2115_v36, %v2116_v39  ;;  %v2129_v54 = vld [vmem:[#allocation4 + $0x16] sm:$0xff] }
 0x847   : > { %v5645_v47 = vpack.i.bf16 %v2119_v40, %v2120_v41  ;;  %v2121_v48 = vld [vmem:[#allocation4 + $0x7] sm:$0xff]  ;;  %v2122_v49 = vld [vmem:[#allocation4 + $0xf] sm:$0xff] }
 0x848   : > { %v5650_v51 = vpack.i.bf16 %v2121_v48, %v2122_v49  ;;  %v2123_v7 = vld [vmem:[#allocation4 + $0x10] sm:$0xff]  ;;  %v2108_v8 = vld [vmem:[#allocation4 + $0x8] sm:$0xff]  ;;  %v2350_v48 = vld [vmem:[%s7311_s8] sm:$0xff] }
 0x849   : > { %5626 = vrot.lane.b32.xlu0 %v5625_v16, %s7358_s26  ;;  %s7362_s26 = smov 112   ;;  %v2351_v49 = vld [vmem:[%s7311_s8 + $0x8] sm:$0xff] }
 0x84a   : > { %2196 = vrot.lane.b32.xlu1 %v2126_v13, %s7359_s12  ;;  %v5108_v50 = vpack.c.bf16 %v2351_v49, %v2350_v48 }
 0x84c   : > { %5109 = vmatprep.subr.bf16.mxu1 %v5108_v50 }
 0x84d   : > { %5641 = vrot.lane.b32.xlu0 %v5640_v35, %s7360_s21  ;;  %5111 = vmatpush3.bf16.msra.mxu1 %v5108_v50 }
 0x84e   : > { %5631 = vrot.lane.b32.xlu1 %v5630_v34, %s7359_s12  ;;  %s7361_s12 = smov 96   ;;  %5112 = vmatprep.subr.bf16.mxu1 %v6145_v31 }
 0x851   : > { %5646 = vrot.lane.b32.xlu0 %v5645_v47, %s7361_s12 }
 0x852   : > { %5636 = vrot.lane.b32.xlu1 %v5635_v46, %s7356_s0 }
 0x855   : > { %5651 = vrot.lane.b32.xlu0 %v5650_v51, %s7362_s26 }
 0x856   : > { %2204 = vrot.lane.b32.xlu1 %v2128_v52, %s7360_s21  ;;  %v4349_v52 = vld [vmem:[%s7310_s7] ss:$0 sm:$0xff] }
 0x859   : > { %2208 = vrot.lane.b32.xlu0 %v2129_v54, %s7361_s12 }
 0x85a   : > { %2212 = vrot.lane.b32.xlu1 %v2130_v53, %s7362_s26 }
 0x8b3   : > { %v2201_v55 = vpop.permute.xlu0 %2200 }
 0x8b4   : > { %v2189_v56 = vpop.permute.xlu1 %2188 }
 0x8b5   : > { %v2229_v9 = vsel %vm1351_vm7, %v2123_v7, %v2189_v56 }
 0x8b7   : > { %v5622_v58 = vpop.permute.xlu0 %5621 }
 0x8b8   : > { %v2193_v57 = vpop.permute.xlu1 %2192  ;;  %v5624_v61 = vunpack.i.h.bf16 %v5622_v58  ;;  %v5623_v62 = vunpack.i.l.bf16 %v5622_v58 }
 0x8b9   : > { %v2230_v24 = vsel %vm1467_vm9, %v2229_v9, %v2193_v57 }
 0x8ba   : > { %v2215_v10 = vsel %vm1351_vm7, %v2107_v1, %v5624_v61  ;;  %v2216_v11 = vsel %vm1351_vm7, %v2108_v8, %v5623_v62 }
 0x8bb   : > { %v5627_v60 = vpop.permute.xlu0 %5626 }
 0x8bc   : > { %v2197_v59 = vpop.permute.xlu1 %2196  ;;  %v5629_v3 = vunpack.i.h.bf16 %v5627_v60  ;;  %v5628_v4 = vunpack.i.l.bf16 %v5627_v60  ;;  %v4350_v60 = vld [vmem:[%s7312_s9] ss:$0 sm:$0xff] }
 0x8bd   : > { %v2231_v29 = vsel %vm1470_vm10, %v2230_v24, %v2197_v59  ;;  %v6093_v24 = vmov 0.0  }
 0x8be   : > { %v2217_v14 = vsel %vm1467_vm9, %v2215_v10, %v5629_v3  ;;  %v2218_v15 = vsel %vm1467_vm9, %v2216_v11, %v5628_v4  ;;  %v2232_v40 = vsel %vm1269_vm14, %v2231_v29, %v2201_v55 }
 0x8bf   : > { %v5642_v0 = vpop.permute.xlu0 %5641 }
 0x8c0   : > { %v5632_v63 = vpop.permute.xlu1 %5631  ;;  %v5644_v21 = vunpack.i.h.bf16 %v5642_v0  ;;  %v5643_v23 = vunpack.i.l.bf16 %v5642_v0 }
 0x8c1   : > { %v5634_v5 = vunpack.i.h.bf16 %v5632_v63  ;;  %v5633_v6 = vunpack.i.l.bf16 %v5632_v63 }
 0x8c3   : > { %v5647_v13 = vpop.permute.xlu0 %5646  ;;  %v2219_v18 = vsel %vm1470_vm10, %v2217_v14, %v5634_v5  ;;  %v2220_v20 = vsel %vm1470_vm10, %v2218_v15, %v5633_v6  ;;  %v6065_v15 = vmov 0.0  }
 0x8c4   : > { %v5637_v12 = vpop.permute.xlu1 %5636  ;;  %v5648_v27 = vunpack.i.l.bf16 %v5647_v13  ;;  %v5649_v30 = vunpack.i.h.bf16 %v5647_v13 }
 0x8c5   : > { %v5639_v16 = vunpack.i.h.bf16 %v5637_v12  ;;  %v5638_v17 = vunpack.i.l.bf16 %v5637_v12 }
 0x8c7   : > { %v2221_v26 = vsel %vm1269_vm14, %v2219_v18, %v5639_v16  ;;  %v2222_v28 = vsel %vm1269_vm14, %v2220_v20, %v5638_v17  ;;  %v5652_v33 = vpop.permute.xlu0 %5651  ;;  %v6069_v16 = vmov 0.0   ;;  %v6073_v17 = vmov 0.0  }
 0x8c8   : > { %v2205_v32 = vpop.permute.xlu1 %2204  ;;  %v2224_v34 = vsel %vm1475_vm11, %v2222_v28, %v5643_v23  ;;  %v2223_v35 = vsel %vm1475_vm11, %v2221_v26, %v5644_v21  ;;  %v5654_v36 = vunpack.i.h.bf16 %v5652_v33  ;;  %v5653_v37 = vunpack.i.l.bf16 %v5652_v33 }
 0x8c9   : > { %v2226_v38 = vsel %vm1478_vm13, %v2224_v34, %v5648_v27  ;;  %v2225_v39 = vsel %vm1478_vm13, %v2223_v35, %v5649_v30  ;;  %v2233_v43 = vsel %vm1475_vm11, %v2232_v40, %v2205_v32  ;;  %v6077_v18 = vmov 0.0  }
 0x8ca   : > { %v2228_v41 = vsel %vm1481_vm15, %v2226_v38, %v5653_v37  ;;  %v2227_v42 = vsel %vm1481_vm15, %v2225_v39, %v5654_v36  ;;  %v6081_v20 = vmov 0.0   ;;  %v6085_v21 = vmov 0.0  }
 0x8cb   : > { %v2209_v45 = vpop.permute.xlu0 %2208  ;;  %2339 = vmatprep.mubr.f32.mxu0 %v2228_v41  ;;  %v6089_v23 = vmov 0.0  }
 0x8cc   : > { %v2213_v44 = vpop.permute.xlu1 %2212  ;;  %v2234_v46 = vsel %vm1478_vm13, %v2233_v43, %v2209_v45  ;;  %2340 = vmatmul.mubr.f32.vlgmr.msra.gmra.mrb[44].mxu0 %v2227_v42 }
 0x8cd   : > { %v2235_v47 = vsel %vm1481_vm15, %v2234_v46, %v2213_v44 }
 0x8ce   : > { %2344 = vmatprep.mubr.f32.mxu0 %v2235_v47 }
 0x8d0   : > { %2345 = vmatmul.mubr.f32.gmra.mrb[46].mxu0 %v2228_v41 }
 0x99f   : > { %v4602_v51 = vpop.f32.mrb[44].mxu0 }
 0x9a0   : > { %v4603_v53 = vpop.f32.mrb[45].mxu0 }
 0x9a1   : > { %v4604_v54 = vadd.f32 %v4603_v53, %v4602_v51 }
 0x9a3   : > { %v2342_v55 = vadd.f32 %v4604_v54, %v4349_v52  ;;  %v4605_v56 = vpop.f32.mrb[46].mxu0 }
 0x9a4   : > { %v4606_v57 = vpop.f32.mrb[47].mxu0 }
 0x9a5   : > { %v4607_v58 = vadd.f32 %v4606_v57, %v4605_v56  ;;  %4901 = vmatprep.mubr.msk.f32.mxu1 %vm1351_vm7, %v2342_v55 }
 0x9a7   : > { %v2347_v59 = vadd.f32 %v4607_v58, %v4349_v52 }
 0x9a9   : > { %4902 = vmatmul.mubr.msk.f32.vlgmr.msra.gmra.mrb[32].mxu1 %vm1351_vm7, %v2347_v59 }
 0x9aa   : > { %4908 = vmatprep.mubr.msk.f32.mxu1 %vm6146_vm0, %v6137_v2 }
 0xa7c   : > { %v4903_v61 = vpop.f32.mrb[32].mxu1 }
 0xa7d   : > { %v2437_v62 = vadd.f32 %v4903_v61, %v4350_v60  ;;  %v2431_v63 = vpop.f32.mrb[33].mxu1 }
 0xa7e   : > { %v2432_v0 = vadd.f32 %v4350_v60, %v2431_v63 }
 0xa7f   : > { %v2443_v1 = vmin.f32 %v2437_v62, 0.0  ;;  %vm2441_vm12 = vcmp.gt.f32.partialorder %v2437_v62, 0.0 }
 0xa80   : > { %v2442_v3 = vmin.f32 %v2432_v0, 0.0  ;;  %vm2440_vm6 = vcmp.gt.f32.partialorder %v2432_v0, 0.0 }
 0xa81   : > { %v2446_v4 = vmul.f32 1.442695, %v2443_v1 }
 0xa82   : > { %v2444_v5 = vmul.f32 1.442695, %v2442_v3 }
 0xa83   : > { %5671 = vpow2.f32 %v2446_v4 }
 0xa84   : > { %5673 = vpow2.f32 %v2444_v5 }
 0xa8d   : > { %v5672_v6 = vpop.eup %5671 }
 0xa8e   : > { %v5674_v7 = vpop.eup %5673  ;;  %v4354_v8 = vadd.f32 -1.0, %v5672_v6 }
 0xa8f   : > { %v4353_v9 = vadd.f32 -1.0, %v5674_v7 }
 0xa90   : > { %v2451_v10 = vsel %vm2441_vm12, %v2437_v62, %v4354_v8 }
 0xa91   : > { %v2450_v11 = vsel %vm2440_vm6, %v2432_v0, %v4353_v9 }
 0xa92   : > { %v5113_v12 = vpack.c.bf16 %v2451_v10, %v2450_v11 }
 0xa94   : > { %5114 = vmatpush3.bf16.msra.mxu1 %v5113_v12 }
 0xa97   : > { %4909 = vmatmul.mubr.msk.f32.vlgmr.msra.gmra.mrb[34].mxu1 %vm1351_vm7, %v6324_v22 }
 0xb6a   : > { %v2518_v13 = vpop.f32.mrb[34].mxu1 }
 0xb6b   : > { %4356 = vst.msk [vmem:[%s6479_s20 + $0x2] sm:$0x3] %vm7345_vm3, %v2518_v13  ;;  %v4910_v14 = vpop.f32.mrb[35].mxu1 }
 0xb6c LB: >> { %s2548_s0 = scalar_lea.vmem %s7305_s2, %s6099_s29  ;;  %s4060_s27 = scalar_lea.vmem [#allocation3], %s6099_s29  ;;  %s6099_s29 = sphi %s6865_s29, %s2529_s29   ;;  %v6095_v24 = vphi %v6093_v24, %v6094_v24   ;;  %v6091_v23 = vphi %v6089_v23, %v6090_v23   ;;  %v6087_v21 = vphi %v6085_v21, %v6086_v21   ;;  %v6083_v20 = vphi %v6081_v20, %v6082_v20   ;;  %v6079_v18 = vphi %v6077_v18, %v6078_v18   ;;  %v6075_v17 = vphi %v6073_v17, %v6074_v17   ;;  %v6071_v16 = vphi %v6069_v16, %v6070_v16   ;;  %v6067_v15 = vphi %v6065_v15, %v6066_v15  }
 0xb6d   : >> { %v4357_v26 = vld [vmem:[%s4060_s27 + $0xbe] sm:$0xff]  ;;  %v4358_v27 = vld [vmem:[%s4060_s27 + $0xc6] sm:$0xff]  ;;  %v4359_v28 = vld [vmem:[%s4060_s27 + $0xce] sm:$0xff]  ;;  %s2529_s29 = sadd.s32 1, %s6099_s29  }
 0xb6e   : >> { %v4360_v29 = vld [vmem:[%s4060_s27 + $0xd6] sm:$0xff]  ;;  %v4361_v30 = vld [vmem:[%s4060_s27 + $0xde] sm:$0xff]  ;;  %v4362_v32 = vld [vmem:[%s4060_s27 + $0xe6] sm:$0xff]  ;;  %p2526_p13 = scmp.ge.s32.totalorder %s2529_s29, 32  }
 0xb6f   : >> { %v4363_v33 = vld [vmem:[%s4060_s27 + $0xee] sm:$0xff]  ;;  %v4364_v34 = vld [vmem:[%s4060_s27 + $0xf6] sm:$0xff]  ;;  %v4365_v35 = vld [vmem:[%s2548_s0] ss:$0 sm:$0xff]  ;;  %2848 = vst.msk [vmem:[#allocation4 + $0x18] sm:$0x7f] (%p2526_p13), %vm7344_vm8, %v6137_v2 }
 0xb70   : >> { %v2554_v36 = vmul.f32 %v4365_v35, %v4357_v26  ;;  %v2555_v37 = vmul.f32 %v4365_v35, %v4358_v27  ;;  %v2556_v38 = vmul.f32 %v4365_v35, %v4359_v28  ;;  %v2557_v39 = vmul.f32 %v4365_v35, %v4360_v29  ;;  %2528 = sbr.rel (!%p2526_p13) target bundleno = 2924 (0xb6c), region = 159  ;;  %v2585_v52 = vld [vmem:[%s7307_s4] sm:$0xff] (%p2526_p13)  ;;  %2845 = vst.msk [vmem:[#allocation4] sm:$0xff] (%p2526_p13), %vm1351_vm7, %v6137_v2  ;;  %s7371_s21 = smov (%p2526_p13), 64  }
 0xb71   : >> { %v2558_v40 = vmul.f32 %v4365_v35, %v4361_v30  ;;  %v2559_v41 = vmul.f32 %v4365_v35, %v4362_v32  ;;  %v2560_v42 = vmul.f32 %v4365_v35, %v4363_v33  ;;  %v2561_v43 = vmul.f32 %v4365_v35, %v4364_v34  ;;  %v4366_v53 = vld [vmem:[%s7306_s3] ss:$0 sm:$0xff] (%p2526_p13)  ;;  %4911 = vmatprep.subr.mxu1 (%p2526_p13), %v2585_v52  ;;  %s7372_s25 = smov (%p2526_p13), 16   ;;  %s7373_s30 = smov (%p2526_p13), 32  }
 0xb72   : >> { %v2562_v44 = vadd.f32 %v6095_v24, %v2554_v36   ;;  %v2563_v45 = vadd.f32 %v6091_v23, %v2555_v37   ;;  %v2564_v46 = vadd.f32 %v6087_v21, %v2556_v38   ;;  %v2565_v47 = vadd.f32 %v6083_v20, %v2557_v39   ;;  %4912 = vmatpush3.msra.mxu1 (%p2526_p13), %v2585_v52  ;;  %v4367_v62 = vld [vmem:[%s7308_s5] ss:$0 sm:$0xff] (%p2526_p13)  ;;  %s7375_s26 = smov (%p2526_p13), 80   ;;  %s7057_s11 = smov (%p2526_p13), 0  }
 0xb73   : >> { %v2566_v48 = vadd.f32 %v6079_v18, %v2558_v40   ;;  %v2567_v49 = vadd.f32 %v6075_v17, %v2559_v41   ;;  %v2568_v50 = vadd.f32 %v6071_v16, %v2560_v42   ;;  %v2569_v51 = vadd.f32 %v6067_v15, %v2561_v43  }
 0xb74   : >> { %v6082_v20 = vmov %v2565_v47   ;;  %v6086_v21 = vmov %v2564_v46   ;;  %v6090_v23 = vmov %v2563_v45   ;;  %v6094_v24 = vmov %v2562_v44  }
 0xb75   : >> { %v6066_v15 = vmov %v2569_v51   ;;  %v6070_v16 = vmov %v2568_v50   ;;  %v6074_v17 = vmov %v2567_v49   ;;  %v6078_v18 = vmov %v2566_v48  }
 0xb76   : > { %v2577_v54 = vadd.f32 (%p2526_p13), %v4366_v53, %v2562_v44  ;;  %v2578_v55 = vadd.f32 (%p2526_p13), %v4366_v53, %v2563_v45  ;;  %v2579_v56 = vadd.f32 (%p2526_p13), %v4366_v53, %v2564_v46  ;;  %vm7363_vm1 = vcmask (%p2526_p13), 64512  }
 0xb77   : > { %vm7364_vm2 = vmmov %vm7363_vm1  ;;  %v2580_v57 = vadd.f32 %v4366_v53, %v2565_v47  ;;  %v2581_v58 = vadd.f32 %v4366_v53, %v2566_v48  ;;  %v2582_v59 = vadd.f32 %v4366_v53, %v2567_v49  ;;  %v2583_v60 = vadd.f32 %v4366_v53, %v2568_v50 }
 0xb78   : > { %4913 = vmatprep.mubr.msk.f32.mxu1 %vm7363_vm1, %v2577_v54  ;;  %vm7365_vm4 = vmmov %vm7363_vm1  ;;  %v2584_v61 = vadd.f32 %v4366_v53, %v2569_v51 }
 0xb79   : > { %4914 = vmatmul.mubr.msk.f32.vlgmr.msra.gmra.mrb[36].mxu1 %vm7364_vm2, %v2578_v55  ;;  %vm7366_vm5 = vmmov %vm7363_vm1 }
 0xb7a   : > { %4916 = vmatprep.mubr.msk.f32.mxu1 %vm7365_vm4, %v2579_v56  ;;  %vm7367_vm12 = vmmov %vm7363_vm1 }
 0xb7b   : > { %vm7368_vm6 = vmmov %vm7363_vm1 }
 0xb7c   : > { %vm7369_vm8 = vmmov %vm7363_vm1 }
 0xb7d   : > { %4917 = vmatmul.mubr.msk.f32.gmra.mrb[38].mxu1 %vm7366_vm5, %v2580_v57  ;;  %vm7370_vm3 = vmmov %vm7363_vm1 }
 0xb7e   : > { %4919 = vmatprep.mubr.msk.f32.mxu1 %vm7367_vm12, %v2581_v58 }
 0xb81   : > { %4920 = vmatmul.mubr.msk.f32.gmra.mrb[40].mxu1 %vm7368_vm6, %v2582_v59 }
 0xb82   : > { %4922 = vmatprep.mubr.msk.f32.mxu1 %vm7369_vm8, %v2583_v60 }
 0xb85   : > { %4923 = vmatmul.mubr.msk.f32.gmra.mrb[42].mxu1 %vm7370_vm3, %v2584_v61 }
 0xb86   : > { %4941 = vmatprep.mubr.msk.f32.mxu1 %vm1269_vm14, %v6312_v19 }
 0xc4c   : > { %v4915_v63 = vpop.f32.mrb[36].mxu1 }
 0xc4d   : > { %v2689_v0 = vadd.f32 %v4915_v63, %v4367_v62  ;;  %v2683_v1 = vpop.f32.mrb[37].mxu1 }
 0xc4e   : > { %v2684_v3 = vadd.f32 %v4367_v62, %v2683_v1  ;;  %v2995_v1 = vld [vmem:[%s7309_s6 + $0x88] sm:$0xff] }
 0xc4f   : > { %v2731_v4 = vmin.f32 %v2689_v0, 0.0  ;;  %vm2723_vm8 = vcmp.gt.f32.partialorder %v2689_v0, 0.0 }
 0xc50   : > { %v2730_v5 = vmin.f32 %v2684_v3, 0.0  ;;  %v4918_v6 = vpop.f32.mrb[38].mxu1  ;;  %vm2722_vm3 = vcmp.gt.f32.partialorder %v2684_v3, 0.0 }
 0xc51   : > { %v2740_v7 = vmul.f32 1.442695, %v2731_v4  ;;  %v2699_v8 = vadd.f32 %v4918_v6, %v4367_v62  ;;  %v2693_v9 = vpop.f32.mrb[39].mxu1  ;;  %v2996_v6 = vld [vmem:[%s7309_s6 + $0x90] sm:$0xff] }
 0xc52   : > { %v2738_v10 = vmul.f32 1.442695, %v2730_v5  ;;  %v2694_v11 = vadd.f32 %v4367_v62, %v2693_v9  ;;  %v2979_v5 = vld [vmem:[%s7309_s6 + $0x8] sm:$0xff] }
 0xc53   : > { %5710 = vpow2.f32 %v2740_v7  ;;  %v2733_v12 = vmin.f32 %v2699_v8, 0.0  ;;  %vm2725_vm1 = vcmp.gt.f32.partialorder %v2699_v8, 0.0  ;;  %v2997_v7 = vld [vmem:[%s7309_s6 + $0x98] sm:$0xff] }
 0xc54   : > { %5712 = vpow2.f32 %v2738_v10  ;;  %v2732_v13 = vmin.f32 %v2694_v11, 0.0  ;;  %v4921_v14 = vpop.f32.mrb[40].mxu1  ;;  %vm2724_vm2 = vcmp.gt.f32.partialorder %v2694_v11, 0.0  ;;  %v5135_v9 = vpack.c.bf16 %v2997_v7, %v2996_v6  ;;  %v2980_v10 = vld [vmem:[%s7309_s6 + $0x10] sm:$0xff] }
 0xc55   : > { %v2744_v15 = vmul.f32 1.442695, %v2733_v12  ;;  %v2709_v16 = vadd.f32 %v4921_v14, %v4367_v62  ;;  %v2703_v17 = vpop.f32.mrb[41].mxu1  ;;  %v2999_v14 = vld [vmem:[%s7309_s6 + $0xa8] sm:$0xff] }
 0xc56   : > { %v2742_v18 = vmul.f32 1.442695, %v2732_v13  ;;  %v2704_v20 = vadd.f32 %v4367_v62, %v2703_v17  ;;  %v2998_v13 = vld [vmem:[%s7309_s6 + $0xa0] sm:$0xff]  ;;  %v2983_v17 = vld [vmem:[%s7309_s6 + $0x28] sm:$0xff] }
 0xc57   : > { %5714 = vpow2.f32 %v2744_v15  ;;  %v2735_v21 = vmin.f32 %v2709_v16, 0.0  ;;  %vm2727_vm4 = vcmp.gt.f32.partialorder %v2709_v16, 0.0  ;;  %v2982_v15 = vld [vmem:[%s7309_s6 + $0x20] sm:$0xff] }
 0xc58   : > { %5716 = vpow2.f32 %v2742_v18  ;;  %v2734_v23 = vmin.f32 %v2704_v20, 0.0  ;;  %v4924_v24 = vpop.f32.mrb[42].mxu1  ;;  %vm2726_vm5 = vcmp.gt.f32.partialorder %v2704_v20, 0.0  ;;  %v5141_v18 = vpack.c.bf16 %v2983_v17, %v2982_v15 }
 0xc59   : > { %v2748_v26 = vmul.f32 1.442695, %v2735_v21  ;;  %v2719_v27 = vadd.f32 %v4924_v24, %v4367_v62  ;;  %v2713_v28 = vpop.f32.mrb[43].mxu1  ;;  %v3001_v24 = vld [vmem:[%s7309_s6 + $0xb8] sm:$0xff] }
 0xc5a   : > { %v2746_v29 = vmul.f32 1.442695, %v2734_v23  ;;  %v2714_v30 = vadd.f32 %v4367_v62, %v2713_v28  ;;  %v3000_v23 = vld [vmem:[%s7309_s6 + $0xb0] sm:$0xff]  ;;  %v2985_v28 = vld [vmem:[%s7309_s6 + $0x38] sm:$0xff] }
 0xc5b   : > { %5718 = vpow2.f32 %v2748_v26  ;;  %v2737_v32 = vmin.f32 %v2719_v27, 0.0  ;;  %vm2729_vm12 = vcmp.gt.f32.partialorder %v2719_v27, 0.0  ;;  %v2984_v26 = vld [vmem:[%s7309_s6 + $0x30] sm:$0xff] }
 0xc5c   : > { %5720 = vpow2.f32 %v2746_v29  ;;  %v2736_v33 = vmin.f32 %v2714_v30, 0.0  ;;  %vm2728_vm6 = vcmp.gt.f32.partialorder %v2714_v30, 0.0  ;;  %v5145_v29 = vpack.c.bf16 %v2985_v28, %v2984_v26 }
 0xc5d   : > { %v5711_v34 = vpop.eup %5710  ;;  %v2752_v35 = vmul.f32 1.442695, %v2737_v32  ;;  %v3003_v32 = vld [vmem:[%s7309_s6 + $0xc8] sm:$0xff] }
 0xc5e   : > { %v5713_v36 = vpop.eup %5712  ;;  %v4377_v37 = vadd.f32 -1.0, %v5711_v34  ;;  %v2750_v38 = vmul.f32 1.442695, %v2736_v33  ;;  %v2986_v33 = vld [vmem:[%s7309_s6 + $0x40] sm:$0xff] }
 0xc5f   : > { %v4376_v39 = vadd.f32 -1.0, %v5713_v36  ;;  %5722 = vpow2.f32 %v2752_v35  ;;  %v2987_v35 = vld [vmem:[%s7309_s6 + $0x48] sm:$0xff] }
 0xc60   : > { %5724 = vpow2.f32 %v2750_v38  ;;  %v2763_v40 = vsel %vm2723_vm8, %v2689_v0, %v4377_v37  ;;  %v2994_v0 = vld [vmem:[%s7309_s6 + $0x80] sm:$0xff]  ;;  %v5149_v38 = vpack.c.bf16 %v2987_v35, %v2986_v33 }
 0xc61   : > { %v5715_v41 = vpop.eup %5714  ;;  %v2762_v42 = vsel %vm2722_vm3, %v2684_v3, %v4376_v39  ;;  %v2978_v3 = vld [vmem:[%s7309_s6] sm:$0xff]  ;;  %v5131_v4 = vpack.c.bf16 %v2995_v1, %v2994_v0  ;;  %v3008_v1 = vld [vmem:[%s7309_s6 + $0xf0] sm:$0xff] }
 0xc62   : > { %v5717_v43 = vpop.eup %5716  ;;  %v4379_v44 = vadd.f32 -1.0, %v5715_v41  ;;  %v5115_v45 = vpack.c.bf16 %v2763_v40, %v2762_v42 }
 0xc63   : > { %v4378_v46 = vadd.f32 -1.0, %v5717_v43  ;;  %5132 = vmatprep.subr.bf16.mxu0 %v5131_v4 }
 0xc64   : > { %5116 = vmatprep.subr.bf16.mxu1 %v5115_v45  ;;  %v2765_v47 = vsel %vm2725_vm1, %v2699_v8, %v4379_v44  ;;  %v5133_v8 = vpack.c.bf16 %v2979_v5, %v2978_v3  ;;  %v3009_v3 = vld [vmem:[%s7309_s6 + $0xf8] sm:$0xff]  ;;  %vm7378_vm1 = vcmask 123904  }
 0xc65   : > { %v5719_v48 = vpop.eup %5718  ;;  %5118 = vmatpush3.bf16.msra.mxu1 %v5115_v45  ;;  %v2764_v49 = vsel %vm2724_vm2, %v2694_v11, %v4378_v46  ;;  %v2981_v11 = vld [vmem:[%s7309_s6 + $0x18] sm:$0xff] }
 0xc66   : > { %v5721_v50 = vpop.eup %5720  ;;  %v4381_v51 = vadd.f32 -1.0, %v5719_v48  ;;  %v5119_v52 = vpack.c.bf16 %v2765_v47, %v2764_v49  ;;  %5134 = vmatpush3.bf16.msra.mxu0 %v5133_v8  ;;  %v5137_v12 = vpack.c.bf16 %v2981_v11, %v2980_v10  ;;  %v2992_v8 = vld [vmem:[%s7309_s6 + $0x70] sm:$0xff]  ;;  %v5159_v10 = vpack.c.bf16 %v3009_v3, %v3008_v1 }
 0xc67   : > { %v4380_v53 = vadd.f32 -1.0, %v5721_v50  ;;  %5136 = vmatprep.subr.bf16.mxu0 %v5135_v9  ;;  %v2993_v9 = vld [vmem:[%s7309_s6 + $0x78] sm:$0xff] }
 0xc68   : > { %5120 = vmatprep.subr.bf16.mxu1 %v5119_v52  ;;  %v2767_v54 = vsel %vm2727_vm4, %v2709_v16, %v4381_v51  ;;  %v5139_v16 = vpack.c.bf16 %v2999_v14, %v2998_v13  ;;  %v3004_v51 = vld [vmem:[%s7309_s6 + $0xd0] sm:$0xff]  ;;  %v5161_v15 = vpack.c.bf16 %v2993_v9, %v2992_v8 }
 0xc69   : > { %v5723_v55 = vpop.eup %5722  ;;  %5122 = vmatpush3.bf16.msra.mxu1 %v5119_v52  ;;  %v2766_v56 = vsel %vm2726_vm5, %v2704_v20, %v4380_v53  ;;  %v3005_v52 = vld [vmem:[%s7309_s6 + $0xd8] sm:$0xff]  ;;  %v2988_v53 = vld [vmem:[%s7309_s6 + $0x50] sm:$0xff] }
 0xc6a   : > { %v5725_v57 = vpop.eup %5724  ;;  %v4383_v58 = vadd.f32 -1.0, %v5723_v55  ;;  %v5123_v59 = vpack.c.bf16 %v2767_v54, %v2766_v56  ;;  %5138 = vmatpush3.bf16.msra.mxu0 %v5137_v12  ;;  %v2989_v54 = vld [vmem:[%s7309_s6 + $0x58] sm:$0xff]  ;;  %v5151_v55 = vpack.c.bf16 %v3005_v52, %v3004_v51 }
 0xc6b   : > { %v4382_v60 = vadd.f32 -1.0, %v5725_v57  ;;  %5140 = vmatprep.subr.bf16.mxu0 %v5139_v16  ;;  %v5153_v56 = vpack.c.bf16 %v2989_v54, %v2988_v53  ;;  %v3006_v57 = vld [vmem:[%s7309_s6 + $0xe0] sm:$0xff] }
 0xc6c   : > { %5124 = vmatprep.subr.bf16.mxu1 %v5123_v59  ;;  %v2769_v61 = vsel %vm2729_vm12, %v2719_v27, %v4383_v58  ;;  %v5143_v27 = vpack.c.bf16 %v3001_v24, %v3000_v23  ;;  %v3007_v58 = vld [vmem:[%s7309_s6 + $0xe8] sm:$0xff] }
 0xc6d   : > { %5126 = vmatpush3.bf16.msra.mxu1 %v5123_v59  ;;  %v2768_v62 = vsel %vm2728_vm6, %v2714_v30, %v4382_v60  ;;  %v3002_v30 = vld [vmem:[%s7309_s6 + $0xc0] sm:$0xff]  ;;  %v5155_v59 = vpack.c.bf16 %v3007_v58, %v3006_v57 }
 0xc6e   : > { %v5127_v63 = vpack.c.bf16 %v2769_v61, %v2768_v62  ;;  %5142 = vmatpush3.bf16.msra.mxu0 %v5141_v18  ;;  %v5147_v34 = vpack.c.bf16 %v3003_v32, %v3002_v30  ;;  %v2990_v60 = vld [vmem:[%s7309_s6 + $0x60] sm:$0xff]  ;;  %v2991_v61 = vld [vmem:[%s7309_s6 + $0x68] sm:$0xff] }
 0xc6f   : > { %5144 = vmatprep.subr.bf16.mxu0 %v5143_v27  ;;  %v5157_v7 = vpack.c.bf16 %v2991_v61, %v2990_v60 }
 0xc70   : > { %5128 = vmatprep.subr.bf16.mxu1 %v5127_v63 }
 0xc71   : > { %5130 = vmatpush3.bf16.msra.mxu1 %v5127_v63 }
 0xc72   : > { %5146 = vmatpush3.bf16.msra.mxu0 %v5145_v29 }
 0xc73   : > { %5148 = vmatprep.subr.bf16.mxu0 %v5147_v34  ;;  %v2849_v34 = vld [vmem:[#allocation4] sm:$0xff] }
 0xc74   : > { %4942 = vmatmul.mubr.msk.f32.vlgmr.msra.gmra.mrb[44].mxu1 %vm1269_vm14, %v6331_v25 }
 0xc76   : > { %5150 = vmatpush3.bf16.msra.mxu0 %v5149_v38 }
 0xc77   : > { %5152 = vmatprep.subr.bf16.mxu0 %v5151_v55 }
 0xc7a   : > { %5154 = vmatpush3.bf16.msra.mxu0 %v5153_v56 }
 0xc7b   : > { %5156 = vmatprep.subr.bf16.mxu0 %v5155_v59 }
 0xc7e   : > { %5158 = vmatpush3.bf16.msra.mxu0 %v5157_v7 }
 0xc7f   : > { %5160 = vmatprep.subr.bf16.mxu0 %v5159_v10 }
 0xc82   : > { %5162 = vmatpush3.bf16.msra.mxu0 %v5161_v15 }
 0xd47   : > { %v4943_v20 = vpop.f32.mrb[44].mxu1 }
 0xd48   : > { %2847 = vst.msk [vmem:[#allocation4 + $0x10] sm:$0xff] %vm1351_vm7, %v4943_v20  ;;  %v2836_v21 = vpop.f32.mrb[45].mxu1 }
 0xd49   : > { %2846 = vst.msk [vmem:[#allocation4 + $0x8] sm:$0xff] %vm1351_vm7, %v2836_v21 }
 0xd4f   : > { %v2869_v36 = vld [vmem:[#allocation4 + $0x14] sm:$0xff] }
 0xd50   : > { %v2866_v37 = vld [vmem:[#allocation4 + $0x11] sm:$0xff]  ;;  %2942 = vrot.lane.b32.xlu0 %v2869_v36, %s7371_s21  ;;  %v2851_v39 = vld [vmem:[#allocation4 + $0x1] sm:$0xff]  ;;  %v2852_v40 = vld [vmem:[#allocation4 + $0x9] sm:$0xff] }
 0xd51   : > { %2930 = vrot.lane.b32.xlu1 %v2866_v37, %s7372_s25  ;;  %v5675_v41 = vpack.i.bf16 %v2851_v39, %v2852_v40  ;;  %v2867_v42 = vld [vmem:[#allocation4 + $0x12] sm:$0xff]  ;;  %v2853_v43 = vld [vmem:[#allocation4 + $0x2] sm:$0xff]  ;;  %v2854_v44 = vld [vmem:[#allocation4 + $0xa] sm:$0xff] }
 0xd52   : > { %v2868_v45 = vld [vmem:[#allocation4 + $0x13] sm:$0xff]  ;;  %v2855_v46 = vld [vmem:[#allocation4 + $0x3] sm:$0xff]  ;;  %v2856_v47 = vld [vmem:[#allocation4 + $0xb] sm:$0xff]  ;;  %v5680_v48 = vpack.i.bf16 %v2853_v43, %v2854_v44 }
 0xd53   : > { %v2859_v49 = vld [vmem:[#allocation4 + $0x5] sm:$0xff]  ;;  %v2860_v50 = vld [vmem:[#allocation4 + $0xd] sm:$0xff]  ;;  %v5685_v62 = vpack.i.bf16 %v2855_v46, %v2856_v47  ;;  %v2870_v17 = vld [vmem:[#allocation4 + $0x15] sm:$0xff] }
 0xd54   : > { %5676 = vrot.lane.b32.xlu0 %v5675_v41, %s7372_s25  ;;  %s7374_s25 = smov 48   ;;  %v5695_v63 = vpack.i.bf16 %v2859_v49, %v2860_v50  ;;  %v2857_v0 = vld [vmem:[#allocation4 + $0x4] sm:$0xff]  ;;  %v2858_v4 = vld [vmem:[#allocation4 + $0xc] sm:$0xff]  ;;  %v2872_v18 = vld [vmem:[#allocation4 + $0x17] sm:$0xff] }
 0xd55   : > { %2934 = vrot.lane.b32.xlu1 %v2867_v42, %s7373_s30  ;;  %v2861_v5 = vld [vmem:[#allocation4 + $0x6] sm:$0xff]  ;;  %v2862_v6 = vld [vmem:[#allocation4 + $0xe] sm:$0xff]  ;;  %v5690_v11 = vpack.i.bf16 %v2857_v0, %v2858_v4  ;;  %v2871_v20 = vld [vmem:[#allocation4 + $0x16] sm:$0xff] }
 0xd56   : > { %v5700_v12 = vpack.i.bf16 %v2861_v5, %v2862_v6  ;;  %v2863_v13 = vld [vmem:[#allocation4 + $0x7] sm:$0xff]  ;;  %v2864_v14 = vld [vmem:[#allocation4 + $0xf] sm:$0xff] }
 0xd57   : > { %v5705_v16 = vpack.i.bf16 %v2863_v13, %v2864_v14  ;;  %v2865_v39 = vld [vmem:[#allocation4 + $0x10] sm:$0xff]  ;;  %v2850_v40 = vld [vmem:[#allocation4 + $0x8] sm:$0xff]  ;;  %v3092_v13 = vld [vmem:[%s7311_s8] sm:$0xff] }
 0xd58   : > { %5681 = vrot.lane.b32.xlu0 %v5680_v48, %s7373_s30  ;;  %s7377_s30 = smov 112   ;;  %v3093_v14 = vld [vmem:[%s7311_s8 + $0x8] sm:$0xff] }
 0xd59   : > { %2938 = vrot.lane.b32.xlu1 %v2868_v45, %s7374_s25  ;;  %v5163_v15 = vpack.c.bf16 %v3093_v14, %v3092_v13 }
 0xd5b   : > { %5164 = vmatprep.subr.bf16.mxu1 %v5163_v15 }
 0xd5c   : > { %5696 = vrot.lane.b32.xlu0 %v5695_v63, %s7375_s26  ;;  %5166 = vmatpush3.bf16.msra.mxu1 %v5163_v15 }
 0xd5d   : > { %5686 = vrot.lane.b32.xlu1 %v5685_v62, %s7374_s25  ;;  %s7376_s25 = smov 96   ;;  %5167 = vmatprep.subr.bf16.mxu1 %v6145_v31 }
 0xd60   : > { %5701 = vrot.lane.b32.xlu0 %v5700_v12, %s7376_s25 }
 0xd61   : > { %5691 = vrot.lane.b32.xlu1 %v5690_v11, %s7371_s21 }
 0xd64   : > { %5706 = vrot.lane.b32.xlu0 %v5705_v16, %s7377_s30 }
 0xd65   : > { %2946 = vrot.lane.b32.xlu1 %v2870_v17, %s7375_s26  ;;  %v4386_v17 = vld [vmem:[%s7310_s7] ss:$0 sm:$0xff] }
 0xd68   : > { %2950 = vrot.lane.b32.xlu0 %v2871_v20, %s7376_s25 }
 0xd69   : > { %2954 = vrot.lane.b32.xlu1 %v2872_v18, %s7377_s30 }
 0xdc2   : > { %v2943_v21 = vpop.permute.xlu0 %2942 }
 0xdc3   : > { %v2931_v23 = vpop.permute.xlu1 %2930 }
 0xdc4   : > { %v2971_v41 = vsel %vm1351_vm7, %v2865_v39, %v2931_v23 }
 0xdc6   : > { %v5677_v26 = vpop.permute.xlu0 %5676 }
 0xdc7   : > { %v2935_v24 = vpop.permute.xlu1 %2934  ;;  %v5679_v29 = vunpack.i.h.bf16 %v5677_v26  ;;  %v5678_v30 = vunpack.i.l.bf16 %v5677_v26 }
 0xdc8   : > { %v2972_v54 = vsel %vm1467_vm9, %v2971_v41, %v2935_v24 }
 0xdc9   : > { %v2957_v42 = vsel %vm1351_vm7, %v2849_v34, %v5679_v29  ;;  %v2958_v43 = vsel %vm1351_vm7, %v2850_v40, %v5678_v30 }
 0xdca   : > { %v5682_v28 = vpop.permute.xlu0 %5681 }
 0xdcb   : > { %v2939_v27 = vpop.permute.xlu1 %2938  ;;  %v5684_v35 = vunpack.i.h.bf16 %v5682_v28  ;;  %v5683_v36 = vunpack.i.l.bf16 %v5682_v28  ;;  %v4387_v28 = vld [vmem:[%s7312_s9] ss:$0 sm:$0xff] }
 0xdcc   : > { %v2973_v58 = vsel %vm1470_vm10, %v2972_v54, %v2939_v27  ;;  %v6129_v54 = vmov 0.0  }
 0xdcd   : > { %v2959_v46 = vsel %vm1467_vm9, %v2957_v42, %v5684_v35  ;;  %v2960_v47 = vsel %vm1467_vm9, %v2958_v43, %v5683_v36  ;;  %v2974_v5 = vsel %vm1269_vm14, %v2973_v58, %v2943_v21 }
 0xdce   : > { %v5697_v33 = vpop.permute.xlu0 %5696 }
 0xdcf   : > { %v5687_v32 = vpop.permute.xlu1 %5686  ;;  %v5699_v52 = vunpack.i.h.bf16 %v5697_v33  ;;  %v5698_v53 = vunpack.i.l.bf16 %v5697_v33 }
 0xdd0   : > { %v5689_v37 = vunpack.i.h.bf16 %v5687_v32  ;;  %v5688_v38 = vunpack.i.l.bf16 %v5687_v32 }
 0xdd2   : > { %v5702_v45 = vpop.permute.xlu0 %5701  ;;  %v2961_v50 = vsel %vm1470_vm10, %v2959_v46, %v5689_v37  ;;  %v2962_v51 = vsel %vm1470_vm10, %v2960_v47, %v5688_v38  ;;  %v6101_v47 = vmov 0.0  }
 0xdd3   : > { %v5692_v44 = vpop.permute.xlu1 %5691  ;;  %v5703_v56 = vunpack.i.l.bf16 %v5702_v45  ;;  %v5704_v59 = vunpack.i.h.bf16 %v5702_v45 }
 0xdd4   : > { %v5694_v48 = vunpack.i.h.bf16 %v5692_v44  ;;  %v5693_v49 = vunpack.i.l.bf16 %v5692_v44 }
 0xdd6   : > { %v2963_v55 = vsel %vm1269_vm14, %v2961_v50, %v5694_v48  ;;  %v2964_v57 = vsel %vm1269_vm14, %v2962_v51, %v5693_v49  ;;  %v5707_v61 = vpop.permute.xlu0 %5706  ;;  %v6105_v48 = vmov 0.0   ;;  %v6109_v49 = vmov 0.0  }
 0xdd7   : > { %v2947_v60 = vpop.permute.xlu1 %2946  ;;  %v2966_v62 = vsel %vm1475_vm11, %v2964_v57, %v5698_v53  ;;  %v2965_v63 = vsel %vm1475_vm11, %v2963_v55, %v5699_v52  ;;  %v5709_v0 = vunpack.i.h.bf16 %v5707_v61  ;;  %v5708_v1 = vunpack.i.l.bf16 %v5707_v61 }
 0xdd8   : > { %v2968_v3 = vsel %vm1478_vm13, %v2966_v62, %v5703_v56  ;;  %v2967_v4 = vsel %vm1478_vm13, %v2965_v63, %v5704_v59  ;;  %v2975_v8 = vsel %vm1475_vm11, %v2974_v5, %v2947_v60  ;;  %v6113_v50 = vmov 0.0  }
 0xdd9   : > { %v2970_v6 = vsel %vm1481_vm15, %v2968_v3, %v5708_v1  ;;  %v2969_v7 = vsel %vm1481_vm15, %v2967_v4, %v5709_v0  ;;  %v6117_v51 = vmov 0.0   ;;  %v6121_v52 = vmov 0.0  }
 0xdda   : > { %v2951_v10 = vpop.permute.xlu0 %2950  ;;  %3081 = vmatprep.mubr.f32.mxu0 %v2970_v6  ;;  %v6125_v53 = vmov 0.0  }
 0xddb   : > { %v2955_v9 = vpop.permute.xlu1 %2954  ;;  %v2976_v11 = vsel %vm1478_vm13, %v2975_v8, %v2951_v10  ;;  %3082 = vmatmul.mubr.f32.vlgmr.msra.gmra.mrb[48].mxu0 %v2969_v7 }
 0xddc   : > { %v2977_v12 = vsel %vm1481_vm15, %v2976_v11, %v2955_v9 }
 0xddd   : > { %3086 = vmatprep.mubr.f32.mxu0 %v2977_v12 }
 0xddf   : > { %3087 = vmatmul.mubr.f32.gmra.mrb[50].mxu0 %v2970_v6 }
 0xeae   : > { %v4666_v16 = vpop.f32.mrb[48].mxu0 }
 0xeaf   : > { %v4667_v18 = vpop.f32.mrb[49].mxu0 }
 0xeb0   : > { %v4668_v20 = vadd.f32 %v4667_v18, %v4666_v16 }
 0xeb2   : > { %v3084_v21 = vadd.f32 %v4668_v20, %v4386_v17  ;;  %v4669_v23 = vpop.f32.mrb[50].mxu0 }
 0xeb3   : > { %v4670_v24 = vpop.f32.mrb[51].mxu0 }
 0xeb4   : > { %v4671_v26 = vadd.f32 %v4670_v24, %v4669_v23  ;;  %4948 = vmatprep.mubr.msk.f32.mxu1 %vm1351_vm7, %v3084_v21 }
 0xeb6   : > { %v3089_v27 = vadd.f32 %v4671_v26, %v4386_v17 }
 0xeb8   : > { %4949 = vmatmul.mubr.msk.f32.vlgmr.msra.gmra.mrb[46].mxu1 %vm1351_vm7, %v3089_v27 }
 0xeb9   : > { %4955 = vmatprep.mubr.msk.f32.mxu1 %vm6146_vm0, %v6137_v2 }
 0xf8b   : > { %v4950_v29 = vpop.f32.mrb[46].mxu1 }
 0xf8c   : > { %v3179_v30 = vadd.f32 %v4950_v29, %v4387_v28  ;;  %v3173_v32 = vpop.f32.mrb[47].mxu1 }
 0xf8d   : > { %v3174_v33 = vadd.f32 %v4387_v28, %v3173_v32 }
 0xf8e   : > { %v3185_v34 = vmin.f32 %v3179_v30, 0.0  ;;  %vm3183_vm8 = vcmp.gt.f32.partialorder %v3179_v30, 0.0 }
 0xf8f   : > { %v3184_v35 = vmin.f32 %v3174_v33, 0.0  ;;  %vm3182_vm3 = vcmp.gt.f32.partialorder %v3174_v33, 0.0 }
 0xf90   : > { %v3188_v36 = vmul.f32 1.442695, %v3185_v34 }
 0xf91   : > { %v3186_v37 = vmul.f32 1.442695, %v3184_v35 }
 0xf92   : > { %5726 = vpow2.f32 %v3188_v36 }
 0xf93   : > { %5728 = vpow2.f32 %v3186_v37 }
 0xf9c   : > { %v5727_v38 = vpop.eup %5726 }
 0xf9d   : > { %v5729_v39 = vpop.eup %5728  ;;  %v4391_v40 = vadd.f32 -1.0, %v5727_v38 }
 0xf9e   : > { %v4390_v41 = vadd.f32 -1.0, %v5729_v39 }
 0xf9f   : > { %v3193_v42 = vsel %vm3183_vm8, %v3179_v30, %v4391_v40 }
 0xfa0   : > { %v3192_v43 = vsel %vm3182_vm3, %v3174_v33, %v4390_v41 }
 0xfa1   : > { %v5168_v44 = vpack.c.bf16 %v3193_v42, %v3192_v43 }
 0xfa3   : > { %5169 = vmatpush3.bf16.msra.mxu1 %v5168_v44 }
 0xfa6   : > { %4956 = vmatmul.mubr.msk.f32.vlgmr.msra.gmra.mrb[48].mxu1 %vm1351_vm7, %v6324_v22 }
0x1079   : > { %v3260_v45 = vpop.f32.mrb[48].mxu1 }
0x107a   : > { %4393 = vst.msk [vmem:[%s6479_s20 + $0x4] sm:$0x3] %vm7378_vm1, %v3260_v45  ;;  %v4957_v46 = vpop.f32.mrb[49].mxu1 }
0x107b LB: >> { %s3290_s21 = scalar_lea.vmem %s7305_s2, %s6135_s11  ;;  %s4063_s18 = scalar_lea.vmem [#allocation3], %s6135_s11  ;;  %s6135_s11 = sphi %s7057_s11, %s3271_s11   ;;  %v6131_v54 = vphi %v6129_v54, %v6130_v54   ;;  %v6127_v53 = vphi %v6125_v53, %v6126_v53   ;;  %v6123_v52 = vphi %v6121_v52, %v6122_v52   ;;  %v6119_v51 = vphi %v6117_v51, %v6118_v51   ;;  %v6115_v50 = vphi %v6113_v50, %v6114_v50   ;;  %v6111_v49 = vphi %v6109_v49, %v6110_v49   ;;  %v6107_v48 = vphi %v6105_v48, %v6106_v48   ;;  %v6103_v47 = vphi %v6101_v47, %v6102_v47  }
0x107c   : >> { %v4394_v55 = vld [vmem:[%s4063_s18 + $0x11d] sm:$0xff]  ;;  %v4395_v56 = vld [vmem:[%s4063_s18 + $0x125] sm:$0xff]  ;;  %v4396_v57 = vld [vmem:[%s4063_s18 + $0x12d] sm:$0xff]  ;;  %s3271_s11 = sadd.s32 1, %s6135_s11  }
0x107d   : >> { %v4397_v58 = vld [vmem:[%s4063_s18 + $0x135] sm:$0xff]  ;;  %v4398_v59 = vld [vmem:[%s4063_s18 + $0x13d] sm:$0xff]  ;;  %v4399_v60 = vld [vmem:[%s4063_s18 + $0x145] sm:$0xff]  ;;  %p3268_p0 = scmp.ge.s32.totalorder %s3271_s11, 32  }
0x107e   : >> { %v4400_v61 = vld [vmem:[%s4063_s18 + $0x14d] sm:$0xff]  ;;  %v4401_v62 = vld [vmem:[%s4063_s18 + $0x155] sm:$0xff]  ;;  %v4402_v63 = vld [vmem:[%s3290_s21] ss:$0 sm:$0xff]  ;;  %vm7379_vm2 = vcmask (%p3268_p0), 129024   ;;  %3587 = vst.msk [vmem:[#allocation4] sm:$0xff] (%p3268_p0), %vm1351_vm7, %v6137_v2 }
0x107f   : >> { %v3296_v0 = vmul.f32 %v4402_v63, %v4394_v55  ;;  %v3297_v1 = vmul.f32 %v4402_v63, %v4395_v56  ;;  %v3298_v3 = vmul.f32 %v4402_v63, %v4396_v57  ;;  %v3299_v4 = vmul.f32 %v4402_v63, %v4397_v58  ;;  %3270 = sbr.rel (!%p3268_p0) target bundleno = 4219 (0x107b), region = 170  ;;  %v3327_v17 = vld [vmem:[%s7307_s4] sm:$0xff] (%p3268_p0)  ;;  %3590 = vst.msk [vmem:[#allocation4 + $0x18] sm:$0x7f] (%p3268_p0), %vm7379_vm2, %v6137_v2  ;;  %s7388_s26 = smov (%p3268_p0), 64  }
0x1080   : >> { %v3300_v5 = vmul.f32 %v4402_v63, %v4398_v59  ;;  %v3301_v6 = vmul.f32 %v4402_v63, %v4399_v60  ;;  %v3302_v7 = vmul.f32 %v4402_v63, %v4400_v61  ;;  %v3303_v8 = vmul.f32 %v4402_v63, %v4401_v62  ;;  %v4403_v18 = vld [vmem:[%s7306_s3] ss:$0 sm:$0xff] (%p3268_p0)  ;;  %4958 = vmatprep.subr.mxu1 (%p3268_p0), %v3327_v17  ;;  %s7389_s0 = smov (%p3268_p0), 16   ;;  %s7390_s27 = smov (%p3268_p0), 32  }
0x1081   : >> { %v3304_v9 = vadd.f32 %v6131_v54, %v3296_v0   ;;  %v3305_v10 = vadd.f32 %v6127_v53, %v3297_v1   ;;  %v3306_v11 = vadd.f32 %v6123_v52, %v3298_v3   ;;  %v3307_v12 = vadd.f32 %v6119_v51, %v3299_v4   ;;  %4959 = vmatpush3.msra.mxu1 (%p3268_p0), %v3327_v17  ;;  %v4404_v30 = vld [vmem:[%s7308_s5] ss:$0 sm:$0xff] (%p3268_p0)  ;;  %s7392_s30 = smov (%p3268_p0), 80   ;;  %s7394_s12 = smov (%p3268_p0), 112  }
0x1082   : >> { %v3308_v13 = vadd.f32 %v6115_v50, %v3300_v5   ;;  %v3309_v14 = vadd.f32 %v6111_v49, %v3301_v6   ;;  %v3310_v15 = vadd.f32 %v6107_v48, %v3302_v7   ;;  %v3311_v16 = vadd.f32 %v6103_v47, %v3303_v8   ;;  %s4437_s1 = sshll.u32 (%p3268_p0), %s6225_s17, 7  ;;  %s7396_s11 = sand.u32 (%p3268_p0), 1, %s5983_s14  }
0x1083   : >> { %v6118_v51 = vmov %v3307_v12   ;;  %v6122_v52 = vmov %v3306_v11   ;;  %v6126_v53 = vmov %v3305_v10   ;;  %v6130_v54 = vmov %v3304_v9   ;;  %s7252_s28 = scalar_lea.hbm (%p3268_p0), %s7313_s10, %s4437_s1  ;;  %s7260_s25 = scalar_lea.sflag (%p3268_p0), [#allocation6], %s7396_s11 }
0x1084   : >> { %v6102_v47 = vmov %v3311_v16   ;;  %v6106_v48 = vmov %v3310_v15   ;;  %v6110_v49 = vmov %v3309_v14   ;;  %v6114_v50 = vmov %v3308_v13   ;;  %s6147_s17 = smov (%p3268_p0), [#allocation5]  }
0x1085   : > { %v3319_v20 = vadd.f32 (%p3268_p0), %v4403_v18, %v3304_v9  ;;  %v3320_v21 = vadd.f32 (%p3268_p0), %v4403_v18, %v3305_v10  ;;  %v3321_v23 = vadd.f32 (%p3268_p0), %v4403_v18, %v3306_v11  ;;  %vm7380_vm4 = vcmask (%p3268_p0), 64512   ;;  %s5789_s21 = sshll.u32 (%p3268_p0), %s6147_s17, 4  ;;  %s5790_s21 = int_to_ptr.vmem [resolvable:$false] %s5789_s21 }
0x1086   : > { %vm7381_vm5 = vmmov %vm7380_vm4  ;;  %v3322_v24 = vadd.f32 %v4403_v18, %v3307_v12  ;;  %v3323_v26 = vadd.f32 %v4403_v18, %v3308_v13  ;;  %v3324_v27 = vadd.f32 %v4403_v18, %v3309_v14  ;;  %v3325_v28 = vadd.f32 %v4403_v18, %v3310_v15  ;;  %s5791_s18 = scalar_lea.vmem %s5790_s21, 256 }
0x1087   : > { %4960 = vmatprep.mubr.msk.f32.mxu1 %vm7380_vm4, %v3319_v20  ;;  %vm7382_vm12 = vmmov %vm7380_vm4  ;;  %v3326_v29 = vadd.f32 %v4403_v18, %v3311_v16 }
0x1088   : > { %4961 = vmatmul.mubr.msk.f32.vlgmr.msra.gmra.mrb[50].mxu1 %vm7381_vm5, %v3320_v21  ;;  %vm7383_vm6 = vmmov %vm7380_vm4 }
0x1089   : > { %4963 = vmatprep.mubr.msk.f32.mxu1 %vm7382_vm12, %v3321_v23  ;;  %vm7384_vm8 = vmmov %vm7380_vm4 }
0x108a   : > { %vm7385_vm3 = vmmov %vm7380_vm4 }
0x108b   : > { %vm7386_vm1 = vmmov %vm7385_vm3 }
0x108c   : > { %4964 = vmatmul.mubr.msk.f32.gmra.mrb[52].mxu1 %vm7383_vm6, %v3322_v24  ;;  %vm7387_vm2 = vmmov %vm7386_vm1 }
0x108d   : > { %4966 = vmatprep.mubr.msk.f32.mxu1 %vm7384_vm8, %v3323_v26 }
0x1090   : > { %4967 = vmatmul.mubr.msk.f32.gmra.mrb[54].mxu1 %vm7385_vm3, %v3324_v27 }
0x1091   : > { %4969 = vmatprep.mubr.msk.f32.mxu1 %vm7386_vm1, %v3325_v28 }
0x1094   : > { %4970 = vmatmul.mubr.msk.f32.gmra.mrb[56].mxu1 %vm7387_vm2, %v3326_v29 }
0x1095   : > { %4988 = vmatprep.mubr.msk.f32.mxu1 %vm1269_vm14, %v6312_v19 }
0x115b   : > { %v4962_v32 = vpop.f32.mrb[50].mxu1 }
0x115c   : > { %v3431_v33 = vadd.f32 %v4962_v32, %v4404_v30  ;;  %v3425_v34 = vpop.f32.mrb[51].mxu1  ;;  %v3736_v32 = vld [vmem:[%s7309_s6 + $0x80] sm:$0xff] }
0x115d   : > { %v3426_v35 = vadd.f32 %v4404_v30, %v3425_v34  ;;  %v3720_v34 = vld [vmem:[%s7309_s6] sm:$0xff] }
0x115e   : > { %v3473_v36 = vmin.f32 %v3431_v33, 0.0  ;;  %vm3465_vm4 = vcmp.gt.f32.partialorder %v3431_v33, 0.0 }
0x115f   : > { %v3472_v37 = vmin.f32 %v3426_v35, 0.0  ;;  %v4965_v38 = vpop.f32.mrb[52].mxu1  ;;  %vm3464_vm5 = vcmp.gt.f32.partialorder %v3426_v35, 0.0 }
0x1160   : > { %v3482_v39 = vmul.f32 1.442695, %v3473_v36  ;;  %v3441_v40 = vadd.f32 %v4965_v38, %v4404_v30  ;;  %v3435_v41 = vpop.f32.mrb[53].mxu1  ;;  %v3721_v36 = vld [vmem:[%s7309_s6 + $0x8] sm:$0xff] }
0x1161   : > { %v3480_v42 = vmul.f32 1.442695, %v3472_v37  ;;  %v3436_v43 = vadd.f32 %v4404_v30, %v3435_v41  ;;  %v3739_v37 = vld [vmem:[%s7309_s6 + $0x98] sm:$0xff]  ;;  %v5188_v38 = vpack.c.bf16 %v3721_v36, %v3720_v34 }
0x1162   : > { %5765 = vpow2.f32 %v3482_v39  ;;  %v3475_v44 = vmin.f32 %v3441_v40, 0.0  ;;  %vm3467_vm12 = vcmp.gt.f32.partialorder %v3441_v40, 0.0  ;;  %v3723_v41 = vld [vmem:[%s7309_s6 + $0x18] sm:$0xff] }
0x1163   : > { %5767 = vpow2.f32 %v3480_v42  ;;  %v3474_v19 = vmin.f32 %v3436_v43, 0.0  ;;  %v4968_v45 = vpop.f32.mrb[54].mxu1  ;;  %vm3466_vm6 = vcmp.gt.f32.partialorder %v3436_v43, 0.0 }
0x1164   : > { %v3486_v46 = vmul.f32 1.442695, %v3475_v44  ;;  %v3451_v47 = vadd.f32 %v4968_v45, %v4404_v30  ;;  %v3445_v48 = vpop.f32.mrb[55].mxu1  ;;  %v3741_v44 = vld [vmem:[%s7309_s6 + $0xa8] sm:$0xff] }
0x1165   : > { %v3484_v49 = vmul.f32 1.442695, %v3474_v19  ;;  %v3446_v50 = vadd.f32 %v4404_v30, %v3445_v48  ;;  %v3724_v19 = vld [vmem:[%s7309_s6 + $0x20] sm:$0xff] }
0x1166   : > { %5769 = vpow2.f32 %v3486_v46  ;;  %v3477_v51 = vmin.f32 %v3451_v47, 0.0  ;;  %vm3469_vm8 = vcmp.gt.f32.partialorder %v3451_v47, 0.0  ;;  %v3725_v46 = vld [vmem:[%s7309_s6 + $0x28] sm:$0xff] }
0x1167   : > { %5771 = vpow2.f32 %v3484_v49  ;;  %v3476_v52 = vmin.f32 %v3446_v50, 0.0  ;;  %v4971_v53 = vpop.f32.mrb[56].mxu1  ;;  %vm3468_vm3 = vcmp.gt.f32.partialorder %v3446_v50, 0.0 }
0x1168   : > { %v3490_v54 = vmul.f32 1.442695, %v3477_v51  ;;  %v3461_v55 = vadd.f32 %v4971_v53, %v4404_v30  ;;  %v3455_v56 = vpop.f32.mrb[57].mxu1  ;;  %v3743_v51 = vld [vmem:[%s7309_s6 + $0xb8] sm:$0xff] }
0x1169   : > { %v3488_v57 = vmul.f32 1.442695, %v3476_v52  ;;  %v3456_v58 = vadd.f32 %v4404_v30, %v3455_v56  ;;  %v3726_v52 = vld [vmem:[%s7309_s6 + $0x30] sm:$0xff]  ;;  %v3744_v56 = vld [vmem:[%s7309_s6 + $0xc0] sm:$0xff] }
0x116a   : > { %5773 = vpow2.f32 %v3490_v54  ;;  %v3479_v59 = vmin.f32 %v3461_v55, 0.0  ;;  %vm3471_vm1 = vcmp.gt.f32.partialorder %v3461_v55, 0.0  ;;  %v3727_v54 = vld [vmem:[%s7309_s6 + $0x38] sm:$0xff] }
0x116b   : > { %5775 = vpow2.f32 %v3488_v57  ;;  %v3478_v60 = vmin.f32 %v3456_v58, 0.0  ;;  %vm3470_vm2 = vcmp.gt.f32.partialorder %v3456_v58, 0.0  ;;  %v3745_v57 = vld [vmem:[%s7309_s6 + $0xc8] sm:$0xff] }
0x116c   : > { %v5766_v61 = vpop.eup %5765  ;;  %v3494_v62 = vmul.f32 1.442695, %v3479_v59  ;;  %v5202_v59 = vpack.c.bf16 %v3745_v57, %v3744_v56  ;;  %v3591_v57 = vld [vmem:[#allocation4] sm:$0xff] }
0x116d   : > { %v5768_v63 = vpop.eup %5767  ;;  %v4414_v0 = vadd.f32 -1.0, %v5766_v61  ;;  %v3492_v1 = vmul.f32 1.442695, %v3478_v60  ;;  %v3729_v60 = vld [vmem:[%s7309_s6 + $0x48] sm:$0xff] }
0x116e   : > { %v4413_v3 = vadd.f32 -1.0, %v5768_v63  ;;  %5777 = vpow2.f32 %v3494_v62 }
0x116f   : > { %5779 = vpow2.f32 %v3492_v1  ;;  %v3505_v4 = vsel %vm3465_vm4, %v3431_v33, %v4414_v0  ;;  %v3737_v33 = vld [vmem:[%s7309_s6 + $0x88] sm:$0xff] }
0x1170   : > { %v5770_v5 = vpop.eup %5769  ;;  %v3504_v6 = vsel %vm3464_vm5, %v3426_v35, %v4413_v3  ;;  %v5186_v35 = vpack.c.bf16 %v3737_v33, %v3736_v32  ;;  %v3751_v32 = vld [vmem:[%s7309_s6 + $0xf8] sm:$0xff] }
0x1171   : > { %v5772_v7 = vpop.eup %5771  ;;  %v4416_v8 = vadd.f32 -1.0, %v5770_v5  ;;  %v5170_v9 = vpack.c.bf16 %v3505_v4, %v3504_v6 }
0x1172   : > { %v4415_v10 = vadd.f32 -1.0, %v5772_v7  ;;  %5187 = vmatprep.subr.bf16.mxu0 %v5186_v35 }
0x1173   : > { %5171 = vmatprep.subr.bf16.mxu1 %v5170_v9  ;;  %v3507_v11 = vsel %vm3467_vm12, %v3441_v40, %v4416_v8  ;;  %v3722_v40 = vld [vmem:[%s7309_s6 + $0x10] sm:$0xff]  ;;  %5189 = vmatpush3.bf16.msra.mxu0 %v5188_v38 }
0x1174   : > { %v5774_v12 = vpop.eup %5773  ;;  %5173 = vmatpush3.bf16.msra.mxu1 %v5170_v9  ;;  %v3506_v13 = vsel %vm3466_vm6, %v3436_v43, %v4415_v10  ;;  %v5192_v42 = vpack.c.bf16 %v3723_v41, %v3722_v40  ;;  %v3740_v43 = vld [vmem:[%s7309_s6 + $0xa0] sm:$0xff] }
0x1175   : > { %v5776_v14 = vpop.eup %5775  ;;  %v4418_v15 = vadd.f32 -1.0, %v5774_v12  ;;  %v5174_v16 = vpack.c.bf16 %v3507_v11, %v3506_v13  ;;  %v5194_v45 = vpack.c.bf16 %v3741_v44, %v3740_v43  ;;  %v3746_v13 = vld [vmem:[%s7309_s6 + $0xd0] sm:$0xff] }
0x1176   : > { %v4417_v17 = vadd.f32 -1.0, %v5776_v14  ;;  %v3747_v14 = vld [vmem:[%s7309_s6 + $0xd8] sm:$0xff] }
0x1177   : > { %5175 = vmatprep.subr.bf16.mxu1 %v5174_v16  ;;  %v3509_v18 = vsel %vm3469_vm8, %v3451_v47, %v4418_v15  ;;  %v5196_v47 = vpack.c.bf16 %v3725_v46, %v3724_v19  ;;  %v3730_v15 = vld [vmem:[%s7309_s6 + $0x50] sm:$0xff] }
0x1178   : > { %v5778_v20 = vpop.eup %5777  ;;  %5177 = vmatpush3.bf16.msra.mxu1 %v5174_v16  ;;  %v3508_v21 = vsel %vm3468_vm3, %v3446_v50, %v4417_v17  ;;  %v3742_v50 = vld [vmem:[%s7309_s6 + $0xb0] sm:$0xff]  ;;  %v3731_v16 = vld [vmem:[%s7309_s6 + $0x58] sm:$0xff]  ;;  %v5206_v17 = vpack.c.bf16 %v3747_v14, %v3746_v13 }
0x1179   : > { %v5780_v23 = vpop.eup %5779  ;;  %v4420_v24 = vadd.f32 -1.0, %v5778_v20  ;;  %v5178_v26 = vpack.c.bf16 %v3509_v18, %v3508_v21  ;;  %v5198_v53 = vpack.c.bf16 %v3743_v51, %v3742_v50  ;;  %v5208_v18 = vpack.c.bf16 %v3731_v16, %v3730_v15  ;;  %v3748_v20 = vld [vmem:[%s7309_s6 + $0xe0] sm:$0xff]  ;;  %v3749_v21 = vld [vmem:[%s7309_s6 + $0xe8] sm:$0xff] }
0x117a   : > { %v4419_v27 = vadd.f32 -1.0, %v5780_v23  ;;  %v5210_v23 = vpack.c.bf16 %v3749_v21, %v3748_v20 }
0x117b   : > { %5179 = vmatprep.subr.bf16.mxu1 %v5178_v26  ;;  %v3511_v28 = vsel %vm3471_vm1, %v3461_v55, %v4420_v24  ;;  %v5200_v55 = vpack.c.bf16 %v3727_v54, %v3726_v52  ;;  %v3732_v24 = vld [vmem:[%s7309_s6 + $0x60] sm:$0xff] }
0x117c   : > { %5181 = vmatpush3.bf16.msra.mxu1 %v5178_v26  ;;  %v3510_v29 = vsel %vm3470_vm2, %v3456_v58, %v4419_v27  ;;  %v3728_v58 = vld [vmem:[%s7309_s6 + $0x40] sm:$0xff]  ;;  %v3733_v26 = vld [vmem:[%s7309_s6 + $0x68] sm:$0xff] }
0x117d   : > { %v5182_v30 = vpack.c.bf16 %v3511_v28, %v3510_v29  ;;  %v5204_v63 = vpack.c.bf16 %v3729_v60, %v3728_v58  ;;  %v5212_v36 = vpack.c.bf16 %v3733_v26, %v3732_v24 }
0x117f   : > { %5183 = vmatprep.subr.bf16.mxu1 %v5182_v30 }
0x1180   : > { %5185 = vmatpush3.bf16.msra.mxu1 %v5182_v30  ;;  %v3750_v30 = vld [vmem:[%s7309_s6 + $0xf0] sm:$0xff] }
0x1181   : > { %v5214_v38 = vpack.c.bf16 %v3751_v32, %v3750_v30 }
0x1183   : > { %4989 = vmatmul.mubr.msk.f32.vlgmr.msra.gmra.mrb[58].mxu1 %vm1269_vm14, %v6331_v25  ;;  %v3738_v25 = vld [vmem:[%s7309_s6 + $0x90] sm:$0xff] }
0x1184   : > { %v5190_v39 = vpack.c.bf16 %v3739_v37, %v3738_v25  ;;  %v3734_v25 = vld [vmem:[%s7309_s6 + $0x70] sm:$0xff]  ;;  %v3735_v37 = vld [vmem:[%s7309_s6 + $0x78] sm:$0xff] }
0x1185   : > { %v5216_v43 = vpack.c.bf16 %v3735_v37, %v3734_v25 }
0x1186   : > { %5191 = vmatprep.subr.bf16.mxu0 %v5190_v39 }
0x1187   : > { %5193 = vmatpush3.bf16.msra.mxu0 %v5192_v42 }
0x1188   : > { %5195 = vmatprep.subr.bf16.mxu0 %v5194_v45 }
0x118b   : > { %5197 = vmatpush3.bf16.msra.mxu0 %v5196_v47 }
0x118c   : > { %5199 = vmatprep.subr.bf16.mxu0 %v5198_v53 }
0x118f   : > { %5201 = vmatpush3.bf16.msra.mxu0 %v5200_v55 }
0x1190   : > { %5203 = vmatprep.subr.bf16.mxu0 %v5202_v59 }
0x1193   : > { %5205 = vmatpush3.bf16.msra.mxu0 %v5204_v63 }
0x1194   : > { %5207 = vmatprep.subr.bf16.mxu0 %v5206_v17 }
0x1197   : > { %5209 = vmatpush3.bf16.msra.mxu0 %v5208_v18 }
0x1198   : > { %5211 = vmatprep.subr.bf16.mxu0 %v5210_v23 }
0x119b   : > { %5213 = vmatpush3.bf16.msra.mxu0 %v5212_v36 }
0x119c   : > { %5215 = vmatprep.subr.bf16.mxu0 %v5214_v38 }
0x119f   : > { %5217 = vmatpush3.bf16.msra.mxu0 %v5216_v43  ;;  %v4423_v43 = vld [vmem:[%s7310_s7] ss:$0 sm:$0xff] }
0x1256   : > { %v4990_v48 = vpop.f32.mrb[58].mxu1 }
0x1257   : > { %3589 = vst.msk [vmem:[#allocation4 + $0x10] sm:$0xff] %vm1351_vm7, %v4990_v48  ;;  %v3578_v49 = vpop.f32.mrb[59].mxu1 }
0x1258   : > { %3588 = vst.msk [vmem:[#allocation4 + $0x8] sm:$0xff] %vm1351_vm7, %v3578_v49 }
0x125e   : > { %v3611_v61 = vld [vmem:[#allocation4 + $0x14] sm:$0xff] }
0x125f   : > { %v3608_v62 = vld [vmem:[#allocation4 + $0x11] sm:$0xff]  ;;  %3684 = vrot.lane.b32.xlu0 %v3611_v61, %s7388_s26  ;;  %v3593_v0 = vld [vmem:[#allocation4 + $0x1] sm:$0xff]  ;;  %v3594_v1 = vld [vmem:[#allocation4 + $0x9] sm:$0xff] }
0x1260   : > { %3672 = vrot.lane.b32.xlu1 %v3608_v62, %s7389_s0  ;;  %v5730_v3 = vpack.i.bf16 %v3593_v0, %v3594_v1  ;;  %v3609_v4 = vld [vmem:[#allocation4 + $0x12] sm:$0xff]  ;;  %v3595_v5 = vld [vmem:[#allocation4 + $0x2] sm:$0xff]  ;;  %v3596_v6 = vld [vmem:[#allocation4 + $0xa] sm:$0xff] }
0x1261   : > { %v3610_v7 = vld [vmem:[#allocation4 + $0x13] sm:$0xff]  ;;  %v3597_v8 = vld [vmem:[#allocation4 + $0x3] sm:$0xff]  ;;  %v3598_v9 = vld [vmem:[#allocation4 + $0xb] sm:$0xff]  ;;  %v5735_v10 = vpack.i.bf16 %v3595_v5, %v3596_v6 }
0x1262   : > { %v3601_v11 = vld [vmem:[#allocation4 + $0x5] sm:$0xff]  ;;  %v3602_v12 = vld [vmem:[#allocation4 + $0xd] sm:$0xff]  ;;  %v5740_v27 = vpack.i.bf16 %v3597_v8, %v3598_v9  ;;  %v3612_v19 = vld [vmem:[#allocation4 + $0x15] sm:$0xff] }
0x1263   : > { %5731 = vrot.lane.b32.xlu0 %v5730_v3, %s7389_s0  ;;  %s7391_s0 = smov 48   ;;  %v5750_v28 = vpack.i.bf16 %v3601_v11, %v3602_v12  ;;  %v3599_v29 = vld [vmem:[#allocation4 + $0x4] sm:$0xff]  ;;  %v3600_v33 = vld [vmem:[#allocation4 + $0xc] sm:$0xff]  ;;  %v3614_v45 = vld [vmem:[#allocation4 + $0x17] sm:$0xff] }
0x1264   : > { %3676 = vrot.lane.b32.xlu1 %v3609_v4, %s7390_s27  ;;  %v3603_v34 = vld [vmem:[#allocation4 + $0x6] sm:$0xff]  ;;  %v3604_v35 = vld [vmem:[#allocation4 + $0xe] sm:$0xff]  ;;  %v5745_v39 = vpack.i.bf16 %v3599_v29, %v3600_v33  ;;  %v3613_v46 = vld [vmem:[#allocation4 + $0x16] sm:$0xff] }
0x1265   : > { %v5755_v40 = vpack.i.bf16 %v3603_v34, %v3604_v35  ;;  %v3605_v41 = vld [vmem:[#allocation4 + $0x7] sm:$0xff]  ;;  %v3606_v42 = vld [vmem:[#allocation4 + $0xf] sm:$0xff] }
0x1266   : > { %v5760_v44 = vpack.i.bf16 %v3605_v41, %v3606_v42  ;;  %v3607_v62 = vld [vmem:[#allocation4 + $0x10] sm:$0xff]  ;;  %v3592_v63 = vld [vmem:[#allocation4 + $0x8] sm:$0xff] }
0x1267   : > { %5736 = vrot.lane.b32.xlu0 %v5735_v10, %s7390_s27 }
0x1268   : > { %3680 = vrot.lane.b32.xlu1 %v3610_v7, %s7391_s0 }
0x126b   : > { %5751 = vrot.lane.b32.xlu0 %v5750_v28, %s7392_s30 }
0x126c   : > { %5741 = vrot.lane.b32.xlu1 %v5740_v27, %s7391_s0  ;;  %s7393_s0 = smov 96  }
0x126f   : > { %5756 = vrot.lane.b32.xlu0 %v5755_v40, %s7393_s0  ;;  %v3835_v40 = vld [vmem:[%s7311_s8 + $0x8] sm:$0xff] }
0x1270   : > { %5746 = vrot.lane.b32.xlu1 %v5745_v39, %s7388_s26  ;;  %v3834_v39 = vld [vmem:[%s7311_s8] sm:$0xff] }
0x1271   : > { %v5218_v41 = vpack.c.bf16 %v3835_v40, %v3834_v39 }
0x1273   : > { %5761 = vrot.lane.b32.xlu0 %v5760_v44, %s7394_s12  ;;  %5219 = vmatprep.subr.bf16.mxu1 %v5218_v41 }
0x1274   : > { %3688 = vrot.lane.b32.xlu1 %v3612_v19, %s7392_s30  ;;  %5221 = vmatpush3.bf16.msra.mxu1 %v5218_v41 }
0x1275   : > { %5222 = vmatprep.subr.bf16.mxu1 %v6145_v31  ;;  %v4424_v31 = vld [vmem:[%s7312_s9] ss:$0 sm:$0xff] }
0x1277   : > { %3692 = vrot.lane.b32.xlu0 %v3613_v46, %s7393_s0  ;;  %s4022_s0 = sshll.u32 %s6479_s20, 4  ;;  %s7254_s0 = int_to_ptr.vmem [resolvable:$true] %s4022_s0 }
0x1278   : > { %3696 = vrot.lane.b32.xlu1 %v3614_v45, %s7394_s12  ;;  %s5785_s30 = scalar_lea.vmem %s7254_s0, 128  ;;  %p5792_p4 = scmp.lt.s32.totalorder %s7254_s0, %s5790_s21 }
0x1279   : > { %p5786_p1 = scmp.ne.s32.totalorder %s7254_s0, %s5785_s30  ;;  %p5793_p7 = scmp.lt.s32.totalorder %s5791_s18, %s5785_s30 }
0x127b   : > { %p5787_p2 = pnand %p5786_p1, %p6242_p5  ;;  %p5794_p8 = por %p5793_p7, %p5792_p4 }
0x127d   : > { %p5788_p3 = pneg %p5787_p2 }
0x127f   : > { %p5795_p9 = pnand %p5794_p8, %p5788_p3 }
0x12d1   : > { %v3685_v47 = vpop.permute.xlu0 %3684 }
0x12d2   : > { %v3673_v48 = vpop.permute.xlu1 %3672 }
0x12d3   : > { %v3713_v0 = vsel %vm1351_vm7, %v3607_v62, %v3673_v48 }
0x12d5   : > { %v5732_v50 = vpop.permute.xlu0 %5731 }
0x12d6   : > { %v3677_v49 = vpop.permute.xlu1 %3676  ;;  %v5734_v53 = vunpack.i.h.bf16 %v5732_v50  ;;  %v5733_v54 = vunpack.i.l.bf16 %v5732_v50 }
0x12d7   : > { %v3714_v14 = vsel %vm1467_vm9, %v3713_v0, %v3677_v49 }
0x12d8   : > { %v3699_v1 = vsel %vm1351_vm7, %v3591_v57, %v5734_v53  ;;  %v3700_v3 = vsel %vm1351_vm7, %v3592_v63, %v5733_v54 }
0x12d9   : > { %v5737_v52 = vpop.permute.xlu0 %5736 }
0x12da   : > { %v3681_v51 = vpop.permute.xlu1 %3680  ;;  %v5739_v58 = vunpack.i.h.bf16 %v5737_v52  ;;  %v5738_v59 = vunpack.i.l.bf16 %v5737_v52 }
0x12db   : > { %v3715_v18 = vsel %vm1470_vm10, %v3714_v14, %v3681_v51 }
0x12dc   : > { %v3701_v6 = vsel %vm1467_vm9, %v3699_v1, %v5739_v58  ;;  %v3702_v7 = vsel %vm1467_vm9, %v3700_v3, %v5738_v59  ;;  %v3716_v32 = vsel %vm1269_vm14, %v3715_v18, %v3685_v47 }
0x12dd   : > { %v5752_v56 = vpop.permute.xlu0 %5751 }
0x12de   : > { %v5742_v55 = vpop.permute.xlu1 %5741  ;;  %v5754_v12 = vunpack.i.h.bf16 %v5752_v56  ;;  %v5753_v13 = vunpack.i.l.bf16 %v5752_v56 }
0x12df   : > { %v5744_v60 = vunpack.i.h.bf16 %v5742_v55  ;;  %v5743_v61 = vunpack.i.l.bf16 %v5742_v55 }
0x12e1   : > { %v5757_v5 = vpop.permute.xlu0 %5756  ;;  %v3703_v10 = vsel %vm1470_vm10, %v3701_v6, %v5744_v60  ;;  %v3704_v11 = vsel %vm1470_vm10, %v3702_v7, %v5743_v61  ;;  %vm7395_vm10 = vcmask 123904  }
0x12e2   : > { %v5747_v4 = vpop.permute.xlu1 %5746  ;;  %v5758_v16 = vunpack.i.l.bf16 %v5757_v5  ;;  %v5759_v20 = vunpack.i.h.bf16 %v5757_v5 }
0x12e3   : > { %v5749_v8 = vunpack.i.h.bf16 %v5747_v4  ;;  %v5748_v9 = vunpack.i.l.bf16 %v5747_v4 }
0x12e5   : > { %v3705_v15 = vsel %vm1269_vm14, %v3703_v10, %v5749_v8  ;;  %v3706_v17 = vsel %vm1269_vm14, %v3704_v11, %v5748_v9  ;;  %v5762_v23 = vpop.permute.xlu0 %5761 }
0x12e6   : > { %v3689_v21 = vpop.permute.xlu1 %3688  ;;  %v3708_v24 = vsel %vm1475_vm11, %v3706_v17, %v5753_v13  ;;  %v3707_v26 = vsel %vm1475_vm11, %v3705_v15, %v5754_v12  ;;  %v5764_v27 = vunpack.i.h.bf16 %v5762_v23  ;;  %v5763_v28 = vunpack.i.l.bf16 %v5762_v23 }
0x12e7   : > { %v3710_v29 = vsel %vm1478_vm13, %v3708_v24, %v5758_v16  ;;  %v3709_v30 = vsel %vm1478_vm13, %v3707_v26, %v5759_v20  ;;  %v3717_v35 = vsel %vm1475_vm11, %v3716_v32, %v3689_v21 }
0x12e8   : > { %v3712_v33 = vsel %vm1481_vm15, %v3710_v29, %v5763_v28  ;;  %v3711_v34 = vsel %vm1481_vm15, %v3709_v30, %v5764_v27 }
0x12e9   : > { %v3693_v25 = vpop.permute.xlu0 %3692  ;;  %3823 = vmatprep.mubr.f32.mxu0 %v3712_v33 }
0x12ea   : > { %v3697_v36 = vpop.permute.xlu1 %3696  ;;  %v3718_v37 = vsel %vm1478_vm13, %v3717_v35, %v3693_v25  ;;  %3824 = vmatmul.mubr.f32.vlgmr.msra.gmra.mrb[52].mxu0 %v3711_v34 }
0x12eb   : > { %v3719_v38 = vsel %vm1481_vm15, %v3718_v37, %v3697_v36 }
0x12ec   : > { %3828 = vmatprep.mubr.f32.mxu0 %v3719_v38 }
0x12ee   : > { %3829 = vmatmul.mubr.f32.gmra.mrb[54].mxu0 %v3712_v33 }
0x13bd   : > { %v4730_v42 = vpop.f32.mrb[52].mxu0 }
0x13be   : > { %v4731_v44 = vpop.f32.mrb[53].mxu0 }
0x13bf   : > { %v4732_v19 = vadd.f32 %v4731_v44, %v4730_v42 }
0x13c1   : > { %v3826_v45 = vadd.f32 %v4732_v19, %v4423_v43  ;;  %v4733_v46 = vpop.f32.mrb[54].mxu0 }
0x13c2   : > { %v4734_v47 = vpop.f32.mrb[55].mxu0 }
0x13c3   : > { %v4735_v48 = vadd.f32 %v4734_v47, %v4733_v46  ;;  %4995 = vmatprep.mubr.msk.f32.mxu1 %vm1351_vm7, %v3826_v45 }
0x13c5   : > { %v3831_v49 = vadd.f32 %v4735_v48, %v4423_v43 }
0x13c7   : > { %4996 = vmatmul.mubr.msk.f32.vlgmr.msra.gmra.mrb[60].mxu1 %vm1351_vm7, %v3831_v49 }
0x13c8   : > { %5002 = vmatprep.mubr.msk.f32.mxu1 %vm6146_vm0, %v6137_v2 }
0x149a   : > { %v4997_v50 = vpop.f32.mrb[60].mxu1 }
0x149b   : > { %v3921_v51 = vadd.f32 %v4997_v50, %v4424_v31  ;;  %v3915_v52 = vpop.f32.mrb[61].mxu1 }
0x149c   : > { %v3916_v53 = vadd.f32 %v4424_v31, %v3915_v52 }
0x149d   : > { %v3927_v54 = vmin.f32 %v3921_v51, 0.0  ;;  %vm3925_vm14 = vcmp.gt.f32.partialorder %v3921_v51, 0.0 }
0x149e   : > { %v3926_v55 = vmin.f32 %v3916_v53, 0.0  ;;  %vm3924_vm9 = vcmp.gt.f32.partialorder %v3916_v53, 0.0 }
0x149f   : > { %v3930_v56 = vmul.f32 1.442695, %v3927_v54 }
0x14a0   : > { %v3928_v57 = vmul.f32 1.442695, %v3926_v55 }
0x14a1   : > { %5781 = vpow2.f32 %v3930_v56 }
0x14a2   : > { %5783 = vpow2.f32 %v3928_v57 }
0x14ab   : > { %v5782_v58 = vpop.eup %5781 }
0x14ac   : > { %v5784_v59 = vpop.eup %5783  ;;  %v4428_v2 = vadd.f32 -1.0, %v5782_v58 }
0x14ad   : > { %v4427_v60 = vadd.f32 -1.0, %v5784_v59 }
0x14ae   : > { %v3935_v61 = vsel %vm3925_vm14, %v3921_v51, %v4428_v2 }
0x14af   : > { %v3934_v62 = vsel %vm3924_vm9, %v3916_v53, %v4427_v60 }
0x14b0   : > { %v5223_v63 = vpack.c.bf16 %v3935_v61, %v3934_v62 }
0x14b2   : > { %5224 = vmatpush3.bf16.msra.mxu1 %v5223_v63 }
0x14b5   : > { %5003 = vmatmul.mubr.msk.f32.vlgmr.msra.gmra.mrb[62].mxu1 %vm1351_vm7, %v6324_v22 }
0x1588   : > { %v4002_v0 = vpop.f32.mrb[62].mxu1 }
0x1589   : > { %4430 = vst.msk [vmem:[%s6479_s20 + $0x6] sm:$0x3] %vm7395_vm10, %v4002_v0  ;;  %v5004_v1 = vpop.f32.mrb[63].mxu1 }
0x158a   : > { %5798 = shalt.err (!%p5795_p9)
}
0x158b   : > { %s5799_s20 = scalar_lea.hbm %s7252_s28, 128  ;;  %s5803_s12 = scalar_lea.hbm %s7313_s10, 256 }
0x158c   : > { %p5800_p10 = scmp.ne.s32.totalorder %s7252_s28, %s5799_s20  ;;  %p5804_p13 = scmp.lt.u32.totalorder %s7252_s28, %s7313_s10 }
0x158d   : > { %p5805_p0 = scmp.lt.u32.totalorder %s5803_s12, %s5799_s20  ;;  %p5807_p2 = scmp.lt.u32.totalorder %s5799_s20, %s7252_s28 }
0x158e   : > { %p5801_p11 = pnand %p5800_p10, %p6242_p5 }
0x158f   : > { %p5806_p1 = por %p5805_p0, %p5804_p13 }
0x1590   : > { %p5802_p12 = pneg %p5801_p11 }
0x1591   : > { %p5808_p3 = por %p5807_p2, %p5806_p1 }
0x1593   : > { %p5809_p4 = pnand %p5808_p3, %p5802_p12 }
0x1595   : > { %5812 = shalt.err (!%p5809_p4)
}
0x1596   : > { %s6148_s30 = smov 2  }
0x1597   : > { %5227 = dma.vmem_to_hbm [thread:$0]  (%p6242_p5), %s7254_s0, 128, %s7252_s28, %s7260_s25, %s7390_s27, %s7390_s27, %s6148_s30  }
0x1598 PF: > { %p5233_p7 = scmp.ge.s32.totalorder %s5991_s16, 2  ;;  %s4037_s17 = sand.u32 1, %s5979_s13  }
0x1599   : > { %s4038_s21 = scalar_lea.sflag [#allocation6], %s4037_s17 }
0x159a   : > { %p5230_p8 = pnand %p5233_p7, %p6246_p6 }
0x159c   : > { %5974 = dma.done.wait (!%p5230_p8), %s4038_s21, 128  }
0x159d   : > { %5976 = vsyncadd (!%p5230_p8), %s4038_s21, 4294967168  ;;  %p20_p9 = scmp.ge.s32.totalorder %s6229_s19, 4   ;;  %s7397_s13 = smov %s5983_s14 }
0x159e   : > { %s7398_s14 = smov %s5987_s15  ;;  %s7399_s15 = smov %s6240_s22 }
0x159f   : > { %s7400_s16 = smov %s6229_s19  ;;  %22 = sbr.rel (!%p20_p9) target bundleno = 6 (0x6), region = 181 }
0x15a6   :  { %4043 = vsyncpa [#allocation6], 1 }
0x15a7   :  { %4045 = vsyncpa [#allocation6 + $0x1], 1 }

</bundles_post_ra>
